<compile_context>
chip_gen: v7x
topology: tpu7x:2x2x1
jax: 0.10.0
libtpu: 0.0.40
codegen_flags: <defaults>
</compile_context>

<pallas_src>
import math
from functools import partial

import jax
import jax.numpy as jnp
from jax.experimental import pallas as pl
from jax.experimental.pallas import tpu as pltpu

# ---------------- small synthetic config (stand-in for vit_base_patch16_384) ----
PATCH = 16
IMG = 32                      # real model: 384
IN_CH = 3
EMBED_DIM = 64                # IMG_FEATURE_DIM_vit (real: 768)
NUM_HEADS = 4                 # real: 12
HEAD_DIM = EMBED_DIM // NUM_HEADS
MLP_DIM = EMBED_DIM * 4
DEPTH = 2                     # real: 12
HIDDEN_DIM_1 = 32             # model_cfg.HIDDEN_DIM_1
HIDDEN_DIM_2 = 32             # model_cfg.HIDDEN_DIM_2
LN_EPS = 1e-6                 # timm ViT LayerNorm eps

NUM_PATCHES = (IMG // PATCH) ** 2
N_TOKENS = NUM_PATCHES + 1
N_PAD = ((N_TOKENS + 7) // 8) * 8     # (8,·)-aligned token axis; padded keys masked


# ---------------- per-generation VMEM budget ------------------------------------
def _vmem_limit_bytes():
    # Leave headroom below physical VMEM (review: ~48 MiB on v7x, 64-100 MiB v5e/v6e).
    try:
        cap = int(pltpu.get_tpu_info().vmem_capacity_bytes)
    except Exception:
        cap = 128 * 1024 * 1024
    return max(32 * 1024 * 1024, min(cap - 16 * 1024 * 1024, 100 * 1024 * 1024))


VMEM_LIMIT = _vmem_limit_bytes()


def _cparams(semantics):
    return pltpu.CompilerParams(dimension_semantics=semantics,
                                vmem_limit_bytes=VMEM_LIMIT)


def _spec(block_shape, index_map, buffer_count=None):
    # buffer_count=1 -> don't double-buffer operands whose block never changes.
    if buffer_count is not None and hasattr(pl, "Buffered"):
        try:
            return pl.BlockSpec(block_shape, index_map,
                                pipeline_mode=pl.Buffered(buffer_count))
        except TypeError:       # older Pallas without pipeline_mode kwarg
            pass
    return pl.BlockSpec(block_shape, index_map)


# ---------------- in-kernel helpers -------------------------------------------
def _layer_norm(x, g, b, eps=LN_EPS):
    mu = jnp.mean(x, axis=-1, keepdims=True)
    var = jnp.mean((x - mu) ** 2, axis=-1, keepdims=True)   # population var (PyTorch LN)
    return (x - mu) * jax.lax.rsqrt(var + eps) * g + b


def _gelu_exact(x):
    # PyTorch nn.GELU() default = exact erf GELU
    return 0.5 * x * (1.0 + jax.lax.erf(x * 0.7071067811865476))


# ---------------- patch embedding (matmul + bias + pos fused, bf16 out) ----------
def patch_embed_kernel(x_ref, w_ref, b_ref, pos_ref, o_ref):
    y = jnp.dot(x_ref[0], w_ref[...], preferred_element_type=jnp.float32)
    o_ref[0] = (y + b_ref[...] + pos_ref[...]).astype(o_ref.dtype)


def patch_embed(patches, w, b, pos_patch):
    B, P, K = patches.shape
    D = w.shape[1]
    tile = P                      # per-image row tile (576 real / 4 toy); fits VMEM easily
    return pl.pallas_call(
        patch_embed_kernel,
        out_shape=jax.ShapeDtypeStruct((B, P, D), jnp.bfloat16),
        grid=(B, P // tile),
        in_specs=[pl.BlockSpec((1, tile, K), lambda bi, j: (bi, j, 0)),
                  _spec((K, D), lambda bi, j: (0, 0), buffer_count=1),
                  _spec((1, D), lambda bi, j: (0, 0), buffer_count=1),
                  pl.BlockSpec((tile, D), lambda bi, j: (j, 0))],
        out_specs=pl.BlockSpec((1, tile, D), lambda bi, j: (bi, j, 0)),
        compiler_params=_cparams(("parallel", "parallel")),
    )(patches, w, b, pos_patch)


# ---------------- fused ViT blocks (all DEPTH layers, residual resident in VMEM) --
def fused_vit_kernel(cls_ref, patch_ref,
                     ln1_g, ln1_b, qkv_w, qkv_b, proj_w, proj_b,
                     ln2_g, ln2_b, fc1_w, fc1_b, fc2_w, fc2_b,
                     o_ref, cls_out_ref,
                     qkvT_scr, acc_scr,
                     *, num_heads, n_real, scale):
    l = pl.program_id(1)
    n_pad, dim = o_ref.shape[1], o_ref.shape[2]
    dh = dim // num_heads
    n_patch = patch_ref.shape[1]

    # ---- layer 0: assemble [cls+pos0 | patch tokens (+pos) | zero pad] in fp32 ----
    @pl.when(l == 0)
    def _():
        o_ref[0, 0:1, :] = cls_ref[...].astype(jnp.float32)
        o_ref[0, 1:1 + n_patch, :] = patch_ref[0].astype(jnp.float32)
        if n_pad > n_real:                      # static: zero the padded token rows
            o_ref[0, n_real:, :] = jnp.zeros((n_pad - n_real, dim), jnp.float32)

    x = o_ref[0]                                # (N, D) fp32, resident across layers

    # ---- attention: x += concat_h(softmax(q k^T * scale) v) @ Wp + bp ------------
    h = _layer_norm(x, ln1_g[...], ln1_b[...]).astype(jnp.bfloat16)
    # ONE full-width QKV matmul (contraction = D) emitted transposed (3D, N) so the
    # per-head loop can slice heads off the sublane axis with pl.ds.
    qkvT = jax.lax.dot_general(qkv_w[...], h, (((1,), (1,)), ((), ())),
                               preferred_element_type=jnp.float32)        # (3D, N)
    qkvT_scr[...] = (qkvT + qkv_b[...]).astype(jnp.bfloat16)

    if n_pad > n_real:
        kmask = jnp.where(
            jax.lax.broadcasted_iota(jnp.int32, (1, n_pad), 1) < n_real, 0.0, -1e30)
    else:
        kmask = None

    acc_scr[...] = jnp.zeros_like(acc_scr)

    @pl.loop(0, num_heads)                      # bounded live range: one head at a time
    def _attn_head(hd):
        off = pl.multiple_of(hd * dh, dh)
        q = qkvT_scr[pl.ds(off, dh), :]                         # (dh, N) bf16
        k = qkvT_scr[pl.ds(dim + off, dh), :]
        v = qkvT_scr[pl.ds(2 * dim + off, dh), :]
        s = jax.lax.dot_general(q, k, (((0,), (0,)), ((), ())),
                                preferred_element_type=jnp.float32) * scale
        if kmask is not None:
            s = s + kmask                                       # mask padded keys
        s = s - jnp.max(s, axis=-1, keepdims=True)
        p = jnp.exp(s)
        p = p * pl.reciprocal(jnp.sum(p, axis=-1, keepdims=True), approx=True)
        outT = jax.lax.dot_general(v, p.astype(jnp.bfloat16), (((1,), (1,)), ((), ())),
                                   preferred_element_type=jnp.float32)   # (dh, N)
        wp = proj_w[pl.ds(off, dh), :]                          # (dh, D) bf16
        acc_scr[...] += jax.lax.dot_general(outT.astype(jnp.bfloat16), wp,
                                            (((0,), (0,)), ((), ())),
                                            preferred_element_type=jnp.float32)

    x = x + acc_scr[...] + proj_b[...]

    # ---- MLP: x += fc2(gelu(fc1(LN2(x)))) ---------------------------------------
    h2 = _layer_norm(x, ln2_g[...], ln2_b[...]).astype(jnp.bfloat16)
    h2 = jnp.dot(h2, fc1_w[...], preferred_element_type=jnp.float32) + fc1_b[...]
    h2 = _gelu_exact(h2)
    h2 = jnp.dot(h2.astype(jnp.bfloat16), fc2_w[...],
                 preferred_element_type=jnp.float32) + fc2_b[...]
    x = x + h2

    o_ref[0] = x                                # residual stays fp32, stays in VMEM
    cls_out_ref[0, 0] = x[0:1, :]               # per-layer CLS side output


def vit_blocks(cls_row, patch_tok, stacked):
    B, n_patch, D = patch_tok.shape
    L = stacked["qkv_w"].shape[0]
    scale = 1.0 / math.sqrt(HEAD_DIM)

    def lspec(shape):
        nd = len(shape) - 1
        return pl.BlockSpec((None,) + tuple(shape[1:]),
                            lambda bi, li, _n=nd: (li,) + (0,) * _n)

    names = ("ln1_g", "ln1_b", "qkv_w", "qkv_b", "proj_w", "proj_b",
             "ln2_g", "ln2_b", "fc1_w", "fc1_b", "fc2_w", "fc2_b")
    weights = [stacked[n] for n in names]

    in_specs = ([_spec((1, D), lambda bi, li: (0, 0), buffer_count=1),        # cls+pos0
                 pl.BlockSpec((1, n_patch, D), lambda bi, li: (bi, 0, 0))]    # patch tokens
                + [lspec(w.shape) for w in weights])

    out_specs = (pl.BlockSpec((1, N_PAD, D), lambda bi, li: (bi, 0, 0)),      # resident residual
                 pl.BlockSpec((1, 1, 1, D), lambda bi, li: (li, bi, 0, 0)))   # per-layer CLS

    x_out, cls_all = pl.pallas_call(
        partial(fused_vit_kernel, num_heads=NUM_HEADS, n_real=N_TOKENS, scale=scale),
        out_shape=(jax.ShapeDtypeStruct((B, N_PAD, D), jnp.float32),
                   jax.ShapeDtypeStruct((L, B, 1, D), jnp.float32)),
        grid=(B, L),
        in_specs=in_specs,
        out_specs=out_specs,
        scratch_shapes=[pltpu.VMEM((3 * D, N_PAD), jnp.bfloat16),   # head-major QKV
                        pltpu.VMEM((N_PAD, D), jnp.float32)],       # attention-proj acc
        compiler_params=_cparams(("parallel", "arbitrary")),
    )(cls_row, patch_tok, *weights)
    return x_out, cls_all


# ---------------- head: final LN (CLS row) + FakeTransformer + F.normalize -------
def head_kernel(cls_ref, ng_ref, nb_ref, w1_ref, b1_ref, w2_ref, b2_ref,
                pre_ref, nrm_ref):
    # backbone final LayerNorm applied to the CLS row only == norm(x)[:, 0]
    x = _layer_norm(cls_ref[...].astype(jnp.float32), ng_ref[...], nb_ref[...])
    h = jnp.dot(x.astype(jnp.bfloat16), w1_ref[...],
                preferred_element_type=jnp.float32) + b1_ref[...]
    h = jnp.maximum(h, 0.0)
    y = jnp.dot(h.astype(jnp.bfloat16), w2_ref[...],
                preferred_element_type=jnp.float32) + b2_ref[...]
    pre_ref[...] = y
    n = jnp.sqrt(jnp.sum(y * y, axis=-1, keepdims=True))
    nrm_ref[...] = y / jnp.maximum(n, 1e-12)


def head(cls_feat, params):
    B = cls_feat.shape[0]
    args = (cls_feat, params["norm_g"], params["norm_b"],
            params["fc1_w"], params["fc1_b"], params["fc2_w"], params["fc2_b"])
    return pl.pallas_call(
        head_kernel,
        out_shape=(jax.ShapeDtypeStruct((B, HIDDEN_DIM_2), jnp.float32),
                   jax.ShapeDtypeStruct((B, HIDDEN_DIM_2), jnp.float32)),
        grid=(1,),
        in_specs=[_spec(a.shape, lambda i, _n=len(a.shape): (0,) * _n, buffer_count=1)
                  for a in args],
        out_specs=(pl.BlockSpec((B, HIDDEN_DIM_2), lambda i: (0, 0)),
                   pl.BlockSpec((B, HIDDEN_DIM_2), lambda i: (0, 0))),
        compiler_params=_cparams(("arbitrary",)),
    )(*args)


# ---------------- deterministic parameter init ----------------------------------
def init_params(key):
    keys = iter(jax.random.split(key, 32))

    def nrm(shape, std=0.02, dtype=jnp.bfloat16):
        return (std * jax.random.normal(next(keys), shape, jnp.float32)).astype(dtype)

    patch_dim = IN_CH * PATCH * PATCH
    p = {
        # Conv2d(3, D, k=16, s=16) weight flattened to (C*p*p, D) (W.T of im2col)
        "patch_w": nrm((patch_dim, EMBED_DIM)),                      # bf16
        "patch_b": jnp.zeros((1, EMBED_DIM), jnp.float32),
        "cls": nrm((1, EMBED_DIM), dtype=jnp.float32),
        "pos": nrm((N_TOKENS, EMBED_DIM), dtype=jnp.float32),
        "norm_g": jnp.ones((1, EMBED_DIM), jnp.float32),
        "norm_b": jnp.zeros((1, EMBED_DIM), jnp.float32),
        # FakeTransformer 'imgFC_vit_0' (Linear weights stored transposed: (in, out))
        "fc1_w": nrm((EMBED_DIM, HIDDEN_DIM_1)),                     # bf16
        "fc1_b": jnp.zeros((1, HIDDEN_DIM_1), jnp.float32),
        "fc2_w": nrm((HIDDEN_DIM_1, HIDDEN_DIM_2)),                  # bf16
        "fc2_b": jnp.zeros((1, HIDDEN_DIM_2), jnp.float32),
    }
    # stacked per-layer transformer weights, streamed by the layer grid axis
    p["blocks"] = {
        "ln1_g": jnp.ones((DEPTH, 1, EMBED_DIM), jnp.float32),
        "ln1_b": jnp.zeros((DEPTH, 1, EMBED_DIM), jnp.float32),
        # qkv kept in PyTorch (out, in) layout -> transposed-output matmul,
        # heads contiguous on the sublane axis.
        "qkv_w": nrm((DEPTH, 3 * EMBED_DIM, EMBED_DIM)),             # bf16
        "qkv_b": jnp.zeros((DEPTH, 3 * EMBED_DIM, 1), jnp.float32),
        # proj stored (in, out) so per-head input rows slice on the sublane axis
        "proj_w": nrm((DEPTH, EMBED_DIM, EMBED_DIM)),                # bf16
        "proj_b": jnp.zeros((DEPTH, 1, EMBED_DIM), jnp.float32),
        "ln2_g": jnp.ones((DEPTH, 1, EMBED_DIM), jnp.float32),
        "ln2_b": jnp.zeros((DEPTH, 1, EMBED_DIM), jnp.float32),
        "fc1_w": nrm((DEPTH, EMBED_DIM, MLP_DIM)),                   # bf16
        "fc1_b": jnp.zeros((DEPTH, 1, MLP_DIM), jnp.float32),
        "fc2_w": nrm((DEPTH, MLP_DIM, EMBED_DIM)),                   # bf16
        "fc2_b": jnp.zeros((DEPTH, 1, EMBED_DIM), jnp.float32),
    }
    return p


# ---------------- forward (== ImgLearnableEncoder.forward) ----------------------
def img_learnable_encoder_forward(params, img):
    B, C, H, W = img.shape
    ph, pw = H // PATCH, W // PATCH
    num_patches = ph * pw

    # --- backbone_vit.forward_features -----------------------------------------
    # Conv2d(k=16, s=16) as im2col (XLA glue) + Pallas matmul fused with +bias +pos, bf16 out
    patches = img.reshape(B, C, ph, PATCH, pw, PATCH)
    patches = patches.transpose(0, 2, 4, 1, 3, 5).reshape(
        B, num_patches, C * PATCH * PATCH).astype(jnp.bfloat16)
    pos_patch = params["pos"][1:]                              # (num_patches, D)
    patch_tok = patch_embed(patches, params["patch_w"], params["patch_b"], pos_patch)

    cls_row = params["cls"] + params["pos"][0:1]               # (1, D), shared by all images

    # all DEPTH transformer blocks in one fused pallas_call (fp32 residual stays in VMEM)
    _, cls_all = vit_blocks(cls_row, patch_tok, params["blocks"])

    feature_list = []
    for l in range(DEPTH):
        # TODO(synk): the modified timm backbone's exact feature_list contents are not in the
        # provided snippet; we collect the per-block CLS token here.
        feature_list.append(cls_all[l, :, 0, :])
    cls_feat = cls_all[DEPTH - 1, :, 0, :]

    # --- final LN (CLS row) + learnable['imgFC_vit_0'] + F.normalize, fused ------
    imgFea_vit, imgFea_vit_norm = head(cls_feat, params)
    feature_list.append(imgFea_vit)
    feature_list.append(imgFea_vit_norm)
    return feature_list


# ---------------- main -----------------------------------------------------------
if __name__ == "__main__":
    key = jax.random.PRNGKey(0)
    pkey, xkey = jax.random.split(key)
    params = init_params(pkey)
    img = jax.random.normal(xkey, (2, IN_CH, IMG, IMG), jnp.float32)   # NCHW

    feats = jax.jit(img_learnable_encoder_forward)(params, img)
    for f in feats:
        jax.block_until_ready(f)

    # light sanity checks
    assert feats[-1].shape == (2, HIDDEN_DIM_2)
    assert feats[-2].shape == (2, HIDDEN_DIM_2)
    assert all(bool(jnp.all(jnp.isfinite(f.astype(jnp.float32)))) for f in feats)
    norms = jnp.linalg.norm(feats[-1], axis=-1)
    assert bool(jnp.all(jnp.abs(norms - 1.0) < 1e-4))
    print("KERNEL_OK")
</pallas_src>

<mosaic_0001>
module attributes {stable_mosaic.version = 11 : i64} {
  func.func @patch_embed_kernel(%arg0: i32, %arg1: i32, %arg2: memref<1x4x768xbf16, #tpu.memory_space<vmem>>, %arg3: memref<768x64xbf16, #tpu.memory_space<vmem>>, %arg4: memref<1x64xf32, #tpu.memory_space<vmem>>, %arg5: memref<4x64xf32, #tpu.memory_space<vmem>>, %arg6: memref<1x4x64xbf16, #tpu.memory_space<vmem>>) attributes {dimension_semantics = [#tpu.dimension_semantics<parallel>, #tpu.dimension_semantics<parallel>], iteration_bounds = array<i64: 2, 1>, scalar_prefetch = 0 : i64, scratch_operands = 0 : i64, tpu.core_type = #tpu.core_type<tc>, window_params = [{transform_indices = @transform_0, window_bounds = array<i64: 1, 4, 768>}, {pipeline_mode = #tpu.pipeline_mode<synchronous>, transform_indices = @transform_1, window_bounds = array<i64: 768, 64>}, {pipeline_mode = #tpu.pipeline_mode<synchronous>, transform_indices = @transform_2, window_bounds = array<i64: 1, 64>}, {transform_indices = @transform_3, window_bounds = array<i64: 4, 64>}, {transform_indices = @transform_4, window_bounds = array<i64: 1, 4, 64>}]} {
    %c0 = arith.constant 0 : index
    %c0_0 = arith.constant 0 : index
    %c0_1 = arith.constant 0 : index
    %0 = vector.load %arg2[%c0, %c0_0, %c0_1] : memref<1x4x768xbf16, #tpu.memory_space<vmem>>, vector<1x4x768xbf16>
    %1 = vector.shape_cast %0 : vector<1x4x768xbf16> to vector<4x768xbf16>
    %c0_2 = arith.constant 0 : index
    %c0_3 = arith.constant 0 : index
    %2 = vector.load %arg3[%c0_2, %c0_3] : memref<768x64xbf16, #tpu.memory_space<vmem>>, vector<768x64xbf16>
    %cst = arith.constant dense<0.000000e+00> : vector<4x64xf32>
    %3 = tpu.matmul %1, %2, %cst {dimension_numbers = #tpu.dot_dimension_numbers<[1], [0], [0], [1], [0, 0, 1, 1], [], []>} : vector<4x768xbf16>, vector<768x64xbf16>, vector<4x64xf32> -> vector<4x64xf32>
    %c0_4 = arith.constant 0 : index
    %c0_5 = arith.constant 0 : index
    %4 = vector.load %arg4[%c0_4, %c0_5] : memref<1x64xf32, #tpu.memory_space<vmem>>, vector<1x64xf32>
    %5 = vector.broadcast %4 : vector<1x64xf32> to vector<4x64xf32>
    %6 = arith.addf %3, %5 : vector<4x64xf32>
    %c0_6 = arith.constant 0 : index
    %c0_7 = arith.constant 0 : index
    %7 = vector.load %arg5[%c0_6, %c0_7] : memref<4x64xf32, #tpu.memory_space<vmem>>, vector<4x64xf32>
    %8 = arith.addf %6, %7 : vector<4x64xf32>
    %9 = arith.truncf %8 : vector<4x64xf32> to vector<4x64xbf16>
    %c0_8 = arith.constant 0 : index
    %c0_9 = arith.constant 0 : index
    %c0_10 = arith.constant 0 : index
    %10 = vector.load %arg6[%c0_8, %c0_9, %c0_10] : memref<1x4x64xbf16, #tpu.memory_space<vmem>>, vector<1x4x64xbf16>
    %11 = vector.shape_cast %10 : vector<1x4x64xbf16> to vector<4x64xbf16>
    %12 = vector.shape_cast %9 : vector<4x64xbf16> to vector<1x4x64xbf16>
    tpu.vector_store %arg6[%c0_8, %c0_9, %c0_10], %12 {strides = array<i32>} : memref<1x4x64xbf16, #tpu.memory_space<vmem>>, vector<1x4x64xbf16>,
    return
  }
  func.func @transform_0(%arg0: i32, %arg1: i32) -> (i32, i32, i32) {
    %c0_i32 = arith.constant 0 : i32
    %c0_i32_0 = arith.constant 0 : i32
    return %arg0, %arg1, %c0_i32 : i32, i32, i32
  }
  func.func @transform_1(%arg0: i32, %arg1: i32) -> (i32, i32) {
    %c0_i32 = arith.constant 0 : i32
    %c0_i32_0 = arith.constant 0 : i32
    %c0_i32_1 = arith.constant 0 : i32
    return %c0_i32, %c0_i32_0 : i32, i32
  }
  func.func @transform_2(%arg0: i32, %arg1: i32) -> (i32, i32) {
    %c0_i32 = arith.constant 0 : i32
    %c0_i32_0 = arith.constant 0 : i32
    %c0_i32_1 = arith.constant 0 : i32
    return %c0_i32, %c0_i32_0 : i32, i32
  }
  func.func @transform_3(%arg0: i32, %arg1: i32) -> (i32, i32) {
    %c0_i32 = arith.constant 0 : i32
    %c0_i32_0 = arith.constant 0 : i32
    return %arg1, %c0_i32 : i32, i32
  }
  func.func @transform_4(%arg0: i32, %arg1: i32) -> (i32, i32, i32) {
    %c0_i32 = arith.constant 0 : i32
    %c0_i32_0 = arith.constant 0 : i32
    return %arg0, %arg1, %c0_i32 : i32, i32, i32
  }
}

module attributes {stable_mosaic.version = 11 : i64} {
  func.func @fused_vit_kernel(%arg0: i32, %arg1: i32, %arg2: memref<1x64xf32, #tpu.memory_space<vmem>>, %arg3: memref<1x4x64xbf16, #tpu.memory_space<vmem>>, %arg4: memref<1x1x64xf32, #tpu.memory_space<vmem>>, %arg5: memref<1x1x64xf32, #tpu.memory_space<vmem>>, %arg6: memref<1x192x64xbf16, #tpu.memory_space<vmem>>, %arg7: memref<1x192x1xf32, #tpu.memory_space<vmem>>, %arg8: memref<1x64x64xbf16, #tpu.memory_space<vmem>>, %arg9: memref<1x1x64xf32, #tpu.memory_space<vmem>>, %arg10: memref<1x1x64xf32, #tpu.memory_space<vmem>>, %arg11: memref<1x1x64xf32, #tpu.memory_space<vmem>>, %arg12: memref<1x64x256xbf16, #tpu.memory_space<vmem>>, %arg13: memref<1x1x256xf32, #tpu.memory_space<vmem>>, %arg14: memref<1x256x64xbf16, #tpu.memory_space<vmem>>, %arg15: memref<1x1x64xf32, #tpu.memory_space<vmem>>, %arg16: memref<1x8x64xf32, #tpu.memory_space<vmem>>, %arg17: memref<1x1x1x64xf32, #tpu.memory_space<vmem>>, %arg18: memref<192x8xbf16, #tpu.memory_space<vmem>>, %arg19: memref<8x64xf32, #tpu.memory_space<vmem>>) attributes {dimension_semantics = [#tpu.dimension_semantics<parallel>, #tpu.dimension_semantics<arbitrary>], iteration_bounds = array<i64: 2, 2>, scalar_prefetch = 0 : i64, scratch_operands = 2 : i64, tpu.core_type = #tpu.core_type<tc>, window_params = [{pipeline_mode = #tpu.pipeline_mode<synchronous>, transform_indices = @transform_0, window_bounds = array<i64: 1, 64>}, {transform_indices = @transform_1, window_bounds = array<i64: 1, 4, 64>}, {transform_indices = @transform_2, window_bounds = array<i64: 1, 1, 64>}, {transform_indices = @transform_3, window_bounds = array<i64: 1, 1, 64>}, {transform_indices = @transform_4, window_bounds = array<i64: 1, 192, 64>}, {transform_indices = @transform_5, window_bounds = array<i64: 1, 192, 1>}, {transform_indices = @transform_6, window_bounds = array<i64: 1, 64, 64>}, {transform_indices = @transform_7, window_bounds = array<i64: 1, 1, 64>}, {transform_indices = @transform_8, window_bounds = array<i64: 1, 1, 64>}, {transform_indices = @transform_9, window_bounds = array<i64: 1, 1, 64>}, {transform_indices = @transform_10, window_bounds = array<i64: 1, 64, 256>}, {transform_indices = @transform_11, window_bounds = array<i64: 1, 1, 256>}, {transform_indices = @transform_12, window_bounds = array<i64: 1, 256, 64>}, {transform_indices = @transform_13, window_bounds = array<i64: 1, 1, 64>}, {transform_indices = @transform_14, window_bounds = array<i64: 1, 8, 64>}, {transform_indices = @transform_15, window_bounds = array<i64: 1, 1, 1, 64>}]} {
    %c0_i32 = arith.constant 0 : i32
    %0 = arith.cmpi eq, %arg1, %c0_i32 : i32
    %1 = arith.extui %0 : i1 to i32
    %c0_i32_0 = arith.constant 0 : i32
    %2 = arith.cmpi ne, %1, %c0_i32_0 : i32
    scf.if %2 {
      %c0_69 = arith.constant 0 : index
      %c0_70 = arith.constant 0 : index
      %114 = vector.load %arg2[%c0_69, %c0_70] : memref<1x64xf32, #tpu.memory_space<vmem>>, vector<1x64xf32>
      %c0_71 = arith.constant 0 : index
      %c0_72 = arith.constant 0 : index
      %c0_73 = arith.constant 0 : index
      %115 = vector.load %arg16[%c0_71, %c0_72, %c0_73] : memref<1x8x64xf32, #tpu.memory_space<vmem>>, vector<1x1x64xf32>
      %116 = vector.shape_cast %115 : vector<1x1x64xf32> to vector<1x64xf32>
      %117 = vector.shape_cast %114 : vector<1x64xf32> to vector<1x1x64xf32>
      tpu.vector_store %arg16[%c0_71, %c0_72, %c0_73], %117 {strides = array<i32>} : memref<1x8x64xf32, #tpu.memory_space<vmem>>, vector<1x1x64xf32>,
      %c0_74 = arith.constant 0 : index
      %c0_75 = arith.constant 0 : index
      %c0_76 = arith.constant 0 : index
      %118 = vector.load %arg3[%c0_74, %c0_75, %c0_76] : memref<1x4x64xbf16, #tpu.memory_space<vmem>>, vector<1x4x64xbf16>
      %119 = vector.shape_cast %118 : vector<1x4x64xbf16> to vector<4x64xbf16>
      %120 = arith.extf %119 : vector<4x64xbf16> to vector<4x64xf32>
      %c0_77 = arith.constant 0 : index
      %c1 = arith.constant 1 : index
      %c0_78 = arith.constant 0 : index
      %121 = vector.load %arg16[%c0_77, %c1, %c0_78] : memref<1x8x64xf32, #tpu.memory_space<vmem>>, vector<1x4x64xf32>
      %122 = vector.shape_cast %121 : vector<1x4x64xf32> to vector<4x64xf32>
      %123 = vector.shape_cast %120 : vector<4x64xf32> to vector<1x4x64xf32>
      tpu.vector_store %arg16[%c0_77, %c1, %c0_78], %123 {strides = array<i32>} : memref<1x8x64xf32, #tpu.memory_space<vmem>>, vector<1x4x64xf32>,
      %cst_79 = arith.constant 0.000000e+00 : f32
      %124 = vector.broadcast %cst_79 : f32 to vector<3x64xf32>
      %c0_80 = arith.constant 0 : index
      %c5 = arith.constant 5 : index
      %c0_81 = arith.constant 0 : index
      %125 = vector.load %arg16[%c0_80, %c5, %c0_81] : memref<1x8x64xf32, #tpu.memory_space<vmem>>, vector<1x3x64xf32>
      %126 = vector.shape_cast %125 : vector<1x3x64xf32> to vector<3x64xf32>
      %127 = vector.shape_cast %124 : vector<3x64xf32> to vector<1x3x64xf32>
      tpu.vector_store %arg16[%c0_80, %c5, %c0_81], %127 {strides = array<i32>} : memref<1x8x64xf32, #tpu.memory_space<vmem>>, vector<1x3x64xf32>,
    } else {
    }
    %c0 = arith.constant 0 : index
    %c0_1 = arith.constant 0 : index
    %c0_2 = arith.constant 0 : index
    %3 = vector.load %arg16[%c0, %c0_1, %c0_2] : memref<1x8x64xf32, #tpu.memory_space<vmem>>, vector<1x8x64xf32>
    %4 = vector.shape_cast %3 : vector<1x8x64xf32> to vector<8x64xf32>
    %c0_3 = arith.constant 0 : index
    %c0_4 = arith.constant 0 : index
    %c0_5 = arith.constant 0 : index
    %5 = vector.load %arg4[%c0_3, %c0_4, %c0_5] : memref<1x1x64xf32, #tpu.memory_space<vmem>>, vector<1x1x64xf32>
    %6 = vector.shape_cast %5 : vector<1x1x64xf32> to vector<1x64xf32>
    %c0_6 = arith.constant 0 : index
    %c0_7 = arith.constant 0 : index
    %c0_8 = arith.constant 0 : index
    %7 = vector.load %arg5[%c0_6, %c0_7, %c0_8] : memref<1x1x64xf32, #tpu.memory_space<vmem>>, vector<1x1x64xf32>
    %8 = vector.shape_cast %7 : vector<1x1x64xf32> to vector<1x64xf32>
    %cst = arith.constant dense<0.000000e+00> : vector<8xf32>
    %9 = vector.multi_reduction <add>, %4, %cst [1] : vector<8x64xf32> to vector<8xf32>
    %10 = vector.shape_cast %9 : vector<8xf32> to vector<8x1xf32>
    %cst_9 = arith.constant 6.400000e+01 : f32
    %11 = vector.broadcast %cst_9 : f32 to vector<8x1xf32>
    %12 = arith.divf %10, %11 : vector<8x1xf32>
    %13 = vector.broadcast %12 : vector<8x1xf32> to vector<8x64xf32>
    %14 = arith.subf %4, %13 : vector<8x64xf32>
    %15 = arith.mulf %14, %14 : vector<8x64xf32>
    %cst_10 = arith.constant dense<0.000000e+00> : vector<8xf32>
    %16 = vector.multi_reduction <add>, %15, %cst_10 [1] : vector<8x64xf32> to vector<8xf32>
    %17 = vector.shape_cast %16 : vector<8xf32> to vector<8x1xf32>
    %cst_11 = arith.constant 6.400000e+01 : f32
    %18 = vector.broadcast %cst_11 : f32 to vector<8x1xf32>
    %19 = arith.divf %17, %18 : vector<8x1xf32>
    %20 = vector.broadcast %12 : vector<8x1xf32> to vector<8x64xf32>
    %21 = arith.subf %4, %20 : vector<8x64xf32>
    %cst_12 = arith.constant 9.99999997E-7 : f32
    %22 = vector.broadcast %cst_12 : f32 to vector<8x1xf32>
    %23 = arith.addf %19, %22 : vector<8x1xf32>
    %24 = math.rsqrt %23 : vector<8x1xf32>
    %25 = vector.broadcast %24 : vector<8x1xf32> to vector<8x64xf32>
    %26 = arith.mulf %21, %25 : vector<8x64xf32>
    %27 = vector.broadcast %6 : vector<1x64xf32> to vector<8x64xf32>
    %28 = arith.mulf %26, %27 : vector<8x64xf32>
    %29 = vector.broadcast %8 : vector<1x64xf32> to vector<8x64xf32>
    %30 = arith.addf %28, %29 : vector<8x64xf32>
    %31 = arith.truncf %30 : vector<8x64xf32> to vector<8x64xbf16>
    %c0_13 = arith.constant 0 : index
    %c0_14 = arith.constant 0 : index
    %c0_15 = arith.constant 0 : index
    %32 = vector.load %arg6[%c0_13, %c0_14, %c0_15] : memref<1x192x64xbf16, #tpu.memory_space<vmem>>, vector<1x192x64xbf16>
    %33 = vector.shape_cast %32 : vector<1x192x64xbf16> to vector<192x64xbf16>
    %cst_16 = arith.constant dense<0.000000e+00> : vector<192x8xf32>
    %34 = tpu.matmul %33, %31, %cst_16 {dimension_numbers = #tpu.dot_dimension_numbers<[1], [1], [0], [0], [0, 0, 1, 0], [], []>} : vector<192x64xbf16>, vector<8x64xbf16>, vector<192x8xf32> -> vector<192x8xf32>
    %c0_17 = arith.constant 0 : index
    %c0_18 = arith.constant 0 : index
    %c0_19 = arith.constant 0 : index
    %35 = vector.load %arg7[%c0_17, %c0_18, %c0_19] : memref<1x192x1xf32, #tpu.memory_space<vmem>>, vector<1x192x1xf32>
    %36 = vector.shape_cast %35 : vector<1x192x1xf32> to vector<192x1xf32>
    %37 = vector.broadcast %36 : vector<192x1xf32> to vector<192x8xf32>
    %38 = arith.addf %34, %37 : vector<192x8xf32>
    %39 = arith.truncf %38 : vector<192x8xf32> to vector<192x8xbf16>
    %c0_20 = arith.constant 0 : index
    %c0_21 = arith.constant 0 : index
    %40 = vector.load %arg18[%c0_20, %c0_21] : memref<192x8xbf16, #tpu.memory_space<vmem>>, vector<192x8xbf16>
    tpu.vector_store %arg18[%c0_20, %c0_21], %39 {strides = array<i32>} : memref<192x8xbf16, #tpu.memory_space<vmem>>, vector<192x8xbf16>,
    %41 = tpu.iota {dimensions = array<i32: 1>} : vector<1x8xi32>
    %c5_i32 = arith.constant 5 : i32
    %42 = vector.broadcast %c5_i32 : i32 to vector<1x8xi32>
    %43 = arith.cmpi slt, %41, %42 : vector<1x8xi32>
    %cst_22 = arith.constant 0.000000e+00 : f32
    %cst_23 = arith.constant -1.000000e+30 : f32
    %44 = vector.broadcast %cst_22 : f32 to vector<1x8xf32>
    %45 = vector.broadcast %cst_23 : f32 to vector<1x8xf32>
    %46 = arith.select %43, %44, %45 : vector<1x8xi1>, vector<1x8xf32>
    %cst_24 = arith.constant 0.000000e+00 : f32
    %47 = vector.broadcast %cst_24 : f32 to vector<8x64xf32>
    %c0_25 = arith.constant 0 : index
    %c0_26 = arith.constant 0 : index
    %48 = vector.load %arg19[%c0_25, %c0_26] : memref<8x64xf32, #tpu.memory_space<vmem>>, vector<8x64xf32>
    tpu.vector_store %arg19[%c0_25, %c0_26], %47 {strides = array<i32>} : memref<8x64xf32, #tpu.memory_space<vmem>>, vector<8x64xf32>,
    %c0_i32_27 = arith.constant 0 : i32
    %c4_i32 = arith.constant 4 : i32
    %49 = arith.addi %c0_i32_27, %c4_i32 : i32
    %c1_i32 = arith.constant 1 : i32
    scf.for %arg20 = %c0_i32_27 to %49 step %c1_i32  : i32 {
      %c1_i32_69 = arith.constant 1 : i32
      %114 = arith.muli %arg20, %c1_i32_69 : i32
      %c0_i32_70 = arith.constant 0 : i32
      %115 = arith.addi %c0_i32_70, %114 : i32
      %c16_i32 = arith.constant 16 : i32
      %116 = arith.muli %115, %c16_i32 : i32
      %117 = tpu.assume_multiple %116, 16 : i32
      %118 = arith.index_cast %117 : i32 to index
      %c0_71 = arith.constant 0 : index
      %119 = vector.load %arg18[%118, %c0_71] : memref<192x8xbf16, #tpu.memory_space<vmem>>, vector<16x8xbf16>
      %c64_i32 = arith.constant 64 : i32
      %120 = arith.addi %c64_i32, %117 : i32
      %121 = arith.index_cast %120 : i32 to index
      %c0_72 = arith.constant 0 : index
      %122 = vector.load %arg18[%121, %c0_72] : memref<192x8xbf16, #tpu.memory_space<vmem>>, vector<16x8xbf16>
      %c128_i32 = arith.constant 128 : i32
      %123 = arith.addi %c128_i32, %117 : i32
      %124 = arith.index_cast %123 : i32 to index
      %c0_73 = arith.constant 0 : index
      %125 = vector.load %arg18[%124, %c0_73] : memref<192x8xbf16, #tpu.memory_space<vmem>>, vector<16x8xbf16>
      %cst_74 = arith.constant dense<0.000000e+00> : vector<8x8xf32>
      %126 = tpu.matmul %119, %122, %cst_74 {dimension_numbers = #tpu.dot_dimension_numbers<[0], [0], [1], [1], [0, 1, 1, 1], [], []>} : vector<16x8xbf16>, vector<16x8xbf16>, vector<8x8xf32> -> vector<8x8xf32>
      %cst_75 = arith.constant 2.500000e-01 : f32
      %127 = vector.broadcast %cst_75 : f32 to vector<8x8xf32>
      %128 = arith.mulf %126, %127 : vector<8x8xf32>
      %129 = vector.broadcast %46 : vector<1x8xf32> to vector<8x8xf32>
      %130 = arith.addf %128, %129 : vector<8x8xf32>
      %cst_76 = arith.constant dense<0xFF800000> : vector<8xf32>
      %131 = vector.multi_reduction <maximumf>, %130, %cst_76 [1] : vector<8x8xf32> to vector<8xf32>
      %132 = vector.shape_cast %131 : vector<8xf32> to vector<8x1xf32>
      %133 = vector.broadcast %132 : vector<8x1xf32> to vector<8x8xf32>
      %134 = arith.subf %130, %133 : vector<8x8xf32>
      %135 = math.exp %134 : vector<8x8xf32>
      %cst_77 = arith.constant dense<0.000000e+00> : vector<8xf32>
      %136 = vector.multi_reduction <add>, %135, %cst_77 [1] : vector<8x8xf32> to vector<8xf32>
      %137 = vector.shape_cast %136 : vector<8xf32> to vector<8x1xf32>
      %138 = tpu.reciprocal %137 {approx = true} : vector<8x1xf32> -> vector<8x1xf32>
      %139 = vector.broadcast %138 : vector<8x1xf32> to vector<8x8xf32>
      %140 = arith.mulf %135, %139 : vector<8x8xf32>
      %141 = arith.truncf %140 : vector<8x8xf32> to vector<8x8xbf16>
      %cst_78 = arith.constant dense<0.000000e+00> : vector<16x8xf32>
      %142 = tpu.matmul %125, %141, %cst_78 {dimension_numbers = #tpu.dot_dimension_numbers<[1], [1], [0], [0], [0, 0, 1, 0], [], []>} : vector<16x8xbf16>, vector<8x8xbf16>, vector<16x8xf32> -> vector<16x8xf32>
      %c0_79 = arith.constant 0 : index
      %143 = arith.index_cast %117 : i32 to index
      %c0_80 = arith.constant 0 : index
      %144 = vector.load %arg8[%c0_79, %143, %c0_80] : memref<1x64x64xbf16, #tpu.memory_space<vmem>>, vector<1x16x64xbf16>
      %145 = vector.shape_cast %144 : vector<1x16x64xbf16> to vector<16x64xbf16>
      %c0_81 = arith.constant 0 : index
      %c0_82 = arith.constant 0 : index
      %146 = vector.load %arg19[%c0_81, %c0_82] : memref<8x64xf32, #tpu.memory_space<vmem>>, vector<8x64xf32>
      %147 = arith.truncf %142 : vector<16x8xf32> to vector<16x8xbf16>
      %cst_83 = arith.constant dense<0.000000e+00> : vector<8x64xf32>
      %148 = tpu.matmul %147, %145, %cst_83 {dimension_numbers = #tpu.dot_dimension_numbers<[0], [0], [1], [1], [0, 1, 1, 1], [], []>} : vector<16x8xbf16>, vector<16x64xbf16>, vector<8x64xf32> -> vector<8x64xf32>
      %149 = arith.addf %146, %148 : vector<8x64xf32>
      %c0_84 = arith.constant 0 : index
      %c0_85 = arith.constant 0 : index
      %150 = vector.load %arg19[%c0_84, %c0_85] : memref<8x64xf32, #tpu.memory_space<vmem>>, vector<8x64xf32>
      tpu.vector_store %arg19[%c0_84, %c0_85], %149 {strides = array<i32>} : memref<8x64xf32, #tpu.memory_space<vmem>>, vector<8x64xf32>,
    }
    %c4_i32_28 = arith.constant 4 : i32
    %c0_29 = arith.constant 0 : index
    %c0_30 = arith.constant 0 : index
    %50 = vector.load %arg19[%c0_29, %c0_30] : memref<8x64xf32, #tpu.memory_space<vmem>>, vector<8x64xf32>
    %51 = arith.addf %4, %50 : vector<8x64xf32>
    %c0_31 = arith.constant 0 : index
    %c0_32 = arith.constant 0 : index
    %c0_33 = arith.constant 0 : index
    %52 = vector.load %arg9[%c0_31, %c0_32, %c0_33] : memref<1x1x64xf32, #tpu.memory_space<vmem>>, vector<1x1x64xf32>
    %53 = vector.shape_cast %52 : vector<1x1x64xf32> to vector<1x64xf32>
    %54 = vector.broadcast %53 : vector<1x64xf32> to vector<8x64xf32>
    %55 = arith.addf %51, %54 : vector<8x64xf32>
    %c0_34 = arith.constant 0 : index
    %c0_35 = arith.constant 0 : index
    %c0_36 = arith.constant 0 : index
    %56 = vector.load %arg10[%c0_34, %c0_35, %c0_36] : memref<1x1x64xf32, #tpu.memory_space<vmem>>, vector<1x1x64xf32>
    %57 = vector.shape_cast %56 : vector<1x1x64xf32> to vector<1x64xf32>
    %c0_37 = arith.constant 0 : index
    %c0_38 = arith.constant 0 : index
    %c0_39 = arith.constant 0 : index
    %58 = vector.load %arg11[%c0_37, %c0_38, %c0_39] : memref<1x1x64xf32, #tpu.memory_space<vmem>>, vector<1x1x64xf32>
    %59 = vector.shape_cast %58 : vector<1x1x64xf32> to vector<1x64xf32>
    %cst_40 = arith.constant dense<0.000000e+00> : vector<8xf32>
    %60 = vector.multi_reduction <add>, %55, %cst_40 [1] : vector<8x64xf32> to vector<8xf32>
    %61 = vector.shape_cast %60 : vector<8xf32> to vector<8x1xf32>
    %cst_41 = arith.constant 6.400000e+01 : f32
    %62 = vector.broadcast %cst_41 : f32 to vector<8x1xf32>
    %63 = arith.divf %61, %62 : vector<8x1xf32>
    %64 = vector.broadcast %63 : vector<8x1xf32> to vector<8x64xf32>
    %65 = arith.subf %55, %64 : vector<8x64xf32>
    %66 = arith.mulf %65, %65 : vector<8x64xf32>
    %cst_42 = arith.constant dense<0.000000e+00> : vector<8xf32>
    %67 = vector.multi_reduction <add>, %66, %cst_42 [1] : vector<8x64xf32> to vector<8xf32>
    %68 = vector.shape_cast %67 : vector<8xf32> to vector<8x1xf32>
    %cst_43 = arith.constant 6.400000e+01 : f32
    %69 = vector.broadcast %cst_43 : f32 to vector<8x1xf32>
    %70 = arith.divf %68, %69 : vector<8x1xf32>
    %71 = vector.broadcast %63 : vector<8x1xf32> to vector<8x64xf32>
    %72 = arith.subf %55, %71 : vector<8x64xf32>
    %cst_44 = arith.constant 9.99999997E-7 : f32
    %73 = vector.broadcast %cst_44 : f32 to vector<8x1xf32>
    %74 = arith.addf %70, %73 : vector<8x1xf32>
    %75 = math.rsqrt %74 : vector<8x1xf32>
    %76 = vector.broadcast %75 : vector<8x1xf32> to vector<8x64xf32>
    %77 = arith.mulf %72, %76 : vector<8x64xf32>
    %78 = vector.broadcast %57 : vector<1x64xf32> to vector<8x64xf32>
    %79 = arith.mulf %77, %78 : vector<8x64xf32>
    %80 = vector.broadcast %59 : vector<1x64xf32> to vector<8x64xf32>
    %81 = arith.addf %79, %80 : vector<8x64xf32>
    %82 = arith.truncf %81 : vector<8x64xf32> to vector<8x64xbf16>
    %c0_45 = arith.constant 0 : index
    %c0_46 = arith.constant 0 : index
    %c0_47 = arith.constant 0 : index
    %83 = vector.load %arg12[%c0_45, %c0_46, %c0_47] : memref<1x64x256xbf16, #tpu.memory_space<vmem>>, vector<1x64x256xbf16>
    %84 = vector.shape_cast %83 : vector<1x64x256xbf16> to vector<64x256xbf16>
    %cst_48 = arith.constant dense<0.000000e+00> : vector<8x256xf32>
    %85 = tpu.matmul %82, %84, %cst_48 {dimension_numbers = #tpu.dot_dimension_numbers<[1], [0], [0], [1], [0, 0, 1, 1], [], []>} : vector<8x64xbf16>, vector<64x256xbf16>, vector<8x256xf32> -> vector<8x256xf32>
    %c0_49 = arith.constant 0 : index
    %c0_50 = arith.constant 0 : index
    %c0_51 = arith.constant 0 : index
    %86 = vector.load %arg13[%c0_49, %c0_50, %c0_51] : memref<1x1x256xf32, #tpu.memory_space<vmem>>, vector<1x1x256xf32>
    %87 = vector.shape_cast %86 : vector<1x1x256xf32> to vector<1x256xf32>
    %88 = vector.broadcast %87 : vector<1x256xf32> to vector<8x256xf32>
    %89 = arith.addf %85, %88 : vector<8x256xf32>
    %cst_52 = arith.constant 5.000000e-01 : f32
    %90 = vector.broadcast %cst_52 : f32 to vector<8x256xf32>
    %91 = arith.mulf %90, %89 : vector<8x256xf32>
    %cst_53 = arith.constant 0.707106769 : f32
    %92 = vector.broadcast %cst_53 : f32 to vector<8x256xf32>
    %93 = arith.mulf %89, %92 : vector<8x256xf32>
    %94 = math.erf %93 : vector<8x256xf32>
    %cst_54 = arith.constant 1.000000e+00 : f32
    %95 = vector.broadcast %cst_54 : f32 to vector<8x256xf32>
    %96 = arith.addf %95, %94 : vector<8x256xf32>
    %97 = arith.mulf %91, %96 : vector<8x256xf32>
    %98 = arith.truncf %97 : vector<8x256xf32> to vector<8x256xbf16>
    %c0_55 = arith.constant 0 : index
    %c0_56 = arith.constant 0 : index
    %c0_57 = arith.constant 0 : index
    %99 = vector.load %arg14[%c0_55, %c0_56, %c0_57] : memref<1x256x64xbf16, #tpu.memory_space<vmem>>, vector<1x256x64xbf16>
    %100 = vector.shape_cast %99 : vector<1x256x64xbf16> to vector<256x64xbf16>
    %cst_58 = arith.constant dense<0.000000e+00> : vector<8x64xf32>
    %101 = tpu.matmul %98, %100, %cst_58 {dimension_numbers = #tpu.dot_dimension_numbers<[1], [0], [0], [1], [0, 0, 1, 1], [], []>} : vector<8x256xbf16>, vector<256x64xbf16>, vector<8x64xf32> -> vector<8x64xf32>
    %c0_59 = arith.constant 0 : index
    %c0_60 = arith.constant 0 : index
    %c0_61 = arith.constant 0 : index
    %102 = vector.load %arg15[%c0_59, %c0_60, %c0_61] : memref<1x1x64xf32, #tpu.memory_space<vmem>>, vector<1x1x64xf32>
    %103 = vector.shape_cast %102 : vector<1x1x64xf32> to vector<1x64xf32>
    %104 = vector.broadcast %103 : vector<1x64xf32> to vector<8x64xf32>
    %105 = arith.addf %101, %104 : vector<8x64xf32>
    %106 = arith.addf %55, %105 : vector<8x64xf32>
    %c0_62 = arith.constant 0 : index
    %c0_63 = arith.constant 0 : index
    %c0_64 = arith.constant 0 : index
    %107 = vector.load %arg16[%c0_62, %c0_63, %c0_64] : memref<1x8x64xf32, #tpu.memory_space<vmem>>, vector<1x8x64xf32>
    %108 = vector.shape_cast %107 : vector<1x8x64xf32> to vector<8x64xf32>
    %109 = vector.shape_cast %106 : vector<8x64xf32> to vector<1x8x64xf32>
    tpu.vector_store %arg16[%c0_62, %c0_63, %c0_64], %109 {strides = array<i32>} : memref<1x8x64xf32, #tpu.memory_space<vmem>>, vector<1x8x64xf32>,
    %110 = vector.extract_strided_slice %106 {offsets = [0, 0], sizes = [1, 64], strides = [1, 1]} : vector<8x64xf32> to vector<1x64xf32>
    %c0_65 = arith.constant 0 : index
    %c0_66 = arith.constant 0 : index
    %c0_67 = arith.constant 0 : index
    %c0_68 = arith.constant 0 : index
    %111 = vector.load %arg17[%c0_65, %c0_66, %c0_67, %c0_68] : memref<1x1x1x64xf32, #tpu.memory_space<vmem>>, vector<1x1x1x64xf32>
    %112 = vector.shape_cast %111 : vector<1x1x1x64xf32> to vector<1x64xf32>
    %113 = vector.shape_cast %110 : vector<1x64xf32> to vector<1x1x1x64xf32>
    tpu.vector_store %arg17[%c0_65, %c0_66, %c0_67, %c0_68], %113 {strides = array<i32>} : memref<1x1x1x64xf32, #tpu.memory_space<vmem>>, vector<1x1x1x64xf32>,
    return
  }
  func.func @transform_0(%arg0: i32, %arg1: i32) -> (i32, i32) {
    %c0_i32 = arith.constant 0 : i32
    %c0_i32_0 = arith.constant 0 : i32
    %c0_i32_1 = arith.constant 0 : i32
    return %c0_i32, %c0_i32_0 : i32, i32
  }
  func.func @transform_1(%arg0: i32, %arg1: i32) -> (i32, i32, i32) {
    %c0_i32 = arith.constant 0 : i32
    %c0_i32_0 = arith.constant 0 : i32
    %c0_i32_1 = arith.constant 0 : i32
    return %arg0, %c0_i32, %c0_i32_0 : i32, i32, i32
  }
  func.func @transform_2(%arg0: i32, %arg1: i32) -> (i32, i32, i32) {
    %c0_i32 = arith.constant 0 : i32
    %c0_i32_0 = arith.constant 0 : i32
    %c0_i32_1 = arith.constant 0 : i32
    return %arg1, %c0_i32, %c0_i32_0 : i32, i32, i32
  }
  func.func @transform_3(%arg0: i32, %arg1: i32) -> (i32, i32, i32) {
    %c0_i32 = arith.constant 0 : i32
    %c0_i32_0 = arith.constant 0 : i32
    %c0_i32_1 = arith.constant 0 : i32
    return %arg1, %c0_i32, %c0_i32_0 : i32, i32, i32
  }
  func.func @transform_4(%arg0: i32, %arg1: i32) -> (i32, i32, i32) {
    %c0_i32 = arith.constant 0 : i32
    %c0_i32_0 = arith.constant 0 : i32
    %c0_i32_1 = arith.constant 0 : i32
    return %arg1, %c0_i32, %c0_i32_0 : i32, i32, i32
  }
  func.func @transform_5(%arg0: i32, %arg1: i32) -> (i32, i32, i32) {
    %c0_i32 = arith.constant 0 : i32
    %c0_i32_0 = arith.constant 0 : i32
    %c0_i32_1 = arith.constant 0 : i32
    return %arg1, %c0_i32, %c0_i32_0 : i32, i32, i32
  }
  func.func @transform_6(%arg0: i32, %arg1: i32) -> (i32, i32, i32) {
    %c0_i32 = arith.constant 0 : i32
    %c0_i32_0 = arith.constant 0 : i32
    %c0_i32_1 = arith.constant 0 : i32
    return %arg1, %c0_i32, %c0_i32_0 : i32, i32, i32
  }
  func.func @transform_7(%arg0: i32, %arg1: i32) -> (i32, i32, i32) {
    %c0_i32 = arith.constant 0 : i32
    %c0_i32_0 = arith.constant 0 : i32
    %c0_i32_1 = arith.constant 0 : i32
    return %arg1, %c0_i32, %c0_i32_0 : i32, i32, i32
  }
  func.func @transform_8(%arg0: i32, %arg1: i32) -> (i32, i32, i32) {
    %c0_i32 = arith.constant 0 : i32
    %c0_i32_0 = arith.constant 0 : i32
    %c0_i32_1 = arith.constant 0 : i32
    return %arg1, %c0_i32, %c0_i32_0 : i32, i32, i32
  }
  func.func @transform_9(%arg0: i32, %arg1: i32) -> (i32, i32, i32) {
    %c0_i32 = arith.constant 0 : i32
    %c0_i32_0 = arith.constant 0 : i32
    %c0_i32_1 = arith.constant 0 : i32
    return %arg1, %c0_i32, %c0_i32_0 : i32, i32, i32
  }
  func.func @transform_10(%arg0: i32, %arg1: i32) -> (i32, i32, i32) {
    %c0_i32 = arith.constant 0 : i32
    %c0_i32_0 = arith.constant 0 : i32
    %c0_i32_1 = arith.constant 0 : i32
    return %arg1, %c0_i32, %c0_i32_0 : i32, i32, i32
  }
  func.func @transform_11(%arg0: i32, %arg1: i32) -> (i32, i32, i32) {
    %c0_i32 = arith.constant 0 : i32
    %c0_i32_0 = arith.constant 0 : i32
    %c0_i32_1 = arith.constant 0 : i32
    return %arg1, %c0_i32, %c0_i32_0 : i32, i32, i32
  }
  func.func @transform_12(%arg0: i32, %arg1: i32) -> (i32, i32, i32) {
    %c0_i32 = arith.constant 0 : i32
    %c0_i32_0 = arith.constant 0 : i32
    %c0_i32_1 = arith.constant 0 : i32
    return %arg1, %c0_i32, %c0_i32_0 : i32, i32, i32
  }
  func.func @transform_13(%arg0: i32, %arg1: i32) -> (i32, i32, i32) {
    %c0_i32 = arith.constant 0 : i32
    %c0_i32_0 = arith.constant 0 : i32
    %c0_i32_1 = arith.constant 0 : i32
    return %arg1, %c0_i32, %c0_i32_0 : i32, i32, i32
  }
  func.func @transform_14(%arg0: i32, %arg1: i32) -> (i32, i32, i32) {
    %c0_i32 = arith.constant 0 : i32
    %c0_i32_0 = arith.constant 0 : i32
    %c0_i32_1 = arith.constant 0 : i32
    return %arg0, %c0_i32, %c0_i32_0 : i32, i32, i32
  }
  func.func @transform_15(%arg0: i32, %arg1: i32) -> (i32, i32, i32, i32) {
    %c0_i32 = arith.constant 0 : i32
    %c0_i32_0 = arith.constant 0 : i32
    %c0_i32_1 = arith.constant 0 : i32
    return %arg1, %arg0, %c0_i32, %c0_i32_0 : i32, i32, i32, i32
  }
}

module attributes {stable_mosaic.version = 11 : i64} {
  func.func @head_kernel(%arg0: i32, %arg1: memref<2x64xf32, #tpu.memory_space<vmem>>, %arg2: memref<1x64xf32, #tpu.memory_space<vmem>>, %arg3: memref<1x64xf32, #tpu.memory_space<vmem>>, %arg4: memref<64x32xbf16, #tpu.memory_space<vmem>>, %arg5: memref<1x32xf32, #tpu.memory_space<vmem>>, %arg6: memref<32x32xbf16, #tpu.memory_space<vmem>>, %arg7: memref<1x32xf32, #tpu.memory_space<vmem>>, %arg8: memref<2x32xf32, #tpu.memory_space<vmem>>, %arg9: memref<2x32xf32, #tpu.memory_space<vmem>>) attributes {dimension_semantics = [#tpu.dimension_semantics<arbitrary>], iteration_bounds = array<i64: 1>, scalar_prefetch = 0 : i64, scratch_operands = 0 : i64, tpu.core_type = #tpu.core_type<tc>, window_params = [{pipeline_mode = #tpu.pipeline_mode<synchronous>, transform_indices = @transform_0, window_bounds = array<i64: 2, 64>}, {pipeline_mode = #tpu.pipeline_mode<synchronous>, transform_indices = @transform_1, window_bounds = array<i64: 1, 64>}, {pipeline_mode = #tpu.pipeline_mode<synchronous>, transform_indices = @transform_2, window_bounds = array<i64: 1, 64>}, {pipeline_mode = #tpu.pipeline_mode<synchronous>, transform_indices = @transform_3, window_bounds = array<i64: 64, 32>}, {pipeline_mode = #tpu.pipeline_mode<synchronous>, transform_indices = @transform_4, window_bounds = array<i64: 1, 32>}, {pipeline_mode = #tpu.pipeline_mode<synchronous>, transform_indices = @transform_5, window_bounds = array<i64: 32, 32>}, {pipeline_mode = #tpu.pipeline_mode<synchronous>, transform_indices = @transform_6, window_bounds = array<i64: 1, 32>}, {pipeline_mode = #tpu.pipeline_mode<synchronous>, transform_indices = @transform_7, window_bounds = array<i64: 2, 32>}, {pipeline_mode = #tpu.pipeline_mode<synchronous>, transform_indices = @transform_8, window_bounds = array<i64: 2, 32>}]} {
    %c0 = arith.constant 0 : index
    %c0_0 = arith.constant 0 : index
    %0 = vector.load %arg1[%c0, %c0_0] : memref<2x64xf32, #tpu.memory_space<vmem>>, vector<2x64xf32>
    %c0_1 = arith.constant 0 : index
    %c0_2 = arith.constant 0 : index
    %1 = vector.load %arg2[%c0_1, %c0_2] : memref<1x64xf32, #tpu.memory_space<vmem>>, vector<1x64xf32>
    %c0_3 = arith.constant 0 : index
    %c0_4 = arith.constant 0 : index
    %2 = vector.load %arg3[%c0_3, %c0_4] : memref<1x64xf32, #tpu.memory_space<vmem>>, vector<1x64xf32>
    %cst = arith.constant dense<0.000000e+00> : vector<2xf32>
    %3 = vector.multi_reduction <add>, %0, %cst [1] : vector<2x64xf32> to vector<2xf32>
    %4 = vector.shape_cast %3 : vector<2xf32> to vector<2x1xf32>
    %cst_5 = arith.constant 6.400000e+01 : f32
    %5 = vector.broadcast %cst_5 : f32 to vector<2x1xf32>
    %6 = arith.divf %4, %5 : vector<2x1xf32>
    %7 = vector.broadcast %6 : vector<2x1xf32> to vector<2x64xf32>
    %8 = arith.subf %0, %7 : vector<2x64xf32>
    %9 = arith.mulf %8, %8 : vector<2x64xf32>
    %cst_6 = arith.constant dense<0.000000e+00> : vector<2xf32>
    %10 = vector.multi_reduction <add>, %9, %cst_6 [1] : vector<2x64xf32> to vector<2xf32>
    %11 = vector.shape_cast %10 : vector<2xf32> to vector<2x1xf32>
    %cst_7 = arith.constant 6.400000e+01 : f32
    %12 = vector.broadcast %cst_7 : f32 to vector<2x1xf32>
    %13 = arith.divf %11, %12 : vector<2x1xf32>
    %14 = vector.broadcast %6 : vector<2x1xf32> to vector<2x64xf32>
    %15 = arith.subf %0, %14 : vector<2x64xf32>
    %cst_8 = arith.constant 9.99999997E-7 : f32
    %16 = vector.broadcast %cst_8 : f32 to vector<2x1xf32>
    %17 = arith.addf %13, %16 : vector<2x1xf32>
    %18 = math.rsqrt %17 : vector<2x1xf32>
    %19 = vector.broadcast %18 : vector<2x1xf32> to vector<2x64xf32>
    %20 = arith.mulf %15, %19 : vector<2x64xf32>
    %21 = vector.broadcast %1 : vector<1x64xf32> to vector<2x64xf32>
    %22 = arith.mulf %20, %21 : vector<2x64xf32>
    %23 = vector.broadcast %2 : vector<1x64xf32> to vector<2x64xf32>
    %24 = arith.addf %22, %23 : vector<2x64xf32>
    %25 = arith.truncf %24 : vector<2x64xf32> to vector<2x64xbf16>
    %c0_9 = arith.constant 0 : index
    %c0_10 = arith.constant 0 : index
    %26 = vector.load %arg4[%c0_9, %c0_10] : memref<64x32xbf16, #tpu.memory_space<vmem>>, vector<64x32xbf16>
    %cst_11 = arith.constant dense<0.000000e+00> : vector<2x32xf32>
    %27 = tpu.matmul %25, %26, %cst_11 {dimension_numbers = #tpu.dot_dimension_numbers<[1], [0], [0], [1], [0, 0, 1, 1], [], []>} : vector<2x64xbf16>, vector<64x32xbf16>, vector<2x32xf32> -> vector<2x32xf32>
    %c0_12 = arith.constant 0 : index
    %c0_13 = arith.constant 0 : index
    %28 = vector.load %arg5[%c0_12, %c0_13] : memref<1x32xf32, #tpu.memory_space<vmem>>, vector<1x32xf32>
    %29 = vector.broadcast %28 : vector<1x32xf32> to vector<2x32xf32>
    %30 = arith.addf %27, %29 : vector<2x32xf32>
    %cst_14 = arith.constant 0.000000e+00 : f32
    %31 = vector.broadcast %cst_14 : f32 to vector<2x32xf32>
    %32 = arith.maximumf %30, %31 : vector<2x32xf32>
    %33 = arith.truncf %32 : vector<2x32xf32> to vector<2x32xbf16>
    %c0_15 = arith.constant 0 : index
    %c0_16 = arith.constant 0 : index
    %34 = vector.load %arg6[%c0_15, %c0_16] : memref<32x32xbf16, #tpu.memory_space<vmem>>, vector<32x32xbf16>
    %cst_17 = arith.constant dense<0.000000e+00> : vector<2x32xf32>
    %35 = tpu.matmul %33, %34, %cst_17 {dimension_numbers = #tpu.dot_dimension_numbers<[1], [0], [0], [1], [0, 0, 1, 1], [], []>} : vector<2x32xbf16>, vector<32x32xbf16>, vector<2x32xf32> -> vector<2x32xf32>
    %c0_18 = arith.constant 0 : index
    %c0_19 = arith.constant 0 : index
    %36 = vector.load %arg7[%c0_18, %c0_19] : memref<1x32xf32, #tpu.memory_space<vmem>>, vector<1x32xf32>
    %37 = vector.broadcast %36 : vector<1x32xf32> to vector<2x32xf32>
    %38 = arith.addf %35, %37 : vector<2x32xf32>
    %c0_20 = arith.constant 0 : index
    %c0_21 = arith.constant 0 : index
    %39 = vector.load %arg8[%c0_20, %c0_21] : memref<2x32xf32, #tpu.memory_space<vmem>>, vector<2x32xf32>
    tpu.vector_store %arg8[%c0_20, %c0_21], %38 {strides = array<i32>} : memref<2x32xf32, #tpu.memory_space<vmem>>, vector<2x32xf32>,
    %40 = arith.mulf %38, %38 : vector<2x32xf32>
    %cst_22 = arith.constant dense<0.000000e+00> : vector<2xf32>
    %41 = vector.multi_reduction <add>, %40, %cst_22 [1] : vector<2x32xf32> to vector<2xf32>
    %42 = vector.shape_cast %41 : vector<2xf32> to vector<2x1xf32>
    %43 = math.sqrt %42 : vector<2x1xf32>
    %cst_23 = arith.constant 9.99999996E-13 : f32
    %44 = vector.broadcast %cst_23 : f32 to vector<2x1xf32>
    %45 = arith.maximumf %43, %44 : vector<2x1xf32>
    %46 = vector.broadcast %45 : vector<2x1xf32> to vector<2x32xf32>
    %47 = arith.divf %38, %46 : vector<2x32xf32>
    %c0_24 = arith.constant 0 : index
    %c0_25 = arith.constant 0 : index
    %48 = vector.load %arg9[%c0_24, %c0_25] : memref<2x32xf32, #tpu.memory_space<vmem>>, vector<2x32xf32>
    tpu.vector_store %arg9[%c0_24, %c0_25], %47 {strides = array<i32>} : memref<2x32xf32, #tpu.memory_space<vmem>>, vector<2x32xf32>,
    return
  }
  func.func @transform_0(%arg0: i32) -> (i32, i32) {
    %c0_i32 = arith.constant 0 : i32
    %c0_i32_0 = arith.constant 0 : i32
    %c0_i32_1 = arith.constant 0 : i32
    return %c0_i32, %c0_i32_0 : i32, i32
  }
  func.func @transform_1(%arg0: i32) -> (i32, i32) {
    %c0_i32 = arith.constant 0 : i32
    %c0_i32_0 = arith.constant 0 : i32
    %c0_i32_1 = arith.constant 0 : i32
    return %c0_i32, %c0_i32_0 : i32, i32
  }
  func.func @transform_2(%arg0: i32) -> (i32, i32) {
    %c0_i32 = arith.constant 0 : i32
    %c0_i32_0 = arith.constant 0 : i32
    %c0_i32_1 = arith.constant 0 : i32
    return %c0_i32, %c0_i32_0 : i32, i32
  }
  func.func @transform_3(%arg0: i32) -> (i32, i32) {
    %c0_i32 = arith.constant 0 : i32
    %c0_i32_0 = arith.constant 0 : i32
    %c0_i32_1 = arith.constant 0 : i32
    return %c0_i32, %c0_i32_0 : i32, i32
  }
  func.func @transform_4(%arg0: i32) -> (i32, i32) {
    %c0_i32 = arith.constant 0 : i32
    %c0_i32_0 = arith.constant 0 : i32
    %c0_i32_1 = arith.constant 0 : i32
    return %c0_i32, %c0_i32_0 : i32, i32
  }
  func.func @transform_5(%arg0: i32) -> (i32, i32) {
    %c0_i32 = arith.constant 0 : i32
    %c0_i32_0 = arith.constant 0 : i32
    %c0_i32_1 = arith.constant 0 : i32
    return %c0_i32, %c0_i32_0 : i32, i32
  }
  func.func @transform_6(%arg0: i32) -> (i32, i32) {
    %c0_i32 = arith.constant 0 : i32
    %c0_i32_0 = arith.constant 0 : i32
    %c0_i32_1 = arith.constant 0 : i32
    return %c0_i32, %c0_i32_0 : i32, i32
  }
  func.func @transform_7(%arg0: i32) -> (i32, i32) {
    %c0_i32 = arith.constant 0 : i32
    %c0_i32_0 = arith.constant 0 : i32
    %c0_i32_1 = arith.constant 0 : i32
    return %c0_i32, %c0_i32_0 : i32, i32
  }
  func.func @transform_8(%arg0: i32) -> (i32, i32) {
    %c0_i32 = arith.constant 0 : i32
    %c0_i32_0 = arith.constant 0 : i32
    %c0_i32_1 = arith.constant 0 : i32
    return %c0_i32, %c0_i32_0 : i32, i32
  }
}

</mosaic_0001>

<bundles_post_ra>
// kernel: img_learnable_encoder_forward.5
= control target key start
LH: loop header
LB: loop body
LE: loop exit
PB: predicated region body
PF: predicated region fallthrough
CT: control target
= control target key end

     0   :  { %14 = vsyncpa [#allocation3], 0  ;;  %s801_s0 = inlined_call_operand.hbm [shape: f32[2,64], index: 0, kind: input, shape index: {}]   ;;  %s802_s1 = inlined_call_operand.hbm [shape: f32[1,64], index: 1, kind: input, shape index: {}]   ;;  %s803_s2 = inlined_call_operand.hbm [shape: f32[1,64], index: 2, kind: input, shape index: {}]   ;;  %s804_s3 = inlined_call_operand.hbm [shape: bf16[64,32], index: 3, kind: input, shape index: {}]   ;;  %s805_s4 = inlined_call_operand.hbm [shape: f32[1,32], index: 4, kind: input, shape index: {}]   ;;  %s806_s5 = inlined_call_operand.hbm [shape: bf16[32,32], index: 5, kind: input, shape index: {}]   ;;  %s807_s6 = inlined_call_operand.hbm [shape: f32[1,32], index: 6, kind: input, shape index: {}]   ;;  %s808_s7 = inlined_call_operand.hbm [shape: f32[2,32], index: 7, kind: output, shape index: {0}]   ;;  %s809_s8 = inlined_call_operand.hbm [shape: f32[2,32], index: 8, kind: output, shape index: {1}]  }
   0x1   :  { %15 = vsyncpa [#allocation6], 0 }
   0x2   :  { %16 = vsyncpa [#allocation9], 0 }
   0x3   :  { %17 = vsyncpa [#allocation12], 0 }
   0x4   :  { %18 = vsyncpa [#allocation4], 0 }
   0x5   :  { %19 = vsyncpa [#allocation16], 0  ;;  %s625_s27 = smov [#allocation5]   ;;  %s626_s29 = smov [#allocation8]  }
   0x6   :  { %s36_s28 = sshll.u32 %s625_s27, 4  ;;  %s55_s30 = sshll.u32 %s626_s29, 4  ;;  %s37_s28 = int_to_ptr.vmem [resolvable:$true] %s36_s28  ;;  %s683_s30 = int_to_ptr.vmem [resolvable:$true] %s55_s30 }
   0x7   :  { %s415_s11 = scalar_lea.hbm %s802_s1, 16 }
   0x8   :  { %p416_p0 = scmp.ne.s32.totalorder %s802_s1, %s415_s11  ;;  %p419_p1 = scmp.lt.u32.totalorder %s415_s11, %s802_s1 }
   0xa   :  { %p421_p2 = pnand %p419_p1, %p416_p0 }
   0xc   :  { %424 = shalt.err (!%p421_p2)
}
   0xd   :  { %s425_s16 = scalar_lea.vmem %s37_s28, 16  ;;  %s429_s17 = scalar_lea.vmem %s37_s28, 32 }
   0xe   :  { %p426_p3 = scmp.ne.s32.totalorder %s37_s28, %s425_s16  ;;  %p430_p4 = scmp.lt.s32.totalorder %s37_s28, %s37_s28 }
   0xf   :  { %p431_p5 = scmp.lt.s32.totalorder %s429_s17, %s425_s16 }
  0x11   :  { %p432_p6 = por %p431_p5, %p430_p4 }
  0x13   :  { %p433_p7 = pnand %p432_p6, %p426_p3 }
  0x15   :  { %436 = shalt.err (!%p433_p7)
}
  0x16   :  { %39 = dma.hbm_to_vmem [thread:$0]  %s802_s1, 16, %s37_s28, [#allocation6]  }
  0x17   :  { %s437_s22 = scalar_lea.hbm %s804_s3, 512 }
  0x18   :  { %p438_p8 = scmp.ne.s32.totalorder %s804_s3, %s437_s22  ;;  %p441_p9 = scmp.lt.u32.totalorder %s437_s22, %s804_s3 }
  0x1a   :  { %p443_p10 = pnand %p441_p9, %p438_p8 }
  0x1c   :  { %446 = shalt.err (!%p443_p10)
}
  0x1d   :  { %s447_s27 = scalar_lea.vmem %s683_s30, 512  ;;  %p452_p12 = scmp.lt.s32.totalorder %s683_s30, %s683_s30 }
  0x1e   :  { %p448_p11 = scmp.ne.s32.totalorder %s683_s30, %s447_s27  ;;  %p453_p13 = scmp.lt.s32.totalorder %s447_s27, %s447_s27 }
  0x20   :  { %p454_p0 = por %p453_p13, %p452_p12 }
  0x22   :  { %p455_p1 = pnand %p454_p0, %p448_p11 }
  0x24   :  { %458 = shalt.err (!%p455_p1)
}
  0x25   :  { %s627_s1 = smov 64   ;;  %s628_s28 = smov 4  }
  0x26   :  { %61 = dma.hbm_to_vmem [thread:$0]  %s804_s3, 512, %s683_s30, [#allocation9], %s627_s1, %s627_s1, %s628_s28  }
  0x27   :  { %s629_s10 = smov [#allocation11]   ;;  %s630_s12 = smov [#allocation2]  }
  0x28   :  { %s77_s11 = sshll.u32 %s629_s10, 4  ;;  %s26_s13 = sshll.u32 %s630_s12, 4  ;;  %s78_s11 = int_to_ptr.vmem [resolvable:$true] %s77_s11  ;;  %s27_s13 = int_to_ptr.vmem [resolvable:$true] %s26_s13 }
  0x29   :  { %s459_s16 = scalar_lea.hbm %s806_s5, 256 }
  0x2a   :  { %p460_p2 = scmp.ne.s32.totalorder %s806_s5, %s459_s16  ;;  %p463_p3 = scmp.lt.u32.totalorder %s459_s16, %s806_s5 }
  0x2c   :  { %p465_p4 = pnand %p463_p3, %p460_p2 }
  0x2e   :  { %468 = shalt.err (!%p465_p4)
}
  0x2f   :  { %s469_s3 = scalar_lea.vmem %s78_s11, 256  ;;  %p474_p6 = scmp.lt.s32.totalorder %s78_s11, %s78_s11 }
  0x30   :  { %p470_p5 = scmp.ne.s32.totalorder %s78_s11, %s469_s3  ;;  %p475_p7 = scmp.lt.s32.totalorder %s469_s3, %s469_s3 }
  0x32   :  { %p476_p8 = por %p475_p7, %p474_p6 }
  0x34   :  { %p477_p9 = pnand %p476_p8, %p470_p5 }
  0x36   :  { %480 = shalt.err (!%p477_p9)
}
  0x37   :  { %83 = dma.hbm_to_vmem [thread:$0]  %s806_s5, 256, %s78_s11, [#allocation12], %s627_s1, %s627_s1, %s628_s28  }
  0x38   :  { %s481_s24 = scalar_lea.hbm %s801_s0, 32 }
  0x39   :  { %p482_p10 = scmp.ne.s32.totalorder %s801_s0, %s481_s24  ;;  %p485_p11 = scmp.lt.u32.totalorder %s481_s24, %s801_s0 }
  0x3b   :  { %p487_p12 = pnand %p485_p11, %p482_p10 }
  0x3d   :  { %490 = shalt.err (!%p487_p12)
}
  0x3e   :  { %s491_s9 = scalar_lea.vmem %s27_s13, 32  ;;  %p496_p0 = scmp.lt.s32.totalorder %s27_s13, %s27_s13 }
  0x3f   :  { %p492_p13 = scmp.ne.s32.totalorder %s27_s13, %s491_s9  ;;  %p497_p1 = scmp.lt.s32.totalorder %s491_s9, %s491_s9 }
  0x41   :  { %p498_p2 = por %p497_p1, %p496_p0 }
  0x43   :  { %p499_p3 = pnand %p498_p2, %p492_p13 }
  0x45   :  { %502 = shalt.err (!%p499_p3)
}
  0x46   :  { %29 = dma.hbm_to_vmem [thread:$0]  %s801_s0, 32, %s27_s13, [#allocation3]  }
  0x47   :  { %s631_s28 = smov [#allocation7]   ;;  %s632_s11 = smov [#allocation10]  }
  0x48   :  { %s46_s10 = sshll.u32 %s631_s28, 4  ;;  %s68_s12 = sshll.u32 %s632_s11, 4  ;;  %s47_s10 = int_to_ptr.vmem [resolvable:$true] %s46_s10  ;;  %s69_s12 = int_to_ptr.vmem [resolvable:$true] %s68_s12 }
  0x49   :  { %s503_s16 = scalar_lea.hbm %s803_s2, 16 }
  0x4a   :  { %p504_p4 = scmp.ne.s32.totalorder %s803_s2, %s503_s16  ;;  %p507_p5 = scmp.lt.u32.totalorder %s503_s16, %s803_s2 }
  0x4c   :  { %p509_p6 = pnand %p507_p5, %p504_p4 }
  0x4e   :  { %512 = shalt.err (!%p509_p6)
}
  0x4f   :  { %s513_s0 = scalar_lea.vmem %s47_s10, 16  ;;  %s517_s13 = scalar_lea.vmem %s47_s10, 32 }
  0x50   :  { %p514_p7 = scmp.ne.s32.totalorder %s47_s10, %s513_s0  ;;  %p518_p8 = scmp.lt.s32.totalorder %s47_s10, %s47_s10 }
  0x51   :  { %p519_p9 = scmp.lt.s32.totalorder %s517_s13, %s513_s0 }
  0x53   :  { %p520_p10 = por %p519_p9, %p518_p8 }
  0x55   :  { %p521_p11 = pnand %p520_p10, %p514_p7 }
  0x57   :  { %524 = shalt.err (!%p521_p11)
}
  0x58   :  { %49 = dma.hbm_to_vmem [thread:$0]  %s803_s2, 16, %s47_s10, [#allocation6]  }
  0x59   :  { %s525_s23 = scalar_lea.hbm %s805_s4, 16 }
  0x5a   :  { %p526_p12 = scmp.ne.s32.totalorder %s805_s4, %s525_s23  ;;  %p529_p13 = scmp.lt.u32.totalorder %s525_s23, %s805_s4 }
  0x5c   :  { %p531_p0 = pnand %p529_p13, %p526_p12 }
  0x5e   :  { %534 = shalt.err (!%p531_p0)
}
  0x5f   :  { %s535_s29 = scalar_lea.vmem %s69_s12, 16  ;;  %s539_s9 = scalar_lea.vmem %s69_s12, 32 }
  0x60   :  { %p536_p1 = scmp.ne.s32.totalorder %s69_s12, %s535_s29  ;;  %p540_p2 = scmp.lt.s32.totalorder %s69_s12, %s69_s12 }
  0x61   :  { %p541_p3 = scmp.lt.s32.totalorder %s539_s9, %s535_s29 }
  0x63   :  { %p542_p4 = por %p541_p3, %p540_p2 }
  0x65   :  { %p543_p5 = pnand %p542_p4, %p536_p1 }
  0x67   :  { %546 = shalt.err (!%p543_p5)
}
  0x68   :  { %71 = dma.hbm_to_vmem [thread:$0]  %s805_s4, 16, %s69_s12, [#allocation9]  }
  0x69   :  { %s633_s1 = smov [#allocation13]   ;;  %s547_s14 = scalar_lea.hbm %s807_s6, 16 }
  0x6a   :  { %s90_s28 = sshll.u32 %s633_s1, 4  ;;  %p548_p6 = scmp.ne.s32.totalorder %s807_s6, %s547_s14  ;;  %s91_s28 = int_to_ptr.vmem [resolvable:$true] %s90_s28 }
  0x6b   :  { %p551_p7 = scmp.lt.u32.totalorder %s547_s14, %s807_s6 }
  0x6d   :  { %p553_p8 = pnand %p551_p7, %p548_p6 }
  0x6f   :  { %556 = shalt.err (!%p553_p8)
}
  0x70   :  { %s557_s19 = scalar_lea.vmem %s91_s28, 16  ;;  %s561_s4 = scalar_lea.vmem %s91_s28, 32 }
  0x71   :  { %p558_p9 = scmp.ne.s32.totalorder %s91_s28, %s557_s19  ;;  %p562_p10 = scmp.lt.s32.totalorder %s91_s28, %s91_s28 }
  0x72   :  { %p563_p11 = scmp.lt.s32.totalorder %s561_s4, %s557_s19 }
  0x74   :  { %p564_p12 = por %p563_p11, %p562_p10 }
  0x76   :  { %p565_p13 = pnand %p564_p12, %p558_p9 }
  0x78   :  { %568 = shalt.err (!%p565_p13)
}
  0x79   :  { %93 = dma.hbm_to_vmem [thread:$0]  %s807_s6, 16, %s91_s28, [#allocation12]  }
  0x7a   :  { %613 = dma.done.wait [#allocation3], 32  }
  0x7b   :  { %614 = vsyncadd [#allocation3], 4294967264 }
  0x7c   :  { %615 = dma.done.wait [#allocation6], 32  }
  0x7d   :  { %616 = vsyncadd [#allocation6], 4294967264 }
  0x7e   :  { %617 = dma.done.wait [#allocation9], 528  }
  0x7f   :  { %618 = vsyncadd [#allocation9], 4294966768 }
  0x80   :  { %619 = dma.done.wait [#allocation12], 272  }
  0x81   :  { %620 = vsyncadd [#allocation12], 4294967024  ;;  %vm119_vm0 = vcmask 517120   ;;  %v116_v0 = vld [vmem:[#allocation2] sm:$0x3]  ;;  %v403_v7 = vld [vmem:[#allocation8] sm:$0xff]  }
  0x82   :  { %v120_v1 = vsel %vm119_vm0, %v116_v0, 0.0  ;;  %v634_v8 = vmov 0.0   ;;  %v404_v9 = vld [vmem:[#allocation8 + $0x8] sm:$0xff]   ;;  %v405_v10 = vld [vmem:[#allocation8 + $0x10] sm:$0xff]   ;;  %v406_v11 = vld [vmem:[#allocation8 + $0x18] sm:$0xff]   ;;  %vm635_vm1 = vmmov 0  }
  0x83   :  { %121 = vadd.xlane.f32.xlu0 %v120_v1  ;;  %370 = vmatprep.subr.bf16.mxu0 %v634_v8  ;;  %v350_v16 = vld [vmem:[#allocation5] ss:$0 sm:$0xff]  ;;  %v351_v18 = vld [vmem:[#allocation7] ss:$0 sm:$0xff]  ;;  %vm188_vm2 = vcmask 523264   ;;  %v407_v22 = vld [vmem:[#allocation11] sm:$0xff]  }
  0x84   :  { %382 = vmatprep.subr.bf16.mxu1 %v634_v8  ;;  %371 = vmatpush3.bf16.msra.mxu0 %v403_v7  ;;  %v408_v23 = vld [vmem:[#allocation11 + $0x8] sm:$0xff]   ;;  %v352_v24 = vld [vmem:[#allocation10] ss:$0 sm:$0xff]  ;;  %vm257_vm3 = vcmask 261120   ;;  %v358_v32 = vld [vmem:[#allocation13] ss:$0 sm:$0xff] }
  0x85   :  { %372 = vmatprep.subr.bf16.mxu0 %v634_v8  ;;  %378 = vmatprep.mubr.msk.bf16.mxu0 %vm635_vm1, %v634_v8  ;;  %vm301_vm4 = vcmask 254976   ;;  %s636_s6 = smov [#allocation14]  }
  0x86   :  { %386 = vmatprep.mubr.msk.bf16.mxu1 %vm635_vm1, %v634_v8  ;;  %383 = vmatpush3.bf16.msra.mxu1 %v407_v22  ;;  %s324_s0 = sshll.u32 %s636_s6, 4  ;;  %s325_s0 = int_to_ptr.vmem [resolvable:$true] %s324_s0 }
  0x87   :  { %384 = vmatprep.subr.bf16.mxu1 %v634_v8  ;;  %s569_s13 = scalar_lea.vmem %s325_s0, 32  ;;  %p574_p1 = scmp.lt.s32.totalorder %s325_s0, %s325_s0 }
  0x88   :  { %373 = vmatpush3.bf16.msra.mxu0 %v404_v9  ;;  %p570_p0 = scmp.ne.s32.totalorder %s325_s0, %s569_s13  ;;  %p575_p2 = scmp.lt.s32.totalorder %s569_s13, %s569_s13 }
  0x89   :  { %374 = vmatprep.subr.bf16.mxu0 %v634_v8 }
  0x8a   :  { %385 = vmatpush3.bf16.msra.mxu1 %v408_v23  ;;  %p576_p3 = por %p575_p2, %p574_p1 }
  0x8c   :  { %375 = vmatpush3.bf16.msra.mxu0 %v405_v10  ;;  %p577_p4 = pnand %p576_p3, %p570_p0 }
  0x8d   :  { %376 = vmatprep.subr.bf16.mxu0 %v634_v8 }
  0x90   :  { %377 = vmatpush3.bf16.msra.mxu0 %v406_v11 }
 0x110   :  { %v122_v2 = vpop.xlane.xlu0 %121 }
 0x111   :  { %v124_v3 = vmul.f32 0.015625, %v122_v2 }
 0x113   :  { %v125_v4 = vsub.f32 %v116_v0, %v124_v3 }
 0x115   :  { %v126_v5 = vmul.f32 %v125_v4, %v125_v4 }
 0x117   :  { %v127_v6 = vsel %vm119_vm0, %v126_v5, 0.0 }
 0x118   :  { %128 = vadd.xlane.f32.xlu0 %v127_v6 }
 0x1a5   :  { %v129_v12 = vpop.xlane.xlu0 %128 }
 0x1a6   :  { %v130_v13 = vmul.f32 0.015625, %v129_v12 }
 0x1a8   :  { %v131_v14 = vadd.f32 1e-06, %v130_v13 }
 0x1aa   :  { %409 = vrsqrt.f32 %v131_v14 }
 0x1b4   :  { %v410_v15 = vpop.eup %409 }
 0x1b5   :  { %v133_v17 = vmul.f32 %v410_v15, %v125_v4 }
 0x1b7   :  { %v140_v19 = vmul.f32 %v350_v16, %v133_v17 }
 0x1b9   :  { %v147_v20 = vadd.f32 %v351_v18, %v140_v19 }
 0x1bb   :  { %v148_v21 = vpack.c.bf16 %v147_v20, %v147_v20 }
 0x1bd   :  { %379 = vmatmul.mubr.msk.bf16.vlgmr.msra.gmra.mrb[0].mxu0 %vm188_vm2, %v148_v21 }
 0x290   :  { %v226_v25 = vpop.f32.mrb[0].mxu0 }
 0x291   :  { %v227_v26 = vadd.f32 %v352_v24, %v226_v25  ;;  %v380_v27 = vpop.f32.mrb[1].mxu0 }
 0x292   :  { %v229_v28 = vpop.f32.mrb[2].mxu0 }
 0x293   :  { %v232_v29 = vmax.f32 %v227_v26, 0.0  ;;  %v381_v30 = vpop.f32.mrb[3].mxu0 }
 0x295   :  { %v233_v31 = vpack.c.bf16 %v232_v29, %v232_v29 }
 0x297   :  { %387 = vmatmul.mubr.msk.bf16.vlgmr.msra.gmra.mrb[0].mxu1 %vm257_vm3, %v233_v31 }
 0x36a   :  { %v295_v33 = vpop.f32.mrb[0].mxu1 }
 0x36b   :  { %v296_v34 = vadd.f32 %v358_v32, %v295_v33  ;;  %v388_v35 = vpop.f32.mrb[1].mxu1 }
 0x36c   :  { %v298_v36 = vpop.f32.mrb[2].mxu1 }
 0x36d   :  { %v389_v37 = vpop.f32.mrb[3].mxu1  ;;  %v303_v38 = vmul.f32 %v296_v34, %v296_v34  ;;  %302 = vst.msk [vmem:[#allocation14] sm:$0x3] %vm301_vm4, %v296_v34 }
 0x36f   :  { %v304_v39 = vsel %vm301_vm4, %v303_v38, 0.0 }
 0x370   :  { %305 = vadd.xlane.f32.xlu1 %v304_v39 }
 0x371   :  { %580 = shalt.err (!%p577_p4)
}
 0x372   :  { %s581_s21 = scalar_lea.hbm %s808_s7, 32 }
 0x373   :  { %p582_p5 = scmp.ne.s32.totalorder %s808_s7, %s581_s21  ;;  %p585_p6 = scmp.lt.u32.totalorder %s581_s21, %s808_s7 }
 0x375   :  { %p587_p7 = pnand %p585_p6, %p582_p5 }
 0x377   :  { %590 = shalt.err (!%p587_p7)
}
 0x378   :  { %327 = dma.vmem_to_hbm [thread:$0]  %s325_s0, 32, %s808_s7, [#allocation4]  }
 0x379   :  { %s637_s29 = smov [#allocation15]  }
 0x37a   :  { %s334_s9 = sshll.u32 %s637_s29, 4  ;;  %s335_s9 = int_to_ptr.vmem [resolvable:$true] %s334_s9 }
 0x37b   :  { %s591_s2 = scalar_lea.vmem %s335_s9, 32  ;;  %p596_p9 = scmp.lt.s32.totalorder %s335_s9, %s335_s9 }
 0x37c   :  { %p592_p8 = scmp.ne.s32.totalorder %s335_s9, %s591_s2  ;;  %p597_p10 = scmp.lt.s32.totalorder %s591_s2, %s591_s2 }
 0x37e   :  { %p598_p11 = por %p597_p10, %p596_p9 }
 0x380   :  { %p599_p12 = pnand %p598_p11, %p592_p8 }
 0x3fd   :  { %v306_v40 = vpop.xlane.xlu1 %305 }
 0x3fe   :  { %411 = vrsqrt.f32 %v306_v40  ;;  %vm309_vm5 = vcmp.eq.f32.partialorder %v306_v40, inf  ;;  %v312_v43 = vand.u32 2147483648, %v306_v40  ;;  %vm311_vm6 = vcmp.eq.f32.partialorder %v306_v40, 0.0 }
 0x408   :  { %v412_v41 = vpop.eup %411 }
 0x409   :  { %v308_v42 = vmul.f32 %v412_v41, %v306_v40 }
 0x40b   :  { %v310_v44 = vsel %vm309_vm5, %v306_v40, %v308_v42 }
 0x40c   :  { %v313_v45 = vsel %vm311_vm6, %v312_v43, %v310_v44 }
 0x40d   :  { %v314_v46 = vmax.f32 %v313_v45, 1e-12 }
 0x40f   :  { %413 = vrcp.f32 %v314_v46 }
 0x419   :  { %v414_v47 = vpop.eup %413 }
 0x41a   :  { %v316_v48 = vmul.f32 %v414_v47, %v296_v34 }
 0x41c   :  { %317 = vst.msk [vmem:[#allocation15] sm:$0x3] %vm301_vm4, %v316_v48 }
 0x41d   :  { %602 = shalt.err (!%p599_p12)
}
 0x41e   :  { %s603_s1 = scalar_lea.hbm %s809_s8, 32 }
 0x41f   :  { %p604_p13 = scmp.ne.s32.totalorder %s809_s8, %s603_s1  ;;  %p607_p0 = scmp.lt.u32.totalorder %s603_s1, %s809_s8 }
 0x421   :  { %p609_p1 = pnand %p607_p0, %p604_p13 }
 0x423   :  { %612 = shalt.err (!%p609_p1)
}
 0x424   :  { %337 = dma.vmem_to_hbm [thread:$0]  %s335_s9, 32, %s809_s8, [#allocation16]  }
 0x425   :  { %621 = dma.done.wait [#allocation4], 32  }
 0x426   :  { %622 = vsyncadd [#allocation4], 4294967264 }
 0x427   :  { %623 = dma.done.wait [#allocation16], 32  }
 0x428   :  { %624 = vsyncadd [#allocation16], 4294967264 }
 0x429   :  { %344 = vsyncpa [#allocation3], 1 }
 0x42a   :  { %345 = vsyncpa [#allocation6], 1 }
 0x42b   :  { %346 = vsyncpa [#allocation9], 1 }
 0x42c   :  { %347 = vsyncpa [#allocation12], 1 }
 0x42d   :  { %348 = vsyncpa [#allocation4], 1 }
 0x42e   :  { %349 = vsyncpa [#allocation16], 1 }

// kernel: img_learnable_encoder_forward.3
= control target key start
LH: loop header
LB: loop body
LE: loop exit
PB: predicated region body
PF: predicated region fallthrough
CT: control target
= control target key end

     0   :  { %9 = vsyncpa [#allocation3], 0  ;;  %s1758_s0 = inlined_call_operand.hbm [shape: bf16[2,4,768], index: 0, kind: input, shape index: {}]   ;;  %s1759_s1 = inlined_call_operand.hbm [shape: bf16[768,64], index: 1, kind: input, shape index: {}]   ;;  %s1760_s2 = inlined_call_operand.hbm [shape: f32[1,64], index: 2, kind: input, shape index: {}]   ;;  %s1761_s3 = inlined_call_operand.hbm [shape: f32[4,64], index: 3, kind: input, shape index: {}]   ;;  %s1762_s4 = inlined_call_operand.hbm [shape: bf16[2,4,64], index: 4, kind: output, shape index: {}]  }
   0x1   :  { %11 = vsyncpa [#allocation3 + $0x1], 0 }
   0x2   :  { %12 = vsyncpa [#allocation6], 0 }
   0x3   :  { %13 = vsyncpa [#allocation9], 0 }
   0x4   :  { %14 = vsyncpa [#allocation4], 0 }
   0x5   :  { %16 = vsyncpa [#allocation4 + $0x1], 0  ;;  %s1479_s15 = smov 0   ;;  %s1481_s16 = smov 0  }
   0x6   :  { %s1483_s17 = smov 0   ;;  %s1485_s18 = smov 0  }
   0x7   :  { %s1487_s19 = smov 0   ;;  %s1489_s20 = smov 0  }
   0x8 LB: > { %s959_s21 = sadd.s32 4294967295, %s1444_s20   ;;  %s960_s22 = sadd.s32 4294967294, %s1444_s20   ;;  %s1444_s20 = sphi %s1489_s20, %s22_s20   ;;  %s1440_s19 = sphi %s1487_s19, %s1789_s19   ;;  %s1436_s18 = sphi %s1485_s18, %s1788_s18   ;;  %s1432_s17 = sphi %s1483_s17, %s1787_s17   ;;  %s1428_s16 = sphi %s1481_s16, %s1786_s16   ;;  %s1424_s15 = sphi %s1479_s15, %s1785_s15  }
   0x9   : > { %p56_p0 = scmp.ne.s32.totalorder %s1428_s16, %s1424_s15  ;;  %p1513_p1 = scmp.eq.s32.totalorder %s959_s21, 0 }
   0xa   : > { %p1517_p2 = scmp.eq.s32.totalorder %s959_s21, 1  ;;  %p156_p3 = scmp.eq.s32.totalorder %s960_s22, 1 }
   0xb   : > { %s1768_s23 = scalar_select %p1513_p1, 1, 0 }
   0xc   : > { %s1769_s24 = scalar_select %p1517_p2, 1, 0 }
   0xd   : > { %p1523_p4 = por %p1513_p1, %p56_p0  ;;  %p961_p5 = scmp.ge.s32.totalorder %s1444_s20, 1 }
   0xe   : > { %p1528_p6 = por %p156_p3, %p56_p0  ;;  %p163_p7 = scmp.lt.s32.totalorder %s1444_s20, 3 }
   0xf   : > { %s1770_s25 = scalar_select %p1523_p4, 1, 0 }
  0x10   : > { %s1771_s26 = scalar_select %p1528_p6, 1, 0 }
  0x11   : > { %p1533_p8 = pnand %p961_p5, %p163_p7  ;;  %s1446_s28 = smov [#allocation5]  }
  0x12   : > { %1772 = sst [smem:[#allocation15_spill]] %s1771_s26  ;;  %s175_s29 = sshll.u32 %s1446_s28, 4  ;;  %s1537_s29 = int_to_ptr.vmem [resolvable:$true] %s175_s29 }
  0x13   : > { %s1773_s27 = scalar_select %p1533_p8, 1, 0 }
  0x14   : > { %p1111_p9 = pneg %p1533_p8  ;;  %s1447_s5 = smov [#allocation7]  }
  0x15   : > { %s189_s6 = sshll.u32 %s1447_s5, 4  ;;  %s1448_s7 = smov [#allocation8]   ;;  %s1548_s6 = int_to_ptr.vmem [resolvable:$true] %s189_s6 }
  0x16   : > { %p1544_p11 = pnand %p1111_p9, %p1513_p1  ;;  %s1550_s8 = sshll.u32 %s1448_s7, 4  ;;  %s203_s8 = int_to_ptr.vmem [resolvable:$true] %s1550_s8 }
  0x17   : > { %s1240_s11 = scalar_lea.hbm %s1759_s1, 6144 }
  0x18   : > { %p1241_p12 = scmp.ne.s32.totalorder %s1759_s1, %s1240_s11  ;;  %p1560_p13 = pneg %p1544_p11 }
  0x19   : > { %p1247_p5 = scmp.lt.u32.totalorder %s1240_s11, %s1759_s1 }
  0x1a   : > { %p1243_p0 = pnand %p1560_p13, %p1241_p12 }
  0x1c   : > { %p1244_p3 = pneg %p1243_p0 }
  0x1e   : > { %p1249_p7 = pnand %p1247_p5, %p1244_p3 }
  0x20   : > { %1252 = shalt.err (!%p1249_p7)
}
  0x21   : > { %s1253_s28 = scalar_lea.vmem %s1537_s29, 6144  ;;  %p1261_p1 = scmp.lt.s32.totalorder %s1537_s29, %s1537_s29 }
  0x22   : > { %p1254_p9 = scmp.ne.s32.totalorder %s1537_s29, %s1253_s28  ;;  %p1262_p4 = scmp.lt.s32.totalorder %s1253_s28, %s1253_s28 }
  0x24   : > { %p1256_p10 = pnand %p1254_p9, %p1560_p13  ;;  %p1263_p12 = por %p1262_p4, %p1261_p1 }
  0x26   : > { %p1257_p6 = pneg %p1256_p10 }
  0x28   : > { %p1264_p0 = pnand %p1263_p12, %p1257_p6 }
  0x2a   : > { %1267 = shalt.err (!%p1264_p0)
}
  0x2b   : > { %s1449_s5 = smov 64   ;;  %s1450_s7 = smov 4  }
  0x2c   : > { %1114 = dma.hbm_to_vmem [thread:$0]  (!%p1544_p11), %s1759_s1, 6144, %s1537_s29, [#allocation6], %s1449_s5, %s1449_s5, %s1450_s7  }
  0x2d   : > { %s1268_s13 = scalar_lea.hbm %s1760_s2, 16 }
  0x2e   : > { %p1269_p1 = scmp.ne.s32.totalorder %s1760_s2, %s1268_s13  ;;  %p1275_p10 = scmp.lt.u32.totalorder %s1268_s13, %s1760_s2 }
  0x30   : > { %p1271_p4 = pnand %p1269_p1, %p1560_p13 }
  0x32   : > { %p1272_p6 = pneg %p1271_p4 }
  0x34   : > { %p1277_p3 = pnand %p1275_p10, %p1272_p6 }
  0x36   : > { %1280 = shalt.err (!%p1277_p3)
}
  0x37   : > { %s1281_s29 = scalar_lea.vmem %s1548_s6, 16  ;;  %s1288_s5 = scalar_lea.vmem %s1548_s6, 32 }
  0x38   : > { %p1282_p5 = scmp.ne.s32.totalorder %s1548_s6, %s1281_s29  ;;  %p1289_p12 = scmp.lt.s32.totalorder %s1548_s6, %s1548_s6 }
  0x39   : > { %p1290_p0 = scmp.lt.s32.totalorder %s1288_s5, %s1281_s29 }
  0x3a   : > { %p1284_p7 = pnand %p1282_p5, %p1560_p13 }
  0x3b   : > { %p1291_p1 = por %p1290_p0, %p1289_p12 }
  0x3c   : > { %p1285_p9 = pneg %p1284_p7 }
  0x3e   : > { %p1292_p4 = pnand %p1291_p1, %p1285_p9 }
  0x40   : > { %1295 = shalt.err (!%p1292_p4)
}
  0x41   : > { %1117 = dma.hbm_to_vmem [thread:$0]  (!%p1544_p11), %s1760_s2, 16, %s1548_s6, [#allocation6]  }
  0x42   : > { %s1296_s11 = scalar_lea.hbm %s1761_s3, 64 }
  0x43   : > { %p1297_p6 = scmp.ne.s32.totalorder %s1761_s3, %s1296_s11  ;;  %p1303_p5 = scmp.lt.u32.totalorder %s1296_s11, %s1761_s3 }
  0x45   : > { %p1299_p10 = pnand %p1297_p6, %p1560_p13 }
  0x47   : > { %p1300_p3 = pneg %p1299_p10 }
  0x49   : > { %p1305_p7 = pnand %p1303_p5, %p1300_p3 }
  0x4b   : > { %1308 = shalt.err (!%p1305_p7)
}
  0x4c   : > { %s1309_s28 = scalar_lea.vmem %s203_s8, 64  ;;  %p1317_p1 = scmp.lt.s32.totalorder %s203_s8, %s203_s8 }
  0x4d   : > { %p1310_p9 = scmp.ne.s32.totalorder %s203_s8, %s1309_s28  ;;  %p1318_p4 = scmp.lt.s32.totalorder %s1309_s28, %s1309_s28 }
  0x4f   : > { %p1312_p12 = pnand %p1310_p9, %p1560_p13  ;;  %p1319_p8 = por %p1318_p4, %p1317_p1 }
  0x51   : > { %p1313_p0 = pneg %p1312_p12 }
  0x53   : > { %p1320_p2 = pnand %p1319_p8, %p1313_p0 }
  0x55   : > { %1323 = shalt.err (!%p1320_p2)
}
  0x56   : > { %1120 = dma.hbm_to_vmem [thread:$0]  (!%p1544_p11), %s1761_s3, 64, %s203_s8, [#allocation9]  }
  0x57   : > { %s43_s14 = sadd.s32 1, %s1432_s17  ;;  %s34_s5 = sadd.s32 1, %s1440_s19 }
  0x58   : > { %p50_p2 = scmp.ne.s32.totalorder %s1432_s17, %s1428_s16  ;;  %p36_p8 = scmp.ge.s32.totalorder %s34_s5, 2 }
  0x59   : > { %p51_p13 = scmp.eq.s32.totalorder %s1444_s20, 0  ;;  %p1776_p6 = scmp.ne.s32.totalorder %s1769_s24, 0 }
  0x5a   : > { %p1132_p3 = scmp.lt.s32.totalorder %s1444_s20, 2  ;;  %s1791_s5 = smov (%p36_p8, %s34_s5), 0 }
  0x5b   : > { %p1631_p10 = por %p1776_p6, %p50_p2  ;;  %p52_p5 = por %p51_p13, %p50_p2 }
  0x5c   : > { %s213_s26 = sand.u32 1, %s1432_s17   ;;  %s38_s7 = ssub.s32 %s1440_s19, %s1791_s5 }
  0x5d   : > { %p41_p7 = scmp.eq.s32.totalorder %s38_s7, 0  ;;  %s1092_s8 = smul.u32 12, %s213_s26 }
  0x5e   : > { %s1093_s9 = smul.u32 192, %s1440_s19  ;;  %p1642_p11 = pnand %p1132_p3, %p52_p5 }
  0x5f   : > { %s1647_s24 = scalar_select %p41_p7, %s1432_s17, %s43_s14  }
  0x60   : > { %s1652_s13 = scalar_lea.hbm %s1758_s0, %s1093_s9  ;;  %s217_s21 = scalar_lea.vmem [#allocation2], %s1092_s8 }
  0x61   : > { %s227_s22 = sshll.u32 %s217_s21, 4  ;;  %s214_s28 = scalar_lea.sflag [#allocation3], %s213_s26  ;;  %s1654_s22 = int_to_ptr.vmem [resolvable:$true] %s227_s22 }
  0x62   : > { %s1324_s6 = scalar_lea.hbm %s1652_s13, 192  ;;  %p1326_p12 = pneg %p1642_p11 }
  0x63   : > { %p1325_p9 = scmp.ne.s32.totalorder %s1652_s13, %s1324_s6  ;;  %s1329_s7 = scalar_lea.hbm %s1758_s0, 384 }
  0x64   : > { %p1330_p4 = scmp.lt.u32.totalorder %s1652_s13, %s1758_s0  ;;  %p1331_p2 = scmp.lt.u32.totalorder %s1329_s7, %s1324_s6 }
  0x65   : > { %p1327_p0 = pnand %p1326_p12, %p1325_p9  ;;  %p1333_p13 = scmp.lt.u32.totalorder %s1324_s6, %s1652_s13 }
  0x66   : > { %p1332_p8 = por %p1331_p2, %p1330_p4 }
  0x67   : > { %p1328_p1 = pneg %p1327_p0 }
  0x68   : > { %p1334_p6 = por %p1333_p13, %p1332_p8 }
  0x6a   : > { %p1335_p3 = pnand %p1334_p6, %p1328_p1 }
  0x6c   : > { %1338 = shalt.err (!%p1335_p3)
}
  0x6d   : > { %s1339_s26 = scalar_lea.vmem %s1654_s22, 192  ;;  %s1451_s8 = smov [#allocation2]  }
  0x6e   : > { %p1340_p5 = scmp.ne.s32.totalorder %s1654_s22, %s1339_s26  ;;  %s1344_s12 = sshll.u32 %s1451_s8, 4  ;;  %s1345_s12 = int_to_ptr.vmem [resolvable:$false] %s1344_s12 }
  0x6f   : > { %s1346_s21 = scalar_lea.vmem %s1345_s12, 384  ;;  %p1347_p0 = scmp.lt.s32.totalorder %s1654_s22, %s1345_s12 }
  0x70   : > { %p1342_p7 = pnand %p1340_p5, %p1326_p12  ;;  %p1348_p4 = scmp.lt.s32.totalorder %s1346_s21, %s1339_s26 }
  0x72   : > { %p1343_p9 = pneg %p1342_p7  ;;  %p1349_p2 = por %p1348_p4, %p1347_p0 }
  0x74   : > { %p1350_p8 = pnand %p1349_p2, %p1343_p9 }
  0x76   : > { %1353 = shalt.err (!%p1350_p8)
}
  0x77   : > { %1124 = dma.hbm_to_vmem [thread:$0]  (!%p1642_p11), %s1652_s13, 192, %s1654_s22, %s214_s28  }
  0x78   : > { %p1779_p1 = scmp.ne.s32.totalorder %s1773_s27, 0 }
  0x79   : > { %s1684_s6 = sand.u32 (!%p1779_p1), 1, %s1428_s16   ;;  %p1780_p12 = scmp.ne.s32.totalorder (!%p1779_p1), %s1770_s25, 0 }
  0x7a   : > { %236 = sbr.rel (%p1779_p1) target bundleno = 435 (0x1b3), region = 36  ;;  %s239_s14 = scalar_lea.sflag (!%p1779_p1), [#allocation3], %s1684_s6 }
  0x7b   : > { %s1094_s29 = smul.u32 (!%p1779_p1), 12, %s1684_s6 }
  0x7d   : > { %s1688_s7 = scalar_lea.vmem (!%p1779_p1), [#allocation2], %s1094_s29 }
  0x81   : > { %1407 = dma.done.wait (%p1780_p12), %s239_s14, 192  }
  0x82   : > { %1409 = vsyncadd (%p1780_p12), %s239_s14, 4294967104  ;;  %p1781_p11 = scmp.ne.s32.totalorder %s1768_s23, 0 }
  0x84   : > { %1411 = dma.done.wait (%p1781_p11), [#allocation6], 6160  }
  0x85   : > { %1413 = vsyncadd (%p1781_p11), [#allocation6], 4294961136 }
  0x86   : > { %1415 = dma.done.wait (%p1781_p11), [#allocation9], 64  }
  0x87   : > { %1417 = vsyncadd (%p1781_p11), [#allocation9], 4294967232  ;;  %v1191_v0 = vld [vmem:[#allocation5 + $0x40] sm:$0xff]   ;;  %v1195_v4 = vld [vmem:[#allocation5 + $0x48] sm:$0xff]   ;;  %v1452_v21 = vmov 1983009808   ;;  %v391_v23 = vlaneseq }
  0x88   : > { %v1192_v1 = vld [vmem:[#allocation5] sm:$0xff]   ;;  %1026 = vmatprep.subr.bf16.mxu0 %v1191_v0  ;;  %v1196_v5 = vld [vmem:[#allocation5 + $0x8] sm:$0xff]   ;;  %v1199_v8 = vld [vmem:[#allocation5 + $0x50] sm:$0xff]   ;;  %v389_v22 = vunpack.c.l.s4 %v1452_v21  ;;  %s971_s23 = sshll.u32 %s1684_s6, 1  ;;  %s1023_s25 = sshll.u32 %s1436_s18, 5  ;;  %vm829_vm0 = vcmask 517120  }
  0x89   : > { %v1193_v2 = vld [vmem:[#allocation5 + $0xc0] sm:$0xff]   ;;  %1027 = vmatpush3.bf16.msra.mxu0 %v1192_v1  ;;  %v1197_v6 = vld [vmem:[#allocation5 + $0xc8] sm:$0xff]   ;;  %v1200_v9 = vld [vmem:[#allocation5 + $0x10] sm:$0xff]   ;;  %v392_v29 = vshrl.u32 %v391_v23, 7  ;;  %s278_s27 = scalar_lea.vmem [#allocation10], %s971_s23  ;;  %s1709_s28 = scalar_lea.hbm %s1762_s4, %s1023_s25 }
  0x8a   : > { %v1194_v3 = vld [vmem:[#allocation5 + $0x80] sm:$0xff]   ;;  %1048 = vmatprep.subr.bf16.mxu1 %v1193_v2  ;;  %1028 = vmatprep.subr.bf16.mxu0 %v1195_v4  ;;  %v1198_v7 = vld [vmem:[#allocation5 + $0x88] sm:$0xff]   ;;  %v1201_v10 = vld [vmem:[#allocation5 + $0xd0] sm:$0xff]   ;;  %v390_v28 = vunpack.c.0.s8 %v389_v22  ;;  %s846_s10 = sshll.u32 %s278_s27, 4  ;;  %s832_s9 = scalar_lea.sflag [#allocation4], %s1684_s6  ;;  %s1711_s10 = int_to_ptr.vmem [resolvable:$true] %s846_s10 }
  0x8b   : > { %1049 = vmatpush3.bf16.msra.mxu1 %v1194_v3  ;;  %v1202_v11 = vld [vmem:[#allocation5 + $0x90] sm:$0xff]   ;;  %v1203_v12 = vld [vmem:[#allocation5 + $0x58] sm:$0xff]   ;;  %v1207_v16 = vld [vmem:[#allocation5 + $0x60] sm:$0xff]   ;;  %s1354_s11 = scalar_lea.vmem %s1711_s10, 32  ;;  %s1453_s18 = smov [#allocation10]  }
  0x8c   : > { %1050 = vmatprep.subr.bf16.mxu1 %v1197_v6  ;;  %v1204_v13 = vld [vmem:[#allocation5 + $0x18] sm:$0xff]   ;;  %v1208_v17 = vld [vmem:[#allocation5 + $0x20] sm:$0xff]   ;;  %v1211_v20 = vld [vmem:[#allocation5 + $0x68] sm:$0xff]   ;;  %v393_v34 = vsub.s32 %v390_v28, %v392_v29  ;;  %p1355_p13 = scmp.ne.s32.totalorder %s1711_s10, %s1354_s11  ;;  %s1358_s26 = sshll.u32 %s1453_s18, 4  ;;  %s1359_s26 = int_to_ptr.vmem [resolvable:$false] %s1358_s26 }
  0x8d   : > { %1029 = vmatpush3.bf16.msra.mxu0 %v1196_v5  ;;  %v1205_v14 = vld [vmem:[#allocation5 + $0xd8] sm:$0xff]   ;;  %v1209_v18 = vld [vmem:[#allocation5 + $0xe0] sm:$0xff]   ;;  %v1212_v24 = vld [vmem:[#allocation5 + $0x28] sm:$0xff]   ;;  %s1360_s8 = scalar_lea.vmem %s1359_s26, 64  ;;  %p1361_p5 = scmp.lt.s32.totalorder %s1711_s10, %s1359_s26 }
  0x8e   : > { %1030 = vmatprep.subr.bf16.mxu0 %v1199_v8  ;;  %v1206_v15 = vld [vmem:[#allocation5 + $0x98] sm:$0xff]   ;;  %v1210_v19 = vld [vmem:[#allocation5 + $0xa0] sm:$0xff]   ;;  %v1213_v25 = vld [vmem:[#allocation5 + $0xe8] sm:$0xff]   ;;  %p1356_p6 = pnand %p1355_p13, %p1631_p10  ;;  %p1362_p7 = scmp.lt.s32.totalorder %s1360_s8, %s1354_s11 }
  0x8f   : > { %1051 = vmatpush3.bf16.msra.mxu1 %v1198_v7  ;;  %v1214_v26 = vld [vmem:[#allocation5 + $0xa8] sm:$0xff]   ;;  %v1215_v27 = vld [vmem:[#allocation5 + $0x70] sm:$0xff]   ;;  %v1219_v33 = vld [vmem:[#allocation5 + $0x78] sm:$0xff]  }
  0x90   : > { %1052 = vmatprep.subr.bf16.mxu1 %v1201_v10  ;;  %v1216_v30 = vld [vmem:[#allocation5 + $0x30] sm:$0xff]   ;;  %v1220_v35 = vld [vmem:[#allocation5 + $0x38] sm:$0xff]   ;;  %v1223_v41 = vld [vmem:[#allocation5 + $0x140] sm:$0xff]   ;;  %p1357_p3 = pneg %p1356_p6  ;;  %p1363_p9 = por %p1362_p7, %p1361_p5 }
  0x91   : > { %1031 = vmatpush3.bf16.msra.mxu0 %v1200_v9  ;;  %v1217_v31 = vld [vmem:[#allocation5 + $0xf0] sm:$0xff]   ;;  %v1221_v36 = vld [vmem:[#allocation5 + $0xf8] sm:$0xff]   ;;  %v1225_v44 = vld [vmem:[#allocation5 + $0x100] sm:$0xff]  }
  0x92   : > { %1032 = vmatprep.subr.bf16.mxu0 %v1203_v12  ;;  %v1218_v32 = vld [vmem:[#allocation5 + $0xb0] sm:$0xff]   ;;  %v1222_v39 = vld [vmem:[#allocation5 + $0xb8] sm:$0xff]   ;;  %v1226_v45 = vld [vmem:[#allocation5 + $0x148] sm:$0xff]   ;;  %p1364_p0 = pnand %p1363_p9, %p1357_p3 }
  0x93   : > { %1053 = vmatpush3.bf16.msra.mxu1 %v1202_v11  ;;  %v280_v37 = vld [vmem:[%s1688_s7] sm:$0xff]  ;;  %v1232_v52 = vld [vmem:[#allocation5 + $0x160] sm:$0xff]   ;;  %v973_v53 = vld.sshfl [vmem:[%s1688_s7 + $0x8] sm:$0x33 pattern:$0x76325410] }
  0x94   : > { %1054 = vmatprep.subr.bf16.mxu1 %v1205_v14  ;;  %v394_v38 = vrot.slane %v280_v37, %v393_v34  ;;  %v387_v40 = vcombine.high %v280_v37, %v280_v37  ;;  %v1227_v47 = vld [vmem:[#allocation5 + $0x108] sm:$0xff]   ;;  %v1228_v48 = vld [vmem:[#allocation5 + $0x150] sm:$0xff]   ;;  %v1230_v50 = vld [vmem:[#allocation5 + $0x158] sm:$0xff]   ;;  %v411_v54 = vcombine.high %v973_v53, %v973_v53 }
  0x95   : > { %1033 = vmatpush3.bf16.msra.mxu0 %v1204_v13  ;;  %v1229_v49 = vld [vmem:[#allocation5 + $0x110] sm:$0xff]   ;;  %v1231_v51 = vld [vmem:[#allocation5 + $0x118] sm:$0xff]   ;;  %v1233_v55 = vld [vmem:[#allocation5 + $0x120] sm:$0xff]  }
  0x96   : > { %1034 = vmatprep.subr.bf16.mxu0 %v1207_v16  ;;  %v402_v42 = vcombine.high %v394_v38, %v394_v38  ;;  %v401_v43 = vrot.slane %v387_v40, %v393_v34  ;;  %v1234_v56 = vld [vmem:[#allocation5 + $0x168] sm:$0xff]   ;;  %v1236_v58 = vld [vmem:[#allocation5 + $0x170] sm:$0xff]   ;;  %v1238_v60 = vld [vmem:[#allocation5 + $0x178] sm:$0xff]  }
  0x97   : > { %1055 = vmatpush3.bf16.msra.mxu1 %v1206_v15  ;;  %v1235_v57 = vld [vmem:[#allocation5 + $0x128] sm:$0xff]   ;;  %v1237_v59 = vld [vmem:[#allocation5 + $0x130] sm:$0xff]   ;;  %v1239_v61 = vld [vmem:[#allocation5 + $0x138] sm:$0xff]  }
  0x98   : > { %1056 = vmatprep.subr.bf16.mxu1 %v1209_v18  ;;  %738 = vmatprep.mubr.bf16.mxu0 %v402_v42  ;;  %v403_v46 = vcombine.high %v401_v43, %v401_v43  ;;  %v972_v63 = vld [vmem:[#allocation7] ss:$0 sm:$0xff]  ;;  %v826_v15 = vld [vmem:[#allocation8] sm:$0xf] }
  0x99   : > { %1035 = vmatpush3.bf16.msra.mxu0 %v1208_v17 }
  0x9a   : > { %1036 = vmatprep.subr.bf16.mxu0 %v1211_v20  ;;  %778 = vmatprep.mubr.bf16.mxu1 %v403_v46 }
  0x9b   : > { %1057 = vmatpush3.bf16.msra.mxu1 %v1210_v19 }
  0x9c   : > { %1058 = vmatprep.subr.bf16.mxu1 %v1213_v25 }
  0x9d   : > { %1037 = vmatpush3.bf16.msra.mxu0 %v1212_v24 }
  0x9e   : > { %1038 = vmatprep.subr.bf16.mxu0 %v1215_v27 }
  0x9f   : > { %1059 = vmatpush3.bf16.msra.mxu1 %v1214_v26 }
  0xa0   : > { %1060 = vmatprep.subr.bf16.mxu1 %v1217_v31 }
  0xa1   : > { %1039 = vmatpush3.bf16.msra.mxu0 %v1216_v30 }
  0xa2   : > { %1040 = vmatprep.subr.bf16.mxu0 %v1219_v33 }
  0xa3   : > { %1061 = vmatpush3.bf16.msra.mxu1 %v1218_v32 }
  0xa4   : > { %1062 = vmatprep.subr.bf16.mxu1 %v1221_v36 }
  0xa5   : > { %1041 = vmatpush3.bf16.msra.mxu0 %v1220_v35 }
  0xa6   : > { %1070 = vmatprep.subr.bf16.mxu0 %v1223_v41 }
  0xa7   : > { %1063 = vmatpush3.bf16.msra.mxu1 %v1222_v39 }
  0xa8   : > { %739 = vmatmul.mubr.bf16.vlgmr.msra.gmra.mrb[0].mxu0 %v394_v38 }
  0xa9   : > { %1071 = vmatpush3.bf16.msra.mxu0 %v1225_v44  ;;  %818 = vmatprep.mubr.bf16.mxu0 %v411_v54 }
  0xaa   : > { %779 = vmatmul.mubr.bf16.vlgmr.msra.gmra.mrb[0].mxu1 %v401_v43  ;;  %1072 = vmatprep.subr.bf16.mxu0 %v1226_v45 }
  0xad   : > { %1073 = vmatpush3.bf16.msra.mxu0 %v1227_v47 }
  0xae   : > { %1074 = vmatprep.subr.bf16.mxu0 %v1228_v48 }
  0xb1   : > { %1075 = vmatpush3.bf16.msra.mxu0 %v1229_v49 }
  0xb2   : > { %1076 = vmatprep.subr.bf16.mxu0 %v1230_v50 }
  0xb5   : > { %1077 = vmatpush3.bf16.msra.mxu0 %v1231_v51 }
  0xb6   : > { %1078 = vmatprep.subr.bf16.mxu0 %v1232_v52 }
  0xb9   : > { %1079 = vmatpush3.bf16.msra.mxu0 %v1233_v55 }
  0xba   : > { %1080 = vmatprep.subr.bf16.mxu0 %v1234_v56 }
  0xbd   : > { %1081 = vmatpush3.bf16.msra.mxu0 %v1235_v57 }
  0xbe   : > { %1082 = vmatprep.subr.bf16.mxu0 %v1236_v58 }
  0xc1   : > { %1083 = vmatpush3.bf16.msra.mxu0 %v1237_v59 }
  0xc2   : > { %1084 = vmatprep.subr.bf16.mxu0 %v1238_v60 }
  0xc5   : > { %1085 = vmatpush3.bf16.msra.mxu0 %v1239_v61 }
  0xc8   : > { %819 = vmatmul.mubr.bf16.vlgmr.msra.gmra.mrb[4].mxu0 %v973_v53 }
 0x17b   : > { %v1042_v62 = vpop.f32.mrb[0].mxu0 }
 0x17c   : > { %v1043_v0 = vpop.f32.mrb[1].mxu0 }
 0x17d   : > { %v1044_v1 = vadd.f32 %v1043_v0, %v1042_v62  ;;  %v1045_v2 = vpop.f32.mrb[2].mxu0  ;;  %v1064_v3 = vpop.f32.mrb[0].mxu1 }
 0x17e   : > { %v1046_v4 = vpop.f32.mrb[3].mxu0  ;;  %v1065_v5 = vpop.f32.mrb[1].mxu1 }
 0x17f   : > { %v741_v6 = vadd.f32 %v1044_v1, %v972_v63  ;;  %v1066_v7 = vadd.f32 %v1065_v5, %v1064_v3  ;;  %v1067_v8 = vpop.f32.mrb[2].mxu1 }
 0x180   : > { %v1068_v9 = vpop.f32.mrb[3].mxu1 }
 0x181   : > { %v781_v10 = vadd.f32 %v1066_v7, %v741_v6 }
 0x19b   : > { %v1086_v11 = vpop.f32.mrb[4].mxu0 }
 0x19c   : > { %v1087_v12 = vpop.f32.mrb[5].mxu0 }
 0x19d   : > { %v1088_v13 = vadd.f32 %v1087_v12, %v1086_v11  ;;  %v1089_v14 = vpop.f32.mrb[6].mxu0 }
 0x19e   : > { %v1090_v16 = vpop.f32.mrb[7].mxu0 }
 0x19f   : > { %v821_v17 = vadd.f32 %v1088_v13, %v781_v10 }
 0x1a1   : > { %v827_v18 = vadd.f32 %v826_v15, %v821_v17 }
 0x1a3   : > { %v828_v19 = vpack.c.bf16 %v827_v18, %v827_v18 }
 0x1a5   : > { %830 = vst.msk [vmem:[%s278_s27] sm:$0x3] %vm829_vm0, %v828_v19 }
 0x1a6   : > { %1367 = shalt.err (!%p1364_p0)
}
 0x1a7   : > { %s1368_s12 = scalar_lea.hbm %s1709_s28, 32  ;;  %s1372_s29 = scalar_lea.hbm %s1762_s4, 64 }
 0x1a8   : > { %p1369_p4 = scmp.ne.s32.totalorder %s1709_s28, %s1368_s12  ;;  %p1373_p1 = scmp.lt.u32.totalorder %s1709_s28, %s1762_s4 }
 0x1a9   : > { %p1374_p12 = scmp.lt.u32.totalorder %s1372_s29, %s1368_s12  ;;  %p1376_p13 = scmp.lt.u32.totalorder %s1368_s12, %s1709_s28 }
 0x1aa   : > { %p1370_p2 = pnand %p1369_p4, %p1631_p10 }
 0x1ab   : > { %p1375_p11 = por %p1374_p12, %p1373_p1 }
 0x1ac   : > { %p1371_p8 = pneg %p1370_p2 }
 0x1ad   : > { %p1377_p6 = por %p1376_p13, %p1375_p11 }
 0x1af   : > { %p1378_p3 = pnand %p1377_p6, %p1371_p8 }
 0x1b1   : > { %1381 = shalt.err (!%p1378_p3)
}
 0x1b2   : > { %1109 = dma.vmem_to_hbm [thread:$0]  (%p1631_p10), %s1711_s10, 32, %s1709_s28, %s832_s9  }
 0x1b3 PF: > { %s1782_s23 = sld [smem:[#allocation15_spill]]  ;;  %s858_s25 = sand.u32 1, %s1424_s15  }
 0x1b4   : > { %p1784_p7 = scmp.ge.s32.totalorder %s1444_s20, 2  ;;  %s859_s27 = scalar_lea.sflag [#allocation4], %s858_s25 }
 0x1b9   : > { %p1783_p5 = scmp.ne.s32.totalorder %s1782_s23, 0 }
 0x1bb   : > { %p1126_p9 = pnand %p1784_p7, %p1783_p5 }
 0x1bd   : > { %1419 = dma.done.wait (!%p1126_p9), %s859_s27, 32  }
 0x1be   : > { %1421 = vsyncadd (!%p1126_p9), %s859_s27, 4294967264  ;;  %s22_s20 = sadd.s32 1, %s1444_s20   ;;  %s1785_s15 = smov %s1428_s16 }
 0x1bf   : > { %p19_p0 = scmp.ge.s32.totalorder %s22_s20, 4   ;;  %s1786_s16 = smov %s1432_s17 }
 0x1c0   : > { %s1787_s17 = smov %s1647_s24  ;;  %s1788_s18 = smov %s1440_s19 }
 0x1c1   : > { %s1789_s19 = smov %s1791_s5  ;;  %21 = sbr.rel (!%p19_p0) target bundleno = 8 (0x8), region = 94 }
 0x1c8   :  { %864 = vsyncpa [#allocation3], 1 }
 0x1c9   :  { %866 = vsyncpa [#allocation3 + $0x1], 1 }
 0x1ca   :  { %867 = vsyncpa [#allocation6], 1 }
 0x1cb   :  { %868 = vsyncpa [#allocation9], 1 }
 0x1cc   :  { %869 = vsyncpa [#allocation4], 1 }
 0x1cd   :  { %871 = vsyncpa [#allocation4 + $0x1], 1 }

// kernel: img_learnable_encoder_forward.4
= control target key start
LH: loop header
LB: loop body
LE: loop exit
PB: predicated region body
PF: predicated region fallthrough
CT: control target
= control target key end

     0   :  { %s4662_s0 = inlined_call_operand.hbm [shape: f32[1,64], index: 0, kind: input, shape index: {}]   ;;  %s4663_s1 = inlined_call_operand.hbm [shape: bf16[2,4,64], index: 1, kind: input, shape index: {}]   ;;  %s4664_s2 = inlined_call_operand.hbm [shape: f32[2,1,64], index: 2, kind: input, shape index: {}]   ;;  %s4665_s3 = inlined_call_operand.hbm [shape: f32[2,1,64], index: 3, kind: input, shape index: {}]   ;;  %s4666_s4 = inlined_call_operand.hbm [shape: bf16[2,192,64], index: 4, kind: input, shape index: {}]   ;;  %s4667_s5 = inlined_call_operand.hbm [shape: f32[2,192,1], index: 5, kind: input, shape index: {}]   ;;  %s4668_s6 = inlined_call_operand.hbm [shape: bf16[2,64,64], index: 6, kind: input, shape index: {}]   ;;  %s4669_s7 = inlined_call_operand.hbm [shape: f32[2,1,64], index: 7, kind: input, shape index: {}]   ;;  %s4670_s8 = inlined_call_operand.hbm [shape: f32[2,1,64], index: 8, kind: input, shape index: {}]   ;;  %s4671_s9 = inlined_call_operand.hbm [shape: f32[2,1,64], index: 9, kind: input, shape index: {}]   ;;  %s4672_s10 = inlined_call_operand.hbm [shape: bf16[2,64,256], index: 10, kind: input, shape index: {}]   ;;  %s4673_s11 = inlined_call_operand.hbm [shape: f32[2,1,256], index: 11, kind: input, shape index: {}]   ;;  %s4674_s12 = inlined_call_operand.hbm [shape: bf16[2,256,64], index: 12, kind: input, shape index: {}]   ;;  %s4675_s13 = inlined_call_operand.hbm [shape: f32[2,1,64], index: 13, kind: input, shape index: {}]   ;;  %s4676_s14 = inlined_call_operand.hbm [shape: f32[2,8,64], index: 14, kind: output, shape index: {0}]   ;;  %s4677_s15 = inlined_call_operand.hbm [shape: f32[2,2,1,64], index: 15, kind: output, shape index: {1}]  }
   0x1   :  { %4728 = sst [smem:[#allocation57_spill]] %s4662_s0 }
   0x2   :  { %4729 = sst [smem:[#allocation58_spill]] %s4663_s1 }
   0x3   :  { %4730 = sst [smem:[#allocation59_spill]] %s4664_s2 }
   0x4   :  { %4731 = sst [smem:[#allocation60_spill]] %s4665_s3 }
   0x5   :  { %4732 = sst [smem:[#allocation61_spill]] %s4666_s4 }
   0x6   :  { %4733 = sst [smem:[#allocation62_spill]] %s4667_s5 }
   0x7   :  { %4734 = sst [smem:[#allocation63_spill]] %s4668_s6 }
   0x8   :  { %4735 = sst [smem:[#allocation64_spill]] %s4669_s7 }
   0x9   :  { %4736 = sst [smem:[#allocation65_spill]] %s4670_s8 }
   0xa   :  { %4737 = sst [smem:[#allocation66_spill]] %s4671_s9 }
   0xb   :  { %4738 = sst [smem:[#allocation67_spill]] %s4672_s10 }
   0xc   :  { %4739 = sst [smem:[#allocation68_spill]] %s4673_s11 }
   0xd   :  { %4740 = sst [smem:[#allocation69_spill]] %s4674_s12 }
   0xe   :  { %4741 = sst [smem:[#allocation70_spill]] %s4675_s13 }
   0xf   :  { %4742 = sst [smem:[#allocation71_spill]] %s4676_s14 }
  0x10   :  { %4743 = sst [smem:[#allocation72_spill]] %s4677_s15 }
  0x11   :  { %21 = vsyncpa [#allocation5], 0 }
  0x12   :  { %22 = vsyncpa [#allocation8], 0 }
  0x13   :  { %24 = vsyncpa [#allocation8 + $0x1], 0 }
  0x14   :  { %25 = vsyncpa [#allocation11], 0 }
  0x15   :  { %27 = vsyncpa [#allocation11 + $0x1], 0 }
  0x16   :  { %28 = vsyncpa [#allocation14], 0 }
  0x17   :  { %30 = vsyncpa [#allocation14 + $0x1], 0 }
  0x18   :  { %31 = vsyncpa [#allocation17], 0 }
  0x19   :  { %33 = vsyncpa [#allocation17 + $0x1], 0 }
  0x1a   :  { %34 = vsyncpa [#allocation20], 0 }
  0x1b   :  { %36 = vsyncpa [#allocation20 + $0x1], 0 }
  0x1c   :  { %37 = vsyncpa [#allocation23], 0 }
  0x1d   :  { %39 = vsyncpa [#allocation23 + $0x1], 0 }
  0x1e   :  { %40 = vsyncpa [#allocation26], 0 }
  0x1f   :  { %42 = vsyncpa [#allocation26 + $0x1], 0 }
  0x20   :  { %43 = vsyncpa [#allocation6], 0 }
  0x21   :  { %45 = vsyncpa [#allocation6 + $0x1], 0 }
  0x22   :  { %46 = vsyncpa [#allocation29], 0 }
  0x23   :  { %48 = vsyncpa [#allocation29 + $0x1], 0  ;;  %s3633_s18 = smov 0   ;;  %s3635_s19 = smov 0  }
  0x24   :  { %s3637_s20 = smov 0   ;;  %s3639_s21 = smov 0  }
  0x25   :  { %s3641_s22 = smov 0   ;;  %s3643_s23 = smov 0  }
  0x26   :  { %s3645_s24 = smov 0   ;;  %s3647_s25 = smov 0  }
  0x27   :  { %s3649_s26 = smov 0   ;;  %s3651_s27 = smov 0  }
  0x28   :  { %s3653_s28 = smov 0   ;;  %s3655_s29 = smov 0  }
  0x29   :  { %s3657_s30 = smov 0   ;;  %s3659_s16 = smov 0  }
  0x2a LB: > { %4744 = sst [smem:[#allocation41_spill]] %s3469_s18  ;;  %s63_s17 = sadd.s32 1, %s3513_s29  ;;  %s3521_s16 = sphi %s3659_s16, %s54_s16   ;;  %s3517_s30 = sphi %s3657_s30, %s4848_s30   ;;  %s3513_s29 = sphi %s3655_s29, %s4856_s29   ;;  %s3509_s28 = sphi %s3653_s28, %s4846_s28   ;;  %s3505_s27 = sphi %s3651_s27, %s4855_s27   ;;  %s3501_s26 = sphi %s3649_s26, %s4845_s26   ;;  %s3497_s25 = sphi %s3647_s25, %s4854_s25   ;;  %s3493_s24 = sphi %s3645_s24, %s4853_s24   ;;  %s3489_s23 = sphi %s3643_s23, %s4852_s23   ;;  %s3485_s22 = sphi %s3641_s22, %s4851_s22   ;;  %s3481_s21 = sphi %s3639_s21, %s4850_s21   ;;  %s3477_s20 = sphi %s3637_s20, %s4841_s20   ;;  %s3473_s19 = sphi %s3635_s19, %s4840_s19   ;;  %s3469_s18 = sphi %s3633_s18, %s4839_s18  }
  0x2b   : > { %4745 = sst [smem:[#allocation42_spill]] %s3473_s19  ;;  %s66_s15 = sadd.s32 1, %s3517_s30 }
  0x2c   : > { %4746 = sst [smem:[#allocation43_spill]] %s3477_s20  ;;  %p64_p0 = scmp.ge.s32.totalorder %s63_s17, 2 }
  0x2d   : > { %4747 = sst [smem:[#allocation44_spill]] %s3489_s23  ;;  %s94_s14 = sadd.s32 1, %s3501_s26 }
  0x2e   : > { %4748 = sst [smem:[#allocation45_spill]] %s3493_s24  ;;  %p4694_p1 = scmp.ne.s32.totalorder %s3501_s26, %s3497_s25 }
  0x2f   : > { %4749 = sst [smem:[#allocation46_spill]] %s3501_s26  ;;  %p102_p2 = scmp.eq.s32.totalorder %s3521_s16, 0 }
  0x30   : > { %4750 = sst [smem:[#allocation47_spill]] %s3505_s27  ;;  %s4858_s17 = smov (%p64_p0, %s63_s17), 0 }
  0x31   : > { %4751 = sst [smem:[#allocation48_spill]] %s3509_s28  ;;  %s4860_s15 = smov (!%p64_p0, %s66_s15), %s3517_s30 }
  0x32   : > { %4752 = sst [smem:[#allocation49_spill]] %s3517_s30  ;;  %p3715_p3 = por %p102_p2, %p4694_p1 }
  0x33   : > { %4753 = sst [smem:[#allocation50_spill]] %s4858_s17  ;;  %s117_s27 = ssub.s32 %s3513_s29, %s4858_s17 }
  0x34   : > { %p68_p4 = scmp.ge.s32.totalorder %s4860_s15, 2  ;;  %p118_p5 = scmp.eq.s32.totalorder %s117_s27, 0 }
  0x35   : > { %s120_s13 = sadd.s32 1, %s3489_s23  ;;  %p127_p6 = scmp.ne.s32.totalorder %s3489_s23, %s3485_s22 }
  0x36   : > { %s4862_s15 = smov (%p68_p4, %s4860_s15), 0  ;;  %p2699_p10 = scmp.lt.s32.totalorder %s3521_s16, 4 }
  0x37   : > { %4755 = sst [smem:[#allocation51_spill]] %s4862_s15  ;;  %s91_s10 = ssub.s32 %s3517_s30, %s4862_s15 }
  0x38   : > { %s3727_s12 = scalar_select %p118_p5, %s3489_s23, %s120_s13  }
  0x39   : > { %p3731_p7 = por %p127_p6, %p102_p2  ;;  %p92_p8 = scmp.eq.s32.totalorder %s91_s10, 0 }
  0x3a   : > { %4756 = sst [smem:[#allocation52_spill]] %s3727_s12  ;;  %s457_s17 = sor.u32 %s117_s27, %s91_s10 }
  0x3b   : > { %p3735_p9 = scmp.eq.s32.totalorder %s457_s17, 0  ;;  %s3744_s0 = sand.u32 1, %s3521_s16  }
  0x3c   : > { %s3740_s4 = scalar_select %p92_p8, %s3501_s26, %s94_s14  }
  0x3d   : > { %s4758_s6 = scalar_select %p3735_p9, 1, 0 }
  0x3e   : > { %4759 = sst [smem:[#allocation53_spill]] %s3740_s4  ;;  %s510_s13 = sand.u32 1, %s3501_s26  }
  0x3f   : > { %s2413_s15 = sshll.u32 %s510_s13, 1  ;;  %s2414_s12 = sshll.u32 %s3517_s30, 5 }
  0x40   : > { %s4760_s1 = sld [smem:[#allocation58_spill]]  ;;  %s512_s10 = scalar_lea.vmem [#allocation7], %s2413_s15 }
  0x41   : > { %s519_s27 = sshll.u32 %s512_s10, 4  ;;  %p3755_p11 = pnand %p2699_p10, %p3715_p3  ;;  %s3759_s27 = int_to_ptr.vmem [resolvable:$true] %s519_s27 }
  0x42   : > { %s3762_s17 = sand.u32 1, %s3489_s23   ;;  %p3766_p12 = pnand %p2699_p10, %p3731_p7 }
  0x43   : > { %p2891_p0 = pneg %p3755_p11 }
  0x44   : > { %s4762_s2 = scalar_select %p3766_p12, 1, 0 }
  0x46   : > { %s3751_s19 = scalar_lea.hbm %s4760_s1, %s2414_s12  ;;  %s4695_s12 = scalar_lea.sflag [#allocation8], %s3744_s0 }
  0x47   : > { %s2889_s15 = scalar_lea.hbm %s3751_s19, 32  ;;  %s2894_s13 = scalar_lea.hbm %s4760_s1, 64 }
  0x48   : > { %p2890_p13 = scmp.ne.s32.totalorder %s3751_s19, %s2889_s15  ;;  %p2895_p4 = scmp.lt.u32.totalorder %s3751_s19, %s4760_s1 }
  0x49   : > { %p2896_p5 = scmp.lt.u32.totalorder %s2894_s13, %s2889_s15  ;;  %p2898_p7 = scmp.lt.u32.totalorder %s2889_s15, %s3751_s19 }
  0x4a   : > { %p2892_p2 = pnand %p2891_p0, %p2890_p13 }
  0x4b   : > { %p2897_p6 = por %p2896_p5, %p2895_p4 }
  0x4c   : > { %p2893_p3 = pneg %p2892_p2 }
  0x4d   : > { %p2899_p8 = por %p2898_p7, %p2897_p6 }
  0x4f   : > { %p2900_p10 = pnand %p2899_p8, %p2893_p3 }
  0x51   : > { %2903 = shalt.err (!%p2900_p10)
}
  0x52   : > { %s2904_s8 = scalar_lea.vmem %s3759_s27, 32  ;;  %s3527_s18 = smov [#allocation7]  }
  0x53   : > { %p2905_p13 = scmp.ne.s32.totalorder %s3759_s27, %s2904_s8  ;;  %s2909_s28 = sshll.u32 %s3527_s18, 4  ;;  %s2910_s28 = int_to_ptr.vmem [resolvable:$false] %s2909_s28 }
  0x54   : > { %s2911_s30 = scalar_lea.vmem %s2910_s28, 64  ;;  %p2912_p9 = scmp.lt.s32.totalorder %s3759_s27, %s2910_s28 }
  0x55   : > { %p2907_p2 = pnand %p2905_p13, %p2891_p0  ;;  %p2913_p4 = scmp.lt.s32.totalorder %s2911_s30, %s2904_s8 }
  0x57   : > { %p2908_p1 = pneg %p2907_p2  ;;  %p2914_p5 = por %p2913_p4, %p2912_p9 }
  0x59   : > { %p2915_p6 = pnand %p2914_p5, %p2908_p1 }
  0x5b   : > { %2918 = shalt.err (!%p2915_p6)
}
  0x5c   : > { %2654 = dma.hbm_to_vmem [thread:$0]  (!%p3755_p11), %s3751_s19, 32, %s3759_s27, %s4695_s12  }
  0x5d   : > { %s3799_s15 = sshll.u32 %s3513_s29, 4  ;;  %s4763_s3 = sld [smem:[#allocation60_spill]] }
  0x5e   : > { %s546_s14 = scalar_lea.vmem [#allocation10], %s3762_s17  ;;  %p3815_p9 = pneg %p3766_p12 }
  0x5f   : > { %s553_s18 = sshll.u32 %s546_s14, 4  ;;  %s3808_s18 = int_to_ptr.vmem [resolvable:$true] %s553_s18 }
  0x63   : > { %s3805_s8 = scalar_lea.hbm %s4763_s3, %s3799_s15  ;;  %s2924_s10 = scalar_lea.hbm %s4763_s3, 32 }
  0x64   : > { %s2919_s30 = scalar_lea.hbm %s3805_s8, 16  ;;  %p2925_p3 = scmp.lt.u32.totalorder %s3805_s8, %s4763_s3 }
  0x65   : > { %p2920_p1 = scmp.ne.s32.totalorder %s3805_s8, %s2919_s30  ;;  %p2926_p7 = scmp.lt.u32.totalorder %s2924_s10, %s2919_s30 }
  0x66   : > { %p2928_p10 = scmp.lt.u32.totalorder %s2919_s30, %s3805_s8 }
  0x67   : > { %p2922_p11 = pnand %p3815_p9, %p2920_p1  ;;  %p2927_p8 = por %p2926_p7, %p2925_p3 }
  0x69   : > { %p2923_p0 = pneg %p2922_p11  ;;  %p2929_p13 = por %p2928_p10, %p2927_p8 }
  0x6b   : > { %p2930_p2 = pnand %p2929_p13, %p2923_p0 }
  0x6d   : > { %2933 = shalt.err (!%p2930_p2)
}
  0x6e   : > { %s2934_s28 = scalar_lea.vmem %s3808_s18, 16  ;;  %s3528_s27 = smov [#allocation10]  }
  0x6f   : > { %p2935_p4 = scmp.ne.s32.totalorder %s3808_s18, %s2934_s28  ;;  %s2939_s13 = sshll.u32 %s3528_s27, 4  ;;  %s2940_s13 = int_to_ptr.vmem [resolvable:$false] %s2939_s13 }
  0x70   : > { %s2941_s12 = scalar_lea.vmem %s2940_s13, 32  ;;  %p2942_p1 = scmp.lt.s32.totalorder %s3808_s18, %s2940_s13 }
  0x71   : > { %p2937_p5 = pnand %p2935_p4, %p3815_p9  ;;  %p2943_p11 = scmp.lt.s32.totalorder %s2941_s12, %s2934_s28 }
  0x73   : > { %p2938_p6 = pneg %p2937_p5  ;;  %p2944_p3 = por %p2943_p11, %p2942_p1 }
  0x75   : > { %p2945_p7 = pnand %p2944_p3, %p2938_p6 }
  0x77   : > { %2948 = shalt.err (!%p2945_p7)
}
  0x78   : > { %s4765_s30 = scalar_lea.sflag [#allocation11], %s3744_s0  ;;  %s2609_s10 = smul.u32 192, %s3762_s17 }
  0x79   : > { %2660 = dma.hbm_to_vmem [thread:$0]  (!%p3766_p12), %s3805_s8, 16, %s3808_s18, %s4765_s30  }
  0x7a   : > { %s2610_s14 = smul.u32 3072, %s3513_s29  ;;  %s4766_s5 = sld [smem:[#allocation62_spill]] }
  0x7b   : > { %s585_s13 = scalar_lea.vmem [#allocation13], %s2609_s10  ;;  %s4707_s3 = scalar_lea.sflag [#allocation14], %s3744_s0 }
  0x7c   : > { %s592_s12 = sshll.u32 %s585_s13, 4  ;;  %s3847_s12 = int_to_ptr.vmem [resolvable:$true] %s592_s12 }
  0x80   : > { %s3845_s28 = scalar_lea.hbm %s4766_s5, %s2610_s14  ;;  %s2954_s1 = scalar_lea.hbm %s4766_s5, 6144 }
  0x81   : > { %s2949_s4 = scalar_lea.hbm %s3845_s28, 3072  ;;  %p2955_p13 = scmp.lt.u32.totalorder %s3845_s28, %s4766_s5 }
  0x82   : > { %p2950_p0 = scmp.ne.s32.totalorder %s3845_s28, %s2949_s4  ;;  %p2956_p2 = scmp.lt.u32.totalorder %s2954_s1, %s2949_s4 }
  0x83   : > { %p2958_p5 = scmp.lt.u32.totalorder %s2949_s4, %s3845_s28 }
  0x84   : > { %p2952_p8 = pnand %p2950_p0, %p3815_p9  ;;  %p2957_p4 = por %p2956_p2, %p2955_p13 }
  0x86   : > { %p2953_p10 = pneg %p2952_p8  ;;  %p2959_p6 = por %p2958_p5, %p2957_p4 }
  0x88   : > { %p2960_p1 = pnand %p2959_p6, %p2953_p10 }
  0x8a   : > { %2963 = shalt.err (!%p2960_p1)
}
  0x8b   : > { %s2964_s10 = scalar_lea.vmem %s3847_s12, 3072  ;;  %s3529_s27 = smov [#allocation13]  }
  0x8c   : > { %p2965_p11 = scmp.ne.s32.totalorder %s3847_s12, %s2964_s10  ;;  %s2969_s13 = sshll.u32 %s3529_s27, 4  ;;  %s2970_s13 = int_to_ptr.vmem [resolvable:$false] %s2969_s13 }
  0x8d   : > { %s2971_s8 = scalar_lea.vmem %s2970_s13, 6144  ;;  %p2972_p0 = scmp.lt.s32.totalorder %s3847_s12, %s2970_s13 }
  0x8e   : > { %p2967_p3 = pnand %p2965_p11, %p3815_p9  ;;  %p2973_p8 = scmp.lt.s32.totalorder %s2971_s8, %s2964_s10 }
  0x90   : > { %p2968_p7 = pneg %p2967_p3  ;;  %p2974_p13 = por %p2973_p8, %p2972_p0 }
  0x92   : > { %p2975_p2 = pnand %p2974_p13, %p2968_p7 }
  0x94   : > { %2978 = shalt.err (!%p2975_p2)
}
  0x95   : > { %s4696_s4 = smov 128   ;;  %s4697_s18 = smov 8  }
  0x96   : > { %2666 = dma.hbm_to_vmem [thread:$0]  (!%p3766_p12), %s3845_s28, 3072, %s3847_s12, %s4707_s3, %s4696_s4, %s4696_s4, %s4697_s18  }
  0x97   : > { %s4767_s7 = sld [smem:[#allocation64_spill]]  ;;  %s626_s10 = scalar_lea.vmem [#allocation16], %s3762_s17 }
  0x98   : > { %s633_s27 = sshll.u32 %s626_s10, 4  ;;  %s4700_s13 = scalar_lea.sflag [#allocation17], %s3744_s0  ;;  %s634_s27 = int_to_ptr.vmem [resolvable:$true] %s633_s27 }
  0x9d   : > { %s3880_s14 = scalar_lea.hbm %s4767_s7, %s3799_s15  ;;  %s2984_s12 = scalar_lea.hbm %s4767_s7, 32 }
  0x9e   : > { %s2979_s8 = scalar_lea.hbm %s3880_s14, 16  ;;  %p2985_p6 = scmp.lt.u32.totalorder %s3880_s14, %s4767_s7 }
  0x9f   : > { %p2980_p10 = scmp.ne.s32.totalorder %s3880_s14, %s2979_s8  ;;  %p2986_p1 = scmp.lt.u32.totalorder %s2984_s12, %s2979_s8 }
  0xa0   : > { %p2988_p3 = scmp.lt.u32.totalorder %s2979_s8, %s3880_s14 }
  0xa1   : > { %p2982_p4 = pnand %p2980_p10, %p3815_p9  ;;  %p2987_p11 = por %p2986_p1, %p2985_p6 }
  0xa3   : > { %p2983_p5 = pneg %p2982_p4  ;;  %p2989_p7 = por %p2988_p3, %p2987_p11 }
  0xa5   : > { %p2990_p0 = pnand %p2989_p7, %p2983_p5 }
  0xa7   : > { %2993 = shalt.err (!%p2990_p0)
}
  0xa8   : > { %s2994_s10 = scalar_lea.vmem %s634_s27, 16  ;;  %s3532_s4 = smov [#allocation16]  }
  0xa9   : > { %p2995_p8 = scmp.ne.s32.totalorder %s634_s27, %s2994_s10  ;;  %s2999_s18 = sshll.u32 %s3532_s4, 4  ;;  %s3000_s18 = int_to_ptr.vmem [resolvable:$false] %s2999_s18 }
  0xaa   : > { %s3001_s5 = scalar_lea.vmem %s3000_s18, 32  ;;  %p3002_p10 = scmp.lt.s32.totalorder %s634_s27, %s3000_s18 }
  0xab   : > { %p2997_p13 = pnand %p2995_p8, %p3815_p9  ;;  %p3003_p4 = scmp.lt.s32.totalorder %s3001_s5, %s2994_s10 }
  0xad   : > { %p2998_p2 = pneg %p2997_p13  ;;  %p3004_p12 = por %p3003_p4, %p3002_p10 }
  0xaf   : > { %p3005_p1 = pnand %p3004_p12, %p2998_p2 }
  0xb1   : > { %3008 = shalt.err (!%p3005_p1)
}
  0xb2   : > { %p4768_p6 = scmp.ne.s32.totalorder %s4762_s2, 0  ;;  %s4769_s9 = sld [smem:[#allocation66_spill]] }
  0xb3   : > { %s660_s18 = scalar_lea.vmem [#allocation19], %s3762_s17  ;;  %s2428_s1 = sshll.u32 %s3762_s17, 1 }
  0xb4   : > { %2672 = dma.hbm_to_vmem [thread:$0]  (!%p4768_p6), %s3880_s14, 16, %s634_s27, %s4700_s13  }
  0xb5   : > { %s667_s12 = sshll.u32 %s660_s18, 4  ;;  %s4701_s30 = scalar_lea.sflag [#allocation20], %s3744_s0  ;;  %s3910_s12 = int_to_ptr.vmem [resolvable:$true] %s667_s12 }
  0xb8   : > { %s3907_s28 = scalar_lea.hbm %s4769_s9, %s3799_s15  ;;  %s3014_s5 = scalar_lea.hbm %s4769_s9, 32 }
  0xb9   : > { %s3009_s10 = scalar_lea.hbm %s3907_s28, 16  ;;  %p3015_p3 = scmp.lt.u32.totalorder %s3907_s28, %s4769_s9 }
  0xba   : > { %p3010_p12 = scmp.ne.s32.totalorder %s3907_s28, %s3009_s10  ;;  %p3016_p7 = scmp.lt.u32.totalorder %s3014_s5, %s3009_s10 }
  0xbb   : > { %p3018_p8 = scmp.lt.u32.totalorder %s3009_s10, %s3907_s28 }
  0xbc   : > { %p3012_p5 = pnand %p3010_p12, %p3815_p9  ;;  %p3017_p0 = por %p3016_p7, %p3015_p3 }
  0xbe   : > { %p3013_p11 = pneg %p3012_p5  ;;  %p3019_p13 = por %p3018_p8, %p3017_p0 }
  0xc0   : > { %p3020_p2 = pnand %p3019_p13, %p3013_p11 }
  0xc2   : > { %3023 = shalt.err (!%p3020_p2)
}
  0xc3   : > { %s3024_s18 = scalar_lea.vmem %s3910_s12, 16  ;;  %s3533_s14 = smov [#allocation19]  }
  0xc4   : > { %p3025_p10 = scmp.ne.s32.totalorder %s3910_s12, %s3024_s18  ;;  %s3029_s27 = sshll.u32 %s3533_s14, 4  ;;  %s3030_s27 = int_to_ptr.vmem [resolvable:$false] %s3029_s27 }
  0xc5   : > { %s3031_s8 = scalar_lea.vmem %s3030_s27, 32  ;;  %p3032_p12 = scmp.lt.s32.totalorder %s3910_s12, %s3030_s27 }
  0xc6   : > { %p3027_p4 = pnand %p3025_p10, %p3815_p9  ;;  %p3033_p5 = scmp.lt.s32.totalorder %s3031_s8, %s3024_s18 }
  0xc8   : > { %p3028_p1 = pneg %p3027_p4  ;;  %p3034_p3 = por %p3033_p5, %p3032_p12 }
  0xca   : > { %p3035_p7 = pnand %p3034_p3, %p3028_p1 }
  0xcc   : > { %3038 = shalt.err (!%p3035_p7)
}
  0xcd   : > { %2678 = dma.hbm_to_vmem [thread:$0]  (!%p4768_p6), %s3907_s28, 16, %s3910_s12, %s4701_s30  }
  0xce   : > { %s2516_s10 = sshll.u32 %s3513_s29, 5  ;;  %s4770_s11 = sld [smem:[#allocation68_spill]] }
  0xcf   : > { %s699_s18 = scalar_lea.vmem [#allocation22], %s2428_s1  ;;  %s4706_s8 = scalar_lea.sflag [#allocation23], %s3744_s0 }
  0xd0   : > { %s707_s27 = sshll.u32 %s699_s18, 4  ;;  %s708_s27 = int_to_ptr.vmem [resolvable:$true] %s707_s27 }
  0xd4   : > { %s3941_s14 = scalar_lea.hbm %s4770_s11, %s2516_s10  ;;  %s3044_s5 = scalar_lea.hbm %s4770_s11, 64 }
  0xd5   : > { %s3039_s13 = scalar_lea.hbm %s3941_s14, 32  ;;  %p3045_p13 = scmp.lt.u32.totalorder %s3941_s14, %s4770_s11 }
  0xd6   : > { %p3040_p11 = scmp.ne.s32.totalorder %s3941_s14, %s3039_s13  ;;  %p3046_p2 = scmp.lt.u32.totalorder %s3044_s5, %s3039_s13 }
  0xd7   : > { %p3048_p4 = scmp.lt.u32.totalorder %s3039_s13, %s3941_s14 }
  0xd8   : > { %p3042_p0 = pnand %p3040_p11, %p3815_p9  ;;  %p3047_p10 = por %p3046_p2, %p3045_p13 }
  0xda   : > { %p3043_p8 = pneg %p3042_p0  ;;  %p3049_p1 = por %p3048_p4, %p3047_p10 }
  0xdc   : > { %p3050_p12 = pnand %p3049_p1, %p3043_p8 }
  0xde   : > { %3053 = shalt.err (!%p3050_p12)
}
  0xdf   : > { %s3054_s1 = scalar_lea.vmem %s708_s27, 32  ;;  %s3534_s18 = smov [#allocation22]  }
  0xe0   : > { %p3055_p5 = scmp.ne.s32.totalorder %s708_s27, %s3054_s1  ;;  %s3059_s30 = sshll.u32 %s3534_s18, 4  ;;  %s3060_s30 = int_to_ptr.vmem [resolvable:$false] %s3059_s30 }
  0xe1   : > { %s3061_s28 = scalar_lea.vmem %s3060_s30, 64  ;;  %p3062_p11 = scmp.lt.s32.totalorder %s708_s27, %s3060_s30 }
  0xe2   : > { %p3057_p3 = pnand %p3055_p5, %p3815_p9  ;;  %p3063_p0 = scmp.lt.s32.totalorder %s3061_s28, %s3054_s1 }
  0xe4   : > { %p3058_p7 = pneg %p3057_p3  ;;  %p3064_p6 = por %p3063_p0, %p3062_p11 }
  0xe6   : > { %p3065_p2 = pnand %p3064_p6, %p3058_p7 }
  0xe8   : > { %3068 = shalt.err (!%p3065_p2)
}
  0xe9   : > { %p4771_p13 = scmp.ne.s32.totalorder %s4762_s2, 0  ;;  %s4772_s13 = sld [smem:[#allocation42_spill]] }
  0xea   : > { %s4773_s30 = sld [smem:[#allocation41_spill]]  ;;  %s3966_s12 = sadd.s32 4294967295, %s3521_s16  }
  0xeb   : > { %2684 = dma.hbm_to_vmem [thread:$0]  (!%p4771_p13), %s3941_s14, 32, %s708_s27, %s4706_s8  }
  0xec   : > { %s2409_s5 = sadd.s32 4294967294, %s3521_s16   ;;  %p107_p6 = scmp.ne.s32.totalorder %s3497_s25, %s3493_s24 }
  0xed   : > { %p4703_p8 = scmp.eq.s32.totalorder %s3966_s12, 0  ;;  %p133_p10 = scmp.ne.s32.totalorder %s3485_s22, %s3481_s21 }
  0xee   : > { %p443_p4 = scmp.eq.s32.totalorder %s3966_s12, 3  ;;  %p449_p1 = scmp.eq.s32.totalorder %s2409_s5, 3 }
  0xef   : > { %p3977_p12 = por %p4703_p8, %p107_p6  ;;  %p3983_p5 = por %p133_p10, %p4703_p8 }
  0xf0   : > { %p4776_p3 = scmp.ne.s32.totalorder %s3501_s26, %s3497_s25  ;;  %p3994_p11 = por %p449_p1, %p107_p6 }
  0xf1   : > { %s4774_s10 = scalar_select %p3977_p12, 1, 0 }
  0xf2   : > { %s4775_s14 = scalar_select %p3983_p5, 1, 0 }
  0xf3   : > { %p3990_p7 = por %p443_p4, %p4776_p3  ;;  %s460_s4 = sadd.s32 1, %s3477_s20 }
  0xf4   : > { %s4778_s21 = scalar_select %p3994_p11, 1, 0 }
  0xf5   : > { %s4777_s27 = scalar_select %p3990_p7, 1, 0 }
  0xf6   : > { %4779 = sst [smem:[#allocation54_spill]] %s4778_s21  ;;  %p470_p0 = scmp.ne.s32.totalorder %s3477_s20, %s4772_s13 }
  0xf7   : > { %p4780_p2 = scmp.ne.s32.totalorder %s4758_s6, 0  ;;  %p476_p8 = scmp.ne.s32.totalorder %s4772_s13, %s4773_s30 }
  0xf8   : > { %p4006_p10 = por %p470_p0, %p443_p4  ;;  %p2410_p3 = scmp.ge.s32.totalorder %s3521_s16, 1 }
  0xf9   : > { %s4004_s1 = scalar_select %p4780_p2, %s3477_s20, %s460_s4  }
  0xfa   : > { %s4782_s18 = scalar_select %p4006_p10, 1, 0 }
  0xfb   : > { %4781 = sst [smem:[#allocation55_spill]] %s4004_s1  ;;  %p484_p5 = scmp.lt.s32.totalorder %s3521_s16, 5 }
  0xfc   : > { %p4014_p7 = por %p476_p8, %p449_p1  ;;  %s3535_s6 = smov [#allocation4]  }
  0xfd   : > { %p4018_p6 = pnand %p2410_p3, %p484_p5  ;;  %s497_s4 = sshll.u32 %s3535_s6, 4  ;;  %s4024_s4 = int_to_ptr.vmem [resolvable:$true] %s497_s4 }
  0xfe   : > { %s4783_s28 = scalar_select %p4014_p7, 1, 0 }
  0xff   : > { %s4785_s5 = scalar_select %p4018_p6, 1, 0 }
 0x100   : > { %4784 = sst [smem:[#allocation56_spill]] %s4783_s28  ;;  %p2647_p4 = pneg %p4018_p6 }
 0x101   : > { %s4786_s30 = sld [smem:[#allocation59_spill]]  ;;  %s529_s9 = scalar_lea.vmem [#allocation9], %s3762_s17 }
 0x102   : > { %s536_s11 = sshll.u32 %s529_s9, 4  ;;  %p4788_p8 = scmp.eq.s32.totalorder %s3966_s12, 0  ;;  %s537_s11 = int_to_ptr.vmem [resolvable:$true] %s536_s11 }
 0x104   : > { %p4035_p1 = pnand %p2647_p4, %p4788_p8 }
 0x106   : > { %s4789_s26 = scalar_select %p4035_p1, 1, 0 }
 0x107   : > { %s4787_s3 = smov %s4786_s30  ;;  %s4030_s7 = scalar_lea.hbm %s4786_s30, %s3799_s15 }
 0x108   : > { %s3069_s6 = scalar_lea.hbm %s4030_s7, 16  ;;  %s3074_s30 = scalar_lea.hbm %s4787_s3, 32 }
 0x109   : > { %p3070_p5 = scmp.ne.s32.totalorder %s4030_s7, %s3069_s6  ;;  %p3075_p3 = scmp.lt.u32.totalorder %s4030_s7, %s4787_s3 }
 0x10a   : > { %p3076_p7 = scmp.lt.u32.totalorder %s3074_s30, %s3069_s6  ;;  %p3078_p4 = scmp.lt.u32.totalorder %s3069_s6, %s4030_s7 }
 0x10b   : > { %p3072_p0 = pnand %p3070_p5, %p3815_p9 }
 0x10c   : > { %p3077_p11 = por %p3076_p7, %p3075_p3 }
 0x10d   : > { %p3073_p2 = pneg %p3072_p0 }
 0x10e   : > { %p3079_p8 = por %p3078_p4, %p3077_p11 }
 0x110   : > { %p3080_p10 = pnand %p3079_p8, %p3073_p2 }
 0x112   : > { %3083 = shalt.err (!%p3080_p10)
}
 0x113   : > { %s3084_s9 = scalar_lea.vmem %s537_s11, 16  ;;  %s3536_s20 = smov [#allocation9]  }
 0x114   : > { %p3085_p12 = scmp.ne.s32.totalorder %s537_s11, %s3084_s9  ;;  %s3089_s28 = sshll.u32 %s3536_s20, 4  ;;  %s3090_s28 = int_to_ptr.vmem [resolvable:$false] %s3089_s28 }
 0x115   : > { %s3091_s8 = scalar_lea.vmem %s3090_s28, 32  ;;  %p3092_p6 = scmp.lt.s32.totalorder %s537_s11, %s3090_s28 }
 0x116   : > { %p3087_p5 = pnand %p3085_p12, %p3815_p9  ;;  %p3093_p1 = scmp.lt.s32.totalorder %s3091_s8, %s3084_s9 }
 0x118   : > { %p3088_p0 = pneg %p3087_p5  ;;  %p3094_p13 = por %p3093_p1, %p3092_p6 }
 0x11a   : > { %p3095_p3 = pnand %p3094_p13, %p3088_p0 }
 0x11c   : > { %3098 = shalt.err (!%p3095_p3)
}
 0x11d   : > { %p4790_p7 = scmp.ne.s32.totalorder %s4762_s2, 0  ;;  %s4791_s23 = scalar_lea.sflag [#allocation8], %s3744_s0 }
 0x11e   : > { %s2607_s1 = smul.u32 96, %s3762_s17  ;;  %s4792_s30 = sld [smem:[#allocation57_spill]] }
 0x11f   : > { %2657 = dma.hbm_to_vmem [thread:$0]  (!%p4790_p7), %s4030_s7, 16, %s537_s11, %s4791_s23  }
 0x120   : > { %p4794_p11 = scmp.ne.s32.totalorder %s4789_s26, 0 }
 0x122   : > { %p3101_p13 = pneg %p4794_p11 }
 0x124   : > { %s4793_s3 = smov %s4792_s30  ;;  %s3099_s20 = scalar_lea.hbm %s4792_s30, 16 }
 0x125   : > { %p3100_p12 = scmp.ne.s32.totalorder %s4793_s3, %s3099_s20  ;;  %p3106_p1 = scmp.lt.u32.totalorder %s3099_s20, %s4793_s3 }
 0x127   : > { %p3102_p10 = pnand %p3101_p13, %p3100_p12 }
 0x129   : > { %p3103_p6 = pneg %p3102_p10 }
 0x12b   : > { %p3108_p2 = pnand %p3106_p1, %p3103_p6 }
 0x12d   : > { %3111 = shalt.err (!%p3108_p2)
}
 0x12e   : > { %s3112_s7 = scalar_lea.vmem %s4024_s4, 16  ;;  %s3119_s11 = scalar_lea.vmem %s4024_s4, 32 }
 0x12f   : > { %p3113_p4 = scmp.ne.s32.totalorder %s4024_s4, %s3112_s7  ;;  %p3120_p0 = scmp.lt.s32.totalorder %s4024_s4, %s4024_s4 }
 0x130   : > { %p3121_p3 = scmp.lt.s32.totalorder %s3119_s11, %s3112_s7 }
 0x131   : > { %p3115_p8 = pnand %p3113_p4, %p3101_p13 }
 0x132   : > { %p3122_p12 = por %p3121_p3, %p3120_p0 }
 0x133   : > { %p3116_p5 = pneg %p3115_p8 }
 0x135   : > { %p3123_p10 = pnand %p3122_p12, %p3116_p5 }
 0x137   : > { %3126 = shalt.err (!%p3123_p10)
}
 0x138   : > { %2650 = dma.hbm_to_vmem [thread:$0]  (!%p4794_p11), %s4793_s3, 16, %s4024_s4, [#allocation5]  }
 0x139   : > { %s2608_s8 = smul.u32 1536, %s3513_s29  ;;  %s564_s23 = scalar_lea.vmem [#allocation12], %s2607_s1 }
 0x13a   : > { %s571_s6 = sshll.u32 %s564_s23, 4  ;;  %s4795_s20 = sld [smem:[#allocation61_spill]]  ;;  %s4087_s6 = int_to_ptr.vmem [resolvable:$true] %s571_s6 }
 0x13b   : > { %s2419_s26 = sshll.u32 %s3762_s17, 5 }
 0x140   : > { %s4796_s9 = smov %s4795_s20  ;;  %s4085_s28 = scalar_lea.hbm %s4795_s20, %s2608_s8 }
 0x141   : > { %s3127_s7 = scalar_lea.hbm %s4085_s28, 1536  ;;  %s3132_s11 = scalar_lea.hbm %s4796_s9, 3072 }
 0x142   : > { %p3128_p13 = scmp.ne.s32.totalorder %s4085_s28, %s3127_s7  ;;  %p3133_p1 = scmp.lt.u32.totalorder %s4085_s28, %s4796_s9 }
 0x143   : > { %p3134_p2 = scmp.lt.u32.totalorder %s3132_s11, %s3127_s7  ;;  %p3136_p8 = scmp.lt.u32.totalorder %s3127_s7, %s4085_s28 }
 0x144   : > { %p3130_p6 = pnand %p3128_p13, %p3815_p9 }
 0x145   : > { %p3135_p4 = por %p3134_p2, %p3133_p1 }
 0x146   : > { %p3131_p11 = pneg %p3130_p6 }
 0x147   : > { %p3137_p5 = por %p3136_p8, %p3135_p4 }
 0x149   : > { %p3138_p0 = pnand %p3137_p5, %p3131_p11 }
 0x14b   : > { %3141 = shalt.err (!%p3138_p0)
}
 0x14c   : > { %s3142_s8 = scalar_lea.vmem %s4087_s6, 1536  ;;  %s3537_s23 = smov [#allocation12]  }
 0x14d   : > { %p3143_p3 = scmp.ne.s32.totalorder %s4087_s6, %s3142_s8  ;;  %s3147_s13 = sshll.u32 %s3537_s23, 4  ;;  %s3148_s13 = int_to_ptr.vmem [resolvable:$false] %s3147_s13 }
 0x14e   : > { %s3149_s30 = scalar_lea.vmem %s3148_s13, 3072  ;;  %p3150_p13 = scmp.lt.s32.totalorder %s4087_s6, %s3148_s13 }
 0x14f   : > { %p3145_p12 = pnand %p3143_p3, %p3815_p9  ;;  %p3151_p6 = scmp.lt.s32.totalorder %s3149_s30, %s3142_s8 }
 0x151   : > { %p3146_p10 = pneg %p3145_p12  ;;  %p3152_p1 = por %p3151_p6, %p3150_p13 }
 0x153   : > { %p3153_p2 = pnand %p3152_p1, %p3146_p10 }
 0x155   : > { %3156 = shalt.err (!%p3153_p2)
}
 0x156   : > { %s4720_s20 = smov 64   ;;  %s4722_s7 = smov 4  }
 0x157   : > { %s4797_s4 = scalar_lea.sflag [#allocation11], %s3744_s0  ;;  %s2514_s1 = sshll.u32 %s3513_s29, 9 }
 0x158   : > { %2663 = dma.hbm_to_vmem [thread:$0]  (!%p4790_p7), %s4085_s28, 1536, %s4087_s6, %s4797_s4, %s4720_s20, %s4720_s20, %s4722_s7  }
 0x159   : > { %s4798_s21 = sld [smem:[#allocation63_spill]]  ;;  %s606_s13 = scalar_lea.vmem [#allocation15], %s2419_s26 }
 0x15a   : > { %s613_s30 = sshll.u32 %s606_s13, 4  ;;  %s4124_s30 = int_to_ptr.vmem [resolvable:$true] %s613_s30 }
 0x15f   : > { %s4799_s8 = smov %s4798_s21  ;;  %s4120_s23 = scalar_lea.hbm %s4798_s21, %s2514_s1 }
 0x160   : > { %s3157_s3 = scalar_lea.hbm %s4120_s23, 512  ;;  %s3162_s4 = scalar_lea.hbm %s4799_s8, 1024 }
 0x161   : > { %p3158_p11 = scmp.ne.s32.totalorder %s4120_s23, %s3157_s3  ;;  %p3163_p5 = scmp.lt.u32.totalorder %s4120_s23, %s4799_s8 }
 0x162   : > { %p3164_p0 = scmp.lt.u32.totalorder %s3162_s4, %s3157_s3  ;;  %p3166_p12 = scmp.lt.u32.totalorder %s3157_s3, %s4120_s23 }
 0x163   : > { %p3160_p4 = pnand %p3158_p11, %p3815_p9 }
 0x164   : > { %p3165_p3 = por %p3164_p0, %p3163_p5 }
 0x165   : > { %p3161_p8 = pneg %p3160_p4 }
 0x166   : > { %p3167_p10 = por %p3166_p12, %p3165_p3 }
 0x168   : > { %p3168_p13 = pnand %p3167_p10, %p3161_p8 }
 0x16a   : > { %3171 = shalt.err (!%p3168_p13)
}
 0x16b   : > { %s3172_s26 = scalar_lea.vmem %s4124_s30, 512  ;;  %s3540_s24 = smov [#allocation15]  }
 0x16c   : > { %p3173_p6 = scmp.ne.s32.totalorder %s4124_s30, %s3172_s26  ;;  %s3177_s21 = sshll.u32 %s3540_s24, 4  ;;  %s3178_s21 = int_to_ptr.vmem [resolvable:$false] %s3177_s21 }
 0x16d   : > { %s3179_s13 = scalar_lea.vmem %s3178_s21, 1024  ;;  %p3180_p11 = scmp.lt.s32.totalorder %s4124_s30, %s3178_s21 }
 0x16e   : > { %p3175_p1 = pnand %p3173_p6, %p3815_p9  ;;  %p3181_p4 = scmp.lt.s32.totalorder %s3179_s13, %s3172_s26 }
 0x170   : > { %p3176_p2 = pneg %p3175_p1  ;;  %p3182_p5 = por %p3181_p4, %p3180_p11 }
 0x172   : > { %p3183_p0 = pnand %p3182_p5, %p3176_p2 }
 0x174   : > { %3186 = shalt.err (!%p3183_p0)
}
 0x175   : > { %s4800_s3 = scalar_lea.sflag [#allocation14], %s3744_s0  ;;  %s4801_s4 = sld [smem:[#allocation65_spill]] }
 0x176   : > { %2669 = dma.hbm_to_vmem [thread:$0]  (!%p4790_p7), %s4120_s23, 512, %s4124_s30, %s4800_s3, %s4720_s20, %s4720_s20, %s4722_s7  }
 0x177   : > { %s643_s11 = scalar_lea.vmem [#allocation18], %s3762_s17  ;;  %s2425_s24 = sshll.u32 %s3762_s17, 6 }
 0x178   : > { %s650_s26 = sshll.u32 %s643_s11, 4  ;;  %s651_s26 = int_to_ptr.vmem [resolvable:$true] %s650_s26 }
 0x17b   : > { %s4156_s1 = scalar_lea.hbm %s4801_s4, %s3799_s15  ;;  %s3192_s30 = scalar_lea.hbm %s4801_s4, 32 }
 0x17c   : > { %s3187_s21 = scalar_lea.hbm %s4156_s1, 16  ;;  %p3193_p10 = scmp.lt.u32.totalorder %s4156_s1, %s4801_s4 }
 0x17d   : > { %p3188_p8 = scmp.ne.s32.totalorder %s4156_s1, %s3187_s21  ;;  %p3194_p13 = scmp.lt.u32.totalorder %s3192_s30, %s3187_s21 }
 0x17e   : > { %p3196_p1 = scmp.lt.u32.totalorder %s3187_s21, %s4156_s1 }
 0x17f   : > { %p3190_p3 = pnand %p3188_p8, %p3815_p9  ;;  %p3195_p6 = por %p3194_p13, %p3193_p10 }
 0x181   : > { %p3191_p12 = pneg %p3190_p3  ;;  %p3197_p2 = por %p3196_p1, %p3195_p6 }
 0x183   : > { %p3198_p11 = pnand %p3197_p2, %p3191_p12 }
 0x185   : > { %3201 = shalt.err (!%p3198_p11)
}
 0x186   : > { %s3202_s28 = scalar_lea.vmem %s651_s26, 16  ;;  %s3541_s11 = smov [#allocation18]  }
 0x187   : > { %p3203_p4 = scmp.ne.s32.totalorder %s651_s26, %s3202_s28  ;;  %s3207_s20 = sshll.u32 %s3541_s11, 4  ;;  %s3208_s20 = int_to_ptr.vmem [resolvable:$false] %s3207_s20 }
 0x188   : > { %s3209_s13 = scalar_lea.vmem %s3208_s20, 32  ;;  %p3210_p8 = scmp.lt.s32.totalorder %s651_s26, %s3208_s20 }
 0x189   : > { %p3205_p5 = pnand %p3203_p4, %p3815_p9  ;;  %p3211_p3 = scmp.lt.s32.totalorder %s3209_s13, %s3202_s28 }
 0x18b   : > { %p3206_p0 = pneg %p3205_p5  ;;  %p3212_p7 = por %p3211_p3, %p3210_p8 }
 0x18d   : > { %p3213_p10 = pnand %p3212_p7, %p3206_p0 }
 0x18f   : > { %3216 = shalt.err (!%p3213_p10)
}
 0x190   : > { %p4802_p13 = scmp.ne.s32.totalorder %s4762_s2, 0  ;;  %s4803_s21 = scalar_lea.sflag [#allocation17], %s3744_s0 }
 0x191   : > { %s2515_s23 = sshll.u32 %s3513_s29, 10  ;;  %s4804_s6 = sld [smem:[#allocation67_spill]] }
 0x192   : > { %2675 = dma.hbm_to_vmem [thread:$0]  (!%p4802_p13), %s4156_s1, 16, %s651_s26, %s4803_s21  }
 0x193   : > { %s678_s20 = scalar_lea.vmem [#allocation21], %s2425_s24  ;;  %s2431_s13 = sshll.u32 %s3762_s17, 7 }
 0x194   : > { %s685_s28 = sshll.u32 %s678_s20, 4  ;;  %s4187_s28 = int_to_ptr.vmem [resolvable:$true] %s685_s28 }
 0x197   : > { %s4183_s11 = scalar_lea.hbm %s4804_s6, %s2515_s23  ;;  %s3222_s21 = scalar_lea.hbm %s4804_s6, 2048 }
 0x198   : > { %s3217_s7 = scalar_lea.hbm %s4183_s11, 1024  ;;  %p3223_p1 = scmp.lt.u32.totalorder %s4183_s11, %s4804_s6 }
 0x199   : > { %p3218_p7 = scmp.ne.s32.totalorder %s4183_s11, %s3217_s7  ;;  %p3224_p2 = scmp.lt.u32.totalorder %s3222_s21, %s3217_s7 }
 0x19a   : > { %p3226_p4 = scmp.lt.u32.totalorder %s3217_s7, %s4183_s11 }
 0x19b   : > { %p3220_p12 = pnand %p3218_p7, %p3815_p9  ;;  %p3225_p11 = por %p3224_p2, %p3223_p1 }
 0x19d   : > { %p3221_p6 = pneg %p3220_p12  ;;  %p3227_p5 = por %p3226_p4, %p3225_p11 }
 0x19f   : > { %p3228_p0 = pnand %p3227_p5, %p3221_p6 }
 0x1a1   : > { %3231 = shalt.err (!%p3228_p0)
}
 0x1a2   : > { %s3232_s24 = scalar_lea.vmem %s4187_s28, 1024  ;;  %s3542_s3 = smov [#allocation21]  }
 0x1a3   : > { %p3233_p8 = scmp.ne.s32.totalorder %s4187_s28, %s3232_s24  ;;  %s3237_s20 = sshll.u32 %s3542_s3, 4  ;;  %s3238_s20 = int_to_ptr.vmem [resolvable:$false] %s3237_s20 }
 0x1a4   : > { %s3239_s1 = scalar_lea.vmem %s3238_s20, 2048  ;;  %p3240_p7 = scmp.lt.s32.totalorder %s4187_s28, %s3238_s20 }
 0x1a5   : > { %p3235_p3 = pnand %p3233_p8, %p3815_p9  ;;  %p3241_p12 = scmp.lt.s32.totalorder %s3239_s1, %s3232_s24 }
 0x1a7   : > { %p3236_p10 = pneg %p3235_p3  ;;  %p3242_p1 = por %p3241_p12, %p3240_p7 }
 0x1a9   : > { %p3243_p2 = pnand %p3242_p1, %p3236_p10 }
 0x1ab   : > { %3246 = shalt.err (!%p3243_p2)
}
 0x1ac   : > { %s4805_s7 = smov 8   ;;  %s4806_s26 = smov 128  }
 0x1ad   : > { %s4807_s21 = scalar_lea.sflag [#allocation20], %s3744_s0  ;;  %s2517_s23 = sshll.u32 %s3513_s29, 11 }
 0x1ae   : > { %2681 = dma.hbm_to_vmem [thread:$0]  (!%p4802_p13), %s4183_s11, 1024, %s4187_s28, %s4807_s21, %s4806_s26, %s4806_s26, %s4805_s7  }
 0x1af   : > { %s4808_s24 = sld [smem:[#allocation69_spill]]  ;;  %s718_s4 = scalar_lea.vmem [#allocation24], %s2431_s13 }
 0x1b0   : > { %s725_s6 = sshll.u32 %s718_s4, 4  ;;  %s4224_s6 = int_to_ptr.vmem [resolvable:$true] %s725_s6 }
 0x1b5   : > { %s4809_s1 = smov %s4808_s24  ;;  %s4220_s20 = scalar_lea.hbm %s4808_s24, %s2517_s23 }
 0x1b6   : > { %s3247_s8 = scalar_lea.hbm %s4220_s20, 2048  ;;  %s3252_s7 = scalar_lea.hbm %s4809_s1, 4096 }
 0x1b7   : > { %p3248_p6 = scmp.ne.s32.totalorder %s4220_s20, %s3247_s8  ;;  %p3253_p5 = scmp.lt.u32.totalorder %s4220_s20, %s4809_s1 }
 0x1b8   : > { %p3254_p0 = scmp.lt.u32.totalorder %s3252_s7, %s3247_s8  ;;  %p3256_p3 = scmp.lt.u32.totalorder %s3247_s8, %s4220_s20 }
 0x1b9   : > { %p3250_p11 = pnand %p3248_p6, %p3815_p9 }
 0x1ba   : > { %p3255_p8 = por %p3254_p0, %p3253_p5 }
 0x1bb   : > { %p3251_p4 = pneg %p3250_p11 }
 0x1bc   : > { %p3257_p10 = por %p3256_p3, %p3255_p8 }
 0x1be   : > { %p3258_p7 = pnand %p3257_p10, %p3251_p4 }
 0x1c0   : > { %3261 = shalt.err (!%p3258_p7)
}
 0x1c1   : > { %s3262_s4 = scalar_lea.vmem %s4224_s6, 2048  ;;  %s3543_s13 = smov [#allocation24]  }
 0x1c2   : > { %p3263_p12 = scmp.ne.s32.totalorder %s4224_s6, %s3262_s4  ;;  %s3267_s23 = sshll.u32 %s3543_s13, 4  ;;  %s3268_s23 = int_to_ptr.vmem [resolvable:$false] %s3267_s23 }
 0x1c3   : > { %s3269_s30 = scalar_lea.vmem %s3268_s23, 4096  ;;  %p3270_p6 = scmp.lt.s32.totalorder %s4224_s6, %s3268_s23 }
 0x1c4   : > { %p3265_p1 = pnand %p3263_p12, %p3815_p9  ;;  %p3271_p11 = scmp.lt.s32.totalorder %s3269_s30, %s3262_s4 }
 0x1c6   : > { %p3266_p2 = pneg %p3265_p1  ;;  %p3272_p5 = por %p3271_p11, %p3270_p6 }
 0x1c8   : > { %p3273_p0 = pnand %p3272_p5, %p3266_p2 }
 0x1ca   : > { %3276 = shalt.err (!%p3273_p0)
}
 0x1cb   : > { %s4810_s8 = smov 4   ;;  %s4811_s3 = smov 64  }
 0x1cc   : > { %s4812_s24 = scalar_lea.sflag [#allocation23], %s3744_s0  ;;  %s4813_s7 = sld [smem:[#allocation70_spill]] }
 0x1cd   : > { %2687 = dma.hbm_to_vmem [thread:$0]  (!%p4802_p13), %s4220_s20, 2048, %s4224_s6, %s4812_s24, %s4811_s3, %s4811_s3, %s4810_s8  }
 0x1ce   : > { %s738_s21 = scalar_lea.vmem [#allocation25], %s3762_s17  ;;  %s736_s0 = scalar_lea.sflag [#allocation26], %s3762_s17 }
 0x1cf   : > { %s745_s4 = sshll.u32 %s738_s21, 4  ;;  %s746_s4 = int_to_ptr.vmem [resolvable:$true] %s745_s4 }
 0x1d2   : > { %s4256_s26 = scalar_lea.hbm %s4813_s7, %s3799_s15  ;;  %s3282_s20 = scalar_lea.hbm %s4813_s7, 32 }
 0x1d3   : > { %s3277_s13 = scalar_lea.hbm %s4256_s26, 16  ;;  %p3283_p10 = scmp.lt.u32.totalorder %s4256_s26, %s4813_s7 }
 0x1d4   : > { %p3278_p4 = scmp.ne.s32.totalorder %s4256_s26, %s3277_s13  ;;  %p3284_p7 = scmp.lt.u32.totalorder %s3282_s20, %s3277_s13 }
 0x1d5   : > { %p3286_p1 = scmp.lt.u32.totalorder %s3277_s13, %s4256_s26 }
 0x1d6   : > { %p3280_p8 = pnand %p3278_p4, %p3815_p9  ;;  %p3285_p12 = por %p3284_p7, %p3283_p10 }
 0x1d8   : > { %p3281_p3 = pneg %p3280_p8  ;;  %p3287_p2 = por %p3286_p1, %p3285_p12 }
 0x1da   : > { %p3288_p6 = pnand %p3287_p2, %p3281_p3 }
 0x1dc   : > { %3291 = shalt.err (!%p3288_p6)
}
 0x1dd   : > { %s3292_s17 = scalar_lea.vmem %s746_s4, 16  ;;  %s3544_s8 = smov [#allocation25]  }
 0x1de   : > { %p3293_p11 = scmp.ne.s32.totalorder %s746_s4, %s3292_s17  ;;  %s3297_s3 = sshll.u32 %s3544_s8, 4  ;;  %s3298_s3 = int_to_ptr.vmem [resolvable:$false] %s3297_s3 }
 0x1df   : > { %s3299_s24 = scalar_lea.vmem %s3298_s3, 32  ;;  %p3300_p4 = scmp.lt.s32.totalorder %s746_s4, %s3298_s3 }
 0x1e0   : > { %p3295_p5 = pnand %p3293_p11, %p3815_p9  ;;  %p3301_p8 = scmp.lt.s32.totalorder %s3299_s24, %s3292_s17 }
 0x1e2   : > { %p3296_p0 = pneg %p3295_p5  ;;  %p3302_p13 = por %p3301_p8, %p3300_p4 }
 0x1e4   : > { %p3303_p7 = pnand %p3302_p13, %p3296_p0 }
 0x1e6   : > { %3306 = shalt.err (!%p3303_p7)
}
 0x1e7   : > { %p4814_p10 = scmp.ne.s32.totalorder %s4762_s2, 0  ;;  %p4815_p3 = scmp.ne.s32.totalorder %s4785_s5, 0 }
 0x1e8   : > { %p4816_p12 = scmp.eq.s32.totalorder (!%p4815_p3), %s3966_s12, 0 }
 0x1e9   : > { %2690 = dma.hbm_to_vmem [thread:$0]  (!%p4814_p10), %s4256_s26, 16, %s746_s4, %s736_s0  }
 0x1ea   : > { %754 = sbr.rel (%p4815_p3) target bundleno = 3107 (0xc23), region = 76 }
 0x1f1   : > { %3424 = dma.done.wait (%p4816_p12), [#allocation5], 16   ;;  %p4817_p9 = pmov %p4816_p12 }
 0x1f2   : > { %s4284_s19 = sand.u32 1, %s3966_s12   ;;  %s4287_s11 = sand.u32 1, %s3497_s25  }
 0x1f3   : > { %3426 = vsyncadd (%p4817_p9), [#allocation5], 4294967280  ;;  %s2437_s2 = sshll.u32 %s4287_s11, 1  ;;  %s761_s28 = scalar_lea.sflag [#allocation8], %s4284_s19 }
 0x1f4   : > { %s4291_s26 = scalar_lea.vmem [#allocation7], %s2437_s2  ;;  %p4818_p13 = scmp.ne.s32.totalorder %s4774_s10, 0 }
 0x1f6   : > { %3428 = dma.done.wait (%p4818_p13), %s761_s28, 32  }
 0x1f7   : > { %3430 = vsyncadd (%p4818_p13), %s761_s28, 4294967264  ;;  %s4298_s5 = sand.u32 1, %s3485_s22   ;;  %p4819_p1 = scmp.ne.s32.totalorder %s4775_s14, 0 }
 0x1f8   : > { %s772_s12 = scalar_lea.vmem [#allocation9], %s4298_s5 }
 0x1f9   : > { %3432 = dma.done.wait (%p4819_p1), %s761_s28, 16  }
 0x1fa   : > { %3434 = vsyncadd (%p4819_p1), %s761_s28, 4294967280  ;;  %s778_s21 = scalar_lea.sflag [#allocation11], %s4284_s19  ;;  %s780_s4 = scalar_lea.vmem [#allocation10], %s4298_s5 }
 0x1fb   : > { %3436 = dma.done.wait (%p4819_p1), %s778_s21, 1552  }
 0x1fc   : > { %3438 = vsyncadd (%p4819_p1), %s778_s21, 4294965744  ;;  %s2611_s10 = smul.u32 96, %s4298_s5  ;;  %s795_s23 = scalar_lea.sflag [#allocation14], %s4284_s19 }
 0x1fd   : > { %s2612_s0 = smul.u32 192, %s4298_s5 }
 0x1fe   : > { %s4313_s13 = scalar_lea.vmem [#allocation12], %s2611_s10 }
 0x1ff   : > { %s4316_s6 = scalar_lea.vmem [#allocation13], %s2612_s0 }
 0x200   : > { %3440 = dma.done.wait (%p4819_p1), %s795_s23, 3584  }
 0x201   : > { %3442 = vsyncadd (%p4819_p1), %s795_s23, 4294963712  ;;  %s2438_s20 = sshll.u32 %s4298_s5, 5  ;;  %s813_s15 = scalar_lea.sflag [#allocation17], %s4284_s19 }
 0x202   : > { %s4323_s30 = scalar_lea.vmem [#allocation15], %s2438_s20  ;;  %s815_s17 = scalar_lea.vmem [#allocation16], %s4298_s5 }
 0x203   : > { %3444 = dma.done.wait (%p4819_p1), %s813_s15, 32  }
 0x204   : > { %3446 = vsyncadd (%p4819_p1), %s813_s15, 4294967264  ;;  %s829_s3 = scalar_lea.sflag [#allocation20], %s4284_s19 }
 0x205   : > { %3448 = dma.done.wait (%p4819_p1), %s829_s3, 1040  }
 0x206   : > { %3450 = vsyncadd (%p4819_p1), %s829_s3, 4294966256  ;;  %s2439_s2 = sshll.u32 %s4298_s5, 6  ;;  %s2440_s28 = sshll.u32 %s4298_s5, 1 }
 0x207   : > { %s4340_s21 = scalar_lea.vmem [#allocation21], %s2439_s2  ;;  %s846_s10 = scalar_lea.sflag [#allocation23], %s4284_s19 }
 0x208   : > { %s4343_s0 = scalar_lea.vmem [#allocation22], %s2440_s28 }
 0x209   : > { %3452 = dma.done.wait (%p4819_p1), %s846_s10, 2080  }
 0x20a   : > { %3454 = vsyncadd (%p4819_p1), %s846_s10, 4294965216  ;;  %s2441_s23 = sshll.u32 %s4298_s5, 7  ;;  %s864_s15 = scalar_lea.sflag [#allocation26], %s4298_s5 }
 0x20b   : > { %s4350_s20 = scalar_lea.vmem [#allocation24], %s2441_s23  ;;  %s866_s3 = scalar_lea.vmem [#allocation25], %s4298_s5 }
 0x20c   : > { %3456 = dma.done.wait (%p4819_p1), %s864_s15, 16  }
 0x20d   : > { %3458 = vsyncadd (%p4819_p1), %s864_s15, 4294967280  ;;  %s4820_s19 = sld [smem:[#allocation42_spill]]  ;;  %s2442_s2 = sshll.u32 %s4287_s11, 3 }
 0x20e   : > { %s4360_s10 = scalar_lea.vmem [#allocation27], %s2442_s2  ;;  %s4821_s8 = sld [smem:[#allocation47_spill]] }
 0x213   : > { %s4727_s28 = sand.u32 1, %s4820_s19  }
 0x214   : > { %s4364_s24 = scalar_lea.vmem [#allocation28], %s4727_s28  ;;  %p2443_p2 = scmp.ne.s32.totalorder %s4821_s8, 0 }
 0x215   : > { %v976_v0 = vld [vmem:[#allocation4] sm:$0x1] (!%p2443_p2)  ;;  %vm977_vm0 = vcmask (!%p2443_p2), 516096   ;;  %v979_v1 = vld [vmem:[%s4291_s26] sm:$0x3] (!%p2443_p2)  ;;  %vm981_vm1 = vcmask (!%p2443_p2), 519168  }
 0x216   : > { %975 = sbr.rel (%p2443_p2) target bundleno = 541 (0x21d), region = 136  ;;  %978 = vst.msk [vmem:[%s4360_s10] sm:$0x1] (!%p2443_p2), %vm977_vm0, %v976_v0  ;;  %v980_v2 = vunpack.c.l.bf16 (!%p2443_p2), %v979_v1  ;;  %vm983_vm2 = vcmask (!%p2443_p2), 518144   ;;  %v3545_v3 = vmov (!%p2443_p2), 0.0  }
 0x217   : > { %984 = vst.msk [vmem:[%s4360_s10 + $0x5] sm:$0x7] (!%p2443_p2), %vm983_vm2, %v3545_v3 }
 0x218   : > { %982 = vst.msk [vmem:[%s4360_s10 + $0x1] sm:$0xf] (!%p2443_p2), %vm981_vm1, %v980_v2 }
 0x21d PF: > { %vm988_vm3 = vcmask 523264   ;;  %v3546_v6 = vmov 0.0   ;;  %v1042_v7 = vld [vmem:[%s4316_s6] sm:$0xff]  ;;  %v3547_v8 = vmov 0   ;;  %v1043_v14 = vld [vmem:[%s4316_s6 + $0x8] sm:$0xff]  ;;  %v1045_v15 = vld [vmem:[%s4316_s6 + $0x18] sm:$0xff]  ;;  %v1439_v60 = vlaneseq }
 0x21e   : > { %1443 = vst.msk [vmem:[#allocation3] sm:$0xff] %vm988_vm3, %v3546_v6  ;;  %2834 = vset.pattern.permute.xlu1 %v3547_v8  ;;  %2835 = vset.pattern.permute.xlu0 %v3547_v8  ;;  %v1046_v16 = vld [vmem:[%s4316_s6 + $0x20] sm:$0xff]  ;;  %v1047_v17 = vld [vmem:[%s4316_s6 + $0x28] sm:$0xff]  ;;  %v1048_v18 = vld [vmem:[%s4316_s6 + $0x30] sm:$0xff]  ;;  %v3548_v62 = vmov -1e+30  }
 0x21f   : > { %v4372_v4 = vld [vmem:[%s4360_s10] sm:$0xff]  ;;  %1068 = vperm.xlu1 %2834, %v1042_v7   ;;  %v1050_v20 = vld [vmem:[%s4316_s6 + $0x40] sm:$0xff]  ;;  %v1440_v61 = vand.u32 127, %v1439_v60  ;;  %vm1426_vm5 = vcmask 64512   ;;  %s4463_s14 = smov 0  }
 0x220   : > { %v989_v5 = vsel %vm988_vm3, %v4372_v4, 0.0  ;;  %v1049_v19 = vld [vmem:[%s4316_s6 + $0x38] sm:$0xff]  ;;  %v2836_v21 = vld [vmem:[%s4313_s13] sm:$0xff]   ;;  %v2837_v22 = vld [vmem:[%s4313_s13 + $0x30] sm:$0xff]  }
 0x221   : > { %990 = vadd.xlane.f32.xlu0 %v989_v5  ;;  %2561 = vmatprep.mubr.msk.bf16.mxu0 %vm988_vm3, %v2836_v21  ;;  %v1051_v23 = vld [vmem:[%s4316_s6 + $0x48] sm:$0xff]  ;;  %v1052_v24 = vld [vmem:[%s4316_s6 + $0x50] sm:$0xff]  ;;  %v1053_v25 = vld [vmem:[%s4316_s6 + $0x58] sm:$0xff]  ;;  %vm1441_vm4 = vcmp.lt.s32.totalorder %v1440_v61, 5 }
 0x222   : > { %2573 = vmatprep.mubr.msk.bf16.mxu1 %vm988_vm3, %v2837_v22  ;;  %v1054_v26 = vld [vmem:[%s4316_s6 + $0x60] sm:$0xff]  ;;  %v1055_v27 = vld [vmem:[%s4316_s6 + $0x68] sm:$0xff]  ;;  %v1057_v28 = vld [vmem:[%s4316_s6 + $0x78] sm:$0xff]  ;;  %v4437_v63 = vsel %vm1441_vm4, 0.0, %v3548_v62 }
 0x223   : > { %1073 = vperm.xlu1 %2834, %v1043_v14   ;;  %v1044_v29 = vld [vmem:[%s4316_s6 + $0x10] sm:$0xff]  ;;  %v1059_v31 = vld [vmem:[%s4316_s6 + $0x88] sm:$0xff]  ;;  %v1058_v32 = vld [vmem:[%s4316_s6 + $0x80] sm:$0xff] }
 0x224   : > { %v1056_v30 = vld [vmem:[%s4316_s6 + $0x70] sm:$0xff]  ;;  %v1061_v33 = vld [vmem:[%s4316_s6 + $0x98] sm:$0xff]  ;;  %v1063_v35 = vld [vmem:[%s4316_s6 + $0xa8] sm:$0xff] }
 0x225   : > { %v1060_v34 = vld [vmem:[%s4316_s6 + $0x90] sm:$0xff]  ;;  %v1062_v36 = vld [vmem:[%s4316_s6 + $0xa0] sm:$0xff]  ;;  %v1065_v37 = vld [vmem:[%s4316_s6 + $0xb8] sm:$0xff] }
 0x226   : > { %v1064_v38 = vld [vmem:[%s4316_s6 + $0xb0] sm:$0xff]  ;;  %v2444_v43 = vld [vmem:[%s772_s12] ss:$0 sm:$0xff]  ;;  %v2839_v51 = vld [vmem:[%s4313_s13 + $0x38] sm:$0xff]  }
 0x227   : > { %1083 = vperm.xlu1 %2834, %v1045_v15   ;;  %v2445_v45 = vld [vmem:[%s780_s4] ss:$0 sm:$0xff]  ;;  %v2840_v52 = vld [vmem:[%s4313_s13 + $0x10] sm:$0xff]   ;;  %v2841_v53 = vld [vmem:[%s4313_s13 + $0x40] sm:$0xff]  }
 0x228   : > { %v2838_v50 = vld [vmem:[%s4313_s13 + $0x8] sm:$0xff]   ;;  %v2842_v54 = vld [vmem:[%s4313_s13 + $0x18] sm:$0xff]   ;;  %v2844_v56 = vld [vmem:[%s4313_s13 + $0x20] sm:$0xff]  }
 0x229   : > { %v2843_v55 = vld [vmem:[%s4313_s13 + $0x48] sm:$0xff]   ;;  %v2845_v57 = vld [vmem:[%s4313_s13 + $0x50] sm:$0xff]   ;;  %v2847_v59 = vld [vmem:[%s4313_s13 + $0x58] sm:$0xff]  }
 0x22a   : > { %v2846_v58 = vld [vmem:[%s4313_s13 + $0x28] sm:$0xff]  }
 0x22b   : > { %1088 = vperm.xlu1 %2834, %v1046_v16  }
 0x22f   : > { %1093 = vperm.xlu1 %2834, %v1047_v17  }
 0x233   : > { %1098 = vperm.xlu1 %2834, %v1048_v18  }
 0x237   : > { %1103 = vperm.xlu1 %2834, %v1049_v19  }
 0x23b   : > { %1108 = vperm.xlu1 %2834, %v1050_v20  }
 0x23f   : > { %1113 = vperm.xlu1 %2834, %v1051_v23  }
 0x243   : > { %1118 = vperm.xlu1 %2834, %v1052_v24  }
 0x247   : > { %1123 = vperm.xlu1 %2834, %v1053_v25  }
 0x24b   : > { %1128 = vperm.xlu1 %2834, %v1054_v26  }
 0x24f   : > { %1133 = vperm.xlu1 %2834, %v1055_v27  }
 0x253   : > { %1143 = vperm.xlu1 %2834, %v1057_v28  }
 0x257   : > { %1153 = vperm.xlu1 %2834, %v1059_v31  }
 0x25b   : > { %1163 = vperm.xlu1 %2834, %v1061_v33  }
 0x25f   : > { %1173 = vperm.xlu1 %2834, %v1063_v35  }
 0x263   : > { %1183 = vperm.xlu1 %2834, %v1065_v37  }
 0x29e   : > { %v1069_v0 = vpop.permute.xlu1 %1068 }
 0x2a2   : > { %v1074_v1 = vpop.permute.xlu1 %1073 }
 0x2a6   : > { %v1084_v2 = vpop.permute.xlu1 %1083 }
 0x2aa   : > { %v1089_v3 = vpop.permute.xlu1 %1088 }
 0x2ae   : > { %v991_v9 = vpop.xlane.xlu0 %990  ;;  %v1094_v5 = vpop.permute.xlu1 %1093 }
 0x2af   : > { %v993_v10 = vmul.f32 0.015625, %v991_v9 }
 0x2b1   : > { %v994_v11 = vsub.f32 %v4372_v4, %v993_v10 }
 0x2b2   : > { %v1099_v6 = vpop.permute.xlu1 %1098 }
 0x2b3   : > { %v995_v12 = vmul.f32 %v994_v11, %v994_v11 }
 0x2b5   : > { %v996_v13 = vsel %vm988_vm3, %v995_v12, 0.0 }
 0x2b6   : > { %997 = vadd.xlane.f32.xlu0 %v996_v13  ;;  %v1104_v7 = vpop.permute.xlu1 %1103 }
 0x2ba   : > { %v4439_v9 = vpop.permute.xlu1 %1108 }
 0x2be   : > { %v4441_v10 = vpop.permute.xlu1 %1113 }
 0x2cc   : > { %1078 = vperm.xlu0 %2835, %v1044_v29  }
 0x2d0   : > { %1138 = vperm.xlu0 %2835, %v1056_v30  }
 0x2d4   : > { %1148 = vperm.xlu0 %2835, %v1058_v32  }
 0x2d8   : > { %1158 = vperm.xlu0 %2835, %v1060_v34  }
 0x2dc   : > { %1168 = vperm.xlu0 %2835, %v1062_v36  }
 0x2e0   : > { %1178 = vperm.xlu0 %2835, %v1064_v38  }
 0x343   : > { %v998_v39 = vpop.xlane.xlu0 %997 }
 0x344   : > { %v999_v40 = vmul.f32 0.015625, %v998_v39 }
 0x346   : > { %v1000_v41 = vadd.f32 1e-06, %v999_v40 }
 0x348   : > { %2848 = vrsqrt.f32 %v1000_v41 }
 0x34b   : > { %v1079_v15 = vpop.permute.xlu0 %1078 }
 0x34f   : > { %v1139_v17 = vpop.permute.xlu0 %1138 }
 0x352   : > { %v2849_v42 = vpop.eup %2848 }
 0x353   : > { %v1002_v44 = vmul.f32 %v2849_v42, %v994_v11  ;;  %v4443_v11 = vpop.permute.xlu1 %1118  ;;  %v1149_v19 = vpop.permute.xlu0 %1148 }
 0x355   : > { %v1009_v46 = vmul.f32 %v2444_v43, %v1002_v44 }
 0x357   : > { %v1016_v47 = vadd.f32 %v2445_v45, %v1009_v46  ;;  %v4445_v12 = vpop.permute.xlu1 %1123  ;;  %v1159_v21 = vpop.permute.xlu0 %1158 }
 0x359   : > { %v1017_v48 = vpack.c.bf16 %v1016_v47, %v1016_v47 }
 0x35b   : > { %2605 = vmatprep.subr.msk.bf16.mxu0 %vm988_vm3, %v1017_v48  ;;  %2606 = vmatprep.subr.msk.bf16.mxu1 %vm988_vm3, %v1017_v48  ;;  %v1283_v49 = vsel %vm988_vm3, %v1017_v48, 0  ;;  %v1129_v13 = vpop.permute.xlu1 %1128  ;;  %v1169_v43 = vpop.permute.xlu0 %1168 }
 0x35c   : > { %2560 = vmatpush3.bf16.xpose.msra.mxu0 %v1283_v49  ;;  %2604 = vmatpush3.bf16.xpose.msra.mxu1 %v1283_v49 }
 0x35f   : > { %v1134_v14 = vpop.permute.xlu1 %1133 }
 0x363   : > { %2562 = vmatmul.mubr.msk.bf16.vlgmr.msra.gmra.mrb[0].mxu0 %vm988_vm3, %v2838_v50  ;;  %2574 = vmatmul.mubr.msk.bf16.vlgmr.msra.gmra.mrb[0].mxu1 %vm988_vm3, %v2839_v51  ;;  %v1144_v16 = vpop.permute.xlu1 %1143 }
 0x364   : > { %2565 = vmatprep.mubr.msk.bf16.mxu0 %vm988_vm3, %v2840_v52  ;;  %2577 = vmatprep.mubr.msk.bf16.mxu1 %vm988_vm3, %v2841_v53 }
 0x367   : > { %v1154_v18 = vpop.permute.xlu1 %1153 }
 0x36b   : > { %2566 = vmatmul.mubr.msk.bf16.gmra.mrb[4].mxu0 %vm988_vm3, %v2842_v54  ;;  %2578 = vmatmul.mubr.msk.bf16.gmra.mrb[4].mxu1 %vm988_vm3, %v2843_v55  ;;  %v1164_v20 = vpop.permute.xlu1 %1163 }
 0x36c   : > { %2569 = vmatprep.mubr.msk.bf16.mxu0 %vm988_vm3, %v2844_v56  ;;  %2581 = vmatprep.mubr.msk.bf16.mxu1 %vm988_vm3, %v2845_v57 }
 0x36f   : > { %v1174_v42 = vpop.permute.xlu1 %1173 }
 0x373   : > { %2570 = vmatmul.mubr.msk.bf16.gmra.mrb[8].mxu0 %vm988_vm3, %v2846_v58  ;;  %2582 = vmatmul.mubr.msk.bf16.gmra.mrb[8].mxu1 %vm988_vm3, %v2847_v59 }
 0x436   : > { %v2563_v22 = vpop.f32.mrb[0].mxu0  ;;  %v2575_v23 = vpop.f32.mrb[0].mxu1 }
 0x437   : > { %v1319_v24 = vpop.f32.mrb[1].mxu0  ;;  %v1367_v25 = vpop.f32.mrb[1].mxu1  ;;  %v1328_v28 = vadd.f32 %v2563_v22, %v1079_v15  ;;  %v1376_v29 = vadd.f32 %v2575_v23, %v1139_v17 }
 0x438   : > { %v2564_v26 = vpop.f32.mrb[2].mxu0  ;;  %v2576_v27 = vpop.f32.mrb[2].mxu1  ;;  %v1320_v34 = vadd.f32 %v1319_v24, %v1069_v0  ;;  %v1368_v35 = vadd.f32 %v1367_v25, %v1129_v13 }
 0x439   : > { %v1331_v30 = vadd.f32 %v2564_v26, %v1084_v2  ;;  %v1379_v31 = vadd.f32 %v2576_v27, %v1144_v16  ;;  %v1322_v32 = vpop.f32.mrb[3].mxu0  ;;  %v1370_v33 = vpop.f32.mrb[3].mxu1 }
 0x43a   : > { %v1323_v36 = vadd.f32 %v1322_v32, %v1074_v1  ;;  %v1371_v37 = vadd.f32 %v1370_v33, %v1134_v14  ;;  %v1184_v2 = vpop.permute.xlu1 %1183  ;;  %v1179_v13 = vpop.permute.xlu0 %1178 }
 0x43b   : > { %v1415_v38 = vpack.c.bf16 %v1331_v30, %v1328_v28  ;;  %v1421_v39 = vpack.c.bf16 %v1379_v31, %v1376_v29 }
 0x43c   : > { %v1414_v40 = vpack.c.bf16 %v1323_v36, %v1320_v34  ;;  %v1420_v41 = vpack.c.bf16 %v1371_v37, %v1368_v35 }
 0x43d   : > { %1428 = vst.msk [vmem:[#allocation2 + $0x8] sm:$0xff] %vm1426_vm5, %v1415_v38  ;;  %1434 = vst.msk [vmem:[#allocation2 + $0x38] sm:$0xff] %vm1426_vm5, %v1421_v39 }
 0x43e   : > { %1427 = vst.msk [vmem:[#allocation2] sm:$0xff] %vm1426_vm5, %v1414_v40  ;;  %1433 = vst.msk [vmem:[#allocation2 + $0x30] sm:$0xff] %vm1426_vm5, %v1420_v41  ;;  %v2567_v44 = vpop.f32.mrb[4].mxu0  ;;  %v2579_v45 = vpop.f32.mrb[4].mxu1 }
 0x43f   : > { %v1335_v46 = vpop.f32.mrb[5].mxu0  ;;  %v1383_v47 = vpop.f32.mrb[5].mxu1  ;;  %v1344_v50 = vadd.f32 %v2567_v44, %v1099_v6  ;;  %v1392_v51 = vadd.f32 %v2579_v45, %v1159_v21 }
 0x440   : > { %v2568_v48 = vpop.f32.mrb[6].mxu0  ;;  %v2580_v49 = vpop.f32.mrb[6].mxu1  ;;  %v1336_v56 = vadd.f32 %v1335_v46, %v1089_v3  ;;  %v1384_v57 = vadd.f32 %v1383_v47, %v1149_v19 }
 0x441   : > { %v1347_v52 = vadd.f32 %v2568_v48, %v1104_v7  ;;  %v1395_v53 = vadd.f32 %v2580_v49, %v1164_v20  ;;  %v1338_v54 = vpop.f32.mrb[7].mxu0  ;;  %v1386_v55 = vpop.f32.mrb[7].mxu1 }
 0x442   : > { %v1339_v58 = vadd.f32 %v1338_v54, %v1094_v5  ;;  %v1387_v59 = vadd.f32 %v1386_v55, %v1154_v18 }
 0x443   : > { %v1417_v61 = vpack.c.bf16 %v1347_v52, %v1344_v50  ;;  %v1423_v62 = vpack.c.bf16 %v1395_v53, %v1392_v51 }
 0x444   : > { %v1416_v0 = vpack.c.bf16 %v1339_v58, %v1336_v56  ;;  %v1422_v1 = vpack.c.bf16 %v1387_v59, %v1384_v57 }
 0x445   : > { %1430 = vst.msk [vmem:[#allocation2 + $0x18] sm:$0xff] %vm1426_vm5, %v1417_v61  ;;  %1436 = vst.msk [vmem:[#allocation2 + $0x48] sm:$0xff] %vm1426_vm5, %v1423_v62 }
 0x446   : > { %1429 = vst.msk [vmem:[#allocation2 + $0x10] sm:$0xff] %vm1426_vm5, %v1416_v0  ;;  %1435 = vst.msk [vmem:[#allocation2 + $0x40] sm:$0xff] %vm1426_vm5, %v1422_v1  ;;  %v2571_v6 = vpop.f32.mrb[8].mxu0  ;;  %v2583_v7 = vpop.f32.mrb[8].mxu1 }
 0x447   : > { %v1351_v3 = vpop.f32.mrb[9].mxu0  ;;  %v1399_v14 = vpop.f32.mrb[9].mxu1  ;;  %v1360_v16 = vadd.f32 %v2571_v6, %v4443_v11  ;;  %v1408_v17 = vadd.f32 %v2583_v7, %v1179_v13 }
 0x448   : > { %v2572_v5 = vpop.f32.mrb[10].mxu0  ;;  %v2584_v15 = vpop.f32.mrb[10].mxu1  ;;  %v1352_v22 = vadd.f32 %v1351_v3, %v4439_v9  ;;  %v1400_v23 = vadd.f32 %v1399_v14, %v1169_v43 }
 0x449   : > { %v1363_v18 = vadd.f32 %v2572_v5, %v4445_v12  ;;  %v1411_v19 = vadd.f32 %v2584_v15, %v1184_v2  ;;  %v1354_v20 = vpop.f32.mrb[11].mxu0  ;;  %v1402_v21 = vpop.f32.mrb[11].mxu1 }
 0x44a   : > { %v1355_v24 = vadd.f32 %v1354_v20, %v4441_v10  ;;  %v1403_v25 = vadd.f32 %v1402_v21, %v1174_v42 }
 0x44b   : > { %v1419_v26 = vpack.c.bf16 %v1363_v18, %v1360_v16  ;;  %v1425_v27 = vpack.c.bf16 %v1411_v19, %v1408_v17 }
 0x44c   : > { %v1418_v28 = vpack.c.bf16 %v1355_v24, %v1352_v22  ;;  %v1424_v29 = vpack.c.bf16 %v1403_v25, %v1400_v23 }
 0x44d   : > { %1432 = vst.msk [vmem:[#allocation2 + $0x28] sm:$0xff] %vm1426_vm5, %v1419_v26  ;;  %1438 = vst.msk [vmem:[#allocation2 + $0x58] sm:$0xff] %vm1426_vm5, %v1425_v27 }
 0x44e   : > { %1431 = vst.msk [vmem:[#allocation2 + $0x20] sm:$0xff] %vm1426_vm5, %v1418_v28  ;;  %1437 = vst.msk [vmem:[#allocation2 + $0x50] sm:$0xff] %vm1426_vm5, %v1424_v29 }
 0x44f LB: >> { %v3549_v9 = vmov 0.0   ;;  %vm3550_vm6 = vmmov 0   ;;  %s4470_s26 = sshll.u32 %s3525_s14, 4  ;;  %vm1484_vm7 = vcmask 130048   ;;  %v1595_v55 = vld [vmem:[#allocation3] sm:$0xff]  ;;  %s1449_s14 = sadd.s32 1, %s3525_s14   ;;  %s3525_s14 = sphi %s4463_s14, %s1449_s14  }
 0x450   : >> { %2585 = vmatprep.subr.bf16.mxu0 %v3549_v9  ;;  %2587 = vmatprep.mubr.msk.bf16.mxu0 %vm3550_vm6, %v3549_v9  ;;  %s1451_s12 = sshra.s32 %s4470_s26, 4  ;;  %s1589_s4 = sshra.s32 %s4470_s26, 3 }
 0x451   : >> { %2591 = vmatprep.subr.bf16.mxu1 %v3549_v9  ;;  %2593 = vmatprep.mubr.msk.bf16.mxu1 %vm3550_vm6, %v3549_v9  ;;  %s2471_s13 = sshll.u32 %s1451_s12, 3  ;;  %s4475_s6 = sshll.u32 %s1589_s4, 2 }
 0x452   : >> { %s1592_s8 = scalar_lea.vmem %s4323_s30, %s4475_s6 [#allocation15]  ;;  %s1454_s23 = scalar_lea.vmem [#allocation2], %s2471_s13 }
 0x453   : >> { %s1456_s15 = sadd.s32 64, %s4470_s26  ;;  %v2850_v48 = vld [vmem:[%s1592_s8] sm:$0xff]   ;;  %p1446_p6 = scmp.ge.s32.totalorder %s1449_s14, 4  }
 0x454   : >> { %s1457_s19 = sshra.s32 %s1456_s15, 4  ;;  %v2479_v0 = vld [vmem:[%s815_s17] ss:$0 sm:$0xff] (%p1446_p6)  ;;  %v2855_v14 = vld [vmem:[%s4340_s21 + $0x4] ss:$8 sps:$4 sm:$0xff] (%p1446_p6)   ;;  %s4822_s30 = scalar_lea.vmem (%p1446_p6), [#allocation18], %s4298_s5 }
 0x455   : >> { %v1455_v10 = vld [vmem:[%s1454_s23] sm:$0xff]  ;;  %s2472_s2 = sshll.u32 %s1457_s19, 3  ;;  %v2858_v5 = vld [vmem:[%s4340_s21 + $0x14] ss:$8 sps:$4 sm:$0xff] (%p1446_p6)   ;;  %v2860_v15 = vld [vmem:[%s4340_s21 + $0x10] ss:$8 sps:$4 sm:$0xff] (%p1446_p6)  }
 0x456   : >> { %1468 = vxpose.xlu0.c.b16.start.end [1/1] (short) (narrow) %v1455_v10, 16  ;;  %s1460_s28 = scalar_lea.vmem [#allocation2], %s2472_s2  ;;  %v2861_v16 = vld [vmem:[%s4340_s21 + $0x24] ss:$8 sps:$4 sm:$0xff] (%p1446_p6)   ;;  %v2863_v17 = vld [vmem:[%s4340_s21 + $0x20] ss:$8 sps:$4 sm:$0xff] (%p1446_p6)  }
 0x457   : >> { %v1461_v11 = vld [vmem:[%s1460_s28] sm:$0xff]  ;;  %s1462_s28 = sadd.s32 128, %s4470_s26  ;;  %v2864_v18 = vld [vmem:[%s4340_s21 + $0x34] ss:$8 sps:$4 sm:$0xff] (%p1446_p6)   ;;  %v2866_v19 = vld [vmem:[%s4340_s21 + $0x30] ss:$8 sps:$4 sm:$0xff] (%p1446_p6)  }
 0x458   : >> { %2586 = vmatpush3.bf16.msra.mxu0 %v1461_v11  ;;  %s1463_s12 = sshra.s32 %s1462_s28, 4  ;;  %v2867_v20 = vld [vmem:[%s4350_s20 + $0x40] sm:$0xff] (%p1446_p6)   ;;  %v2869_v22 = vld [vmem:[%s4350_s20 + $0x48] sm:$0xff] (%p1446_p6)   ;;  %s4823_s17 = scalar_lea.vmem (%p1446_p6), [#allocation19], %s4298_s5  ;;  %vm1997_vm8 = vcmask (%p1446_p6), 516096  }
 0x459   : >> { %2597 = vmatprep.subr.bf16.mxu0 %v3549_v9  ;;  %s2473_s4 = sshll.u32 %s1463_s12, 3  ;;  %v2868_v21 = vld [vmem:[%s4350_s20] sm:$0xff] (%p1446_p6)   ;;  %v2870_v23 = vld [vmem:[%s4350_s20 + $0x8] sm:$0xff] (%p1446_p6)   ;;  %s2017_s6 = sshll.u32 (%p1446_p6), %s4360_s10, 4  ;;  %s4550_s6 = int_to_ptr.vmem [resolvable:$true] %s2017_s6 }
 0x45a   : >> { %s1466_s13 = scalar_lea.vmem [#allocation2], %s2473_s4  ;;  %v2480_v28 = vld [vmem:[%s4822_s30] ss:$0 sm:$0xff] (%p1446_p6)  ;;  %s2032_s23 = sshll.u32 (%p1446_p6), %s4364_s24, 4  ;;  %s4557_s23 = int_to_ptr.vmem [resolvable:$true] %s2032_s23 }
 0x45b   : >> { %v1467_v47 = vld [vmem:[%s1466_s13] sm:$0xff]  ;;  %s4826_s2 = sld [smem:[#allocation71_spill]] (%p1446_p6)  ;;  %s4827_s12 = sld [smem:[#allocation72_spill]] (%p1446_p6) }
 0x45c   : > { %s2000_s13 = scalar_lea.sflag (%p1446_p6), [#allocation6], %s4287_s11  ;;  %s3307_s30 = scalar_lea.vmem (%p1446_p6), %s4550_s6, 128 }
 0x45d   : > { %p3308_p11 = scmp.ne.s32.totalorder (%p1446_p6), %s4550_s6, %s3307_s30  ;;  %p4828_p5 = scmp.ne.s32.totalorder (%p1446_p6), %s4777_s27, 0 }
 0x45f   : > { %p3309_p0 = pnand (%p1446_p6), %p3308_p11, %p4828_p5 }
 0x461   : > { %p3310_p4 = pneg (%p1446_p6), %p3309_p0 }
 0x4bc   : >> { %v1476_v12 = vpop.trf.xlu0 }
 0x4bd   : >> { %2588 = vmatmul.mubr.msk.bf16.vlgmr.msra.gmra.mrb[0].mxu0 %vm1484_vm7, %v1476_v12 }
 0x4be   : >> { %2599 = vmatprep.mubr.msk.bf16.mxu0 %vm3550_vm6, %v3549_v9  ;;  %2598 = vmatpush3.bf16.msra.mxu0 %v2850_v48  ;;  %v2481_v9 = vld [vmem:[%s4823_s17] ss:$0 sm:$0xff] (%p1446_p6)  ;;  %s3551_s17 = smov (%p1446_p6), [#allocation27]  }
 0x4bf   : > { %1767 = vmatprep.subr.bf16.mxu0 (%p1446_p6), %v2855_v14 }
 0x590   : >> { %v1522_v30 = vpop.f32.mrb[0].mxu0 }
 0x591   : >> { %v1528_v31 = vmul.f32 0.25, %v1522_v30  ;;  %v2589_v32 = vpop.f32.mrb[1].mxu0  ;;  %v2871_v30 = vld [vmem:[%s4350_s20 + $0x50] sm:$0xff] (%p1446_p6)  }
 0x592   : >> { %v1525_v33 = vpop.f32.mrb[2].mxu0  ;;  %v2873_v32 = vld [vmem:[%s4350_s20 + $0x58] sm:$0xff] (%p1446_p6)  }
 0x593   : >> { %v1529_v34 = vadd.f32 %v1528_v31, %v4437_v63  ;;  %v2590_v35 = vpop.f32.mrb[3].mxu0  ;;  %v2872_v31 = vld [vmem:[%s4350_s20 + $0x10] sm:$0xff] (%p1446_p6)   ;;  %v2874_v33 = vld [vmem:[%s4350_s20 + $0x18] sm:$0xff] (%p1446_p6)  }
 0x594   : > { %v2876_v35 = vld [vmem:[%s4350_s20 + $0x20] sm:$0xff] (%p1446_p6)  }
 0x595   : >> { %v1530_v36 = vsel %vm1426_vm5, %v1529_v34, -inf }
 0x596   : >> { %1531 = vmax.xlane.f32.xlu0 %v1530_v36  ;;  %v2877_v36 = vld [vmem:[%s4350_s20 + $0x68] sm:$0xff] (%p1446_p6)  }
 0x623   : >> { %v1532_v37 = vpop.xlane.xlu0 %1531 }
 0x624   : >> { %v1533_v38 = vsub.f32 %v1529_v34, %v1532_v37  ;;  %v2875_v34 = vld [vmem:[%s4350_s20 + $0x60] sm:$0xff] (%p1446_p6)   ;;  %v2878_v37 = vld [vmem:[%s4350_s20 + $0x28] sm:$0xff] (%p1446_p6)  }
 0x626   : >> { %v1534_v39 = vmul.f32 1.442695, %v1533_v38  ;;  %v2879_v38 = vld [vmem:[%s4350_s20 + $0x70] sm:$0xff] (%p1446_p6)  }
 0x628   : >> { %2851 = vpow2.f32 %v1534_v39  ;;  %v2880_v39 = vld [vmem:[%s4350_s20 + $0x30] sm:$0xff] (%p1446_p6)  }
 0x632   : >> { %v2852_v40 = vpop.eup %2851 }
 0x633   : >> { %v1536_v41 = vsel %vm1426_vm5, %v2852_v40, 0.0 }
 0x634   : >> { %1537 = vadd.xlane.f32.xlu1 %v1536_v41  ;;  %v2882_v41 = vld [vmem:[%s4350_s20 + $0x38] sm:$0xff] (%p1446_p6)  }
 0x6c1   : >> { %v1538_v42 = vpop.xlane.xlu1 %1537 }
 0x6c2   : >> { %2853 = vrcp.f32 %v1538_v42  ;;  %v1715_v42 = vshrl.u32 (%p1446_p6), %v1439_v60, 7 }
 0x6cc   : >> { %v2854_v43 = vpop.eup %2853 }
 0x6cd   : >> { %v1540_v44 = vmul.f32 %v2854_v43, %v2852_v40  ;;  %v2881_v40 = vld [vmem:[%s4350_s20 + $0x78] sm:$0xff] (%p1446_p6)   ;;  %v1716_v43 = vsub.s32 (%p1446_p6), 0, %v1715_v42  ;;  %s4825_s20 = sld [smem:[#allocation48_spill]] (%p1446_p6) }
 0x6cf   : >> { %v1541_v45 = vpack.c.bf16 %v1540_v44, %v1540_v44  ;;  %v1712_v44 = vld [vmem:[%s4343_s0] sm:$0x3] (%p1446_p6) }
 0x6d1   : >> { %v1546_v46 = vsel %vm1426_vm5, %v1541_v45, 0  ;;  %v1720_v45 = vsub.s32 (%p1446_p6), 1, %v1715_v42 }
 0x6d2   : >> { %2592 = vmatpush3.bf16.xpose.msra.mxu1 %v1546_v46  ;;  %v1717_v46 = vrot.slane (%p1446_p6), %v1712_v44, %v1716_v43 }
 0x6d3   : > { %2537 = vmatprep.subr.bf16.mxu1 (%p1446_p6), %v2867_v20  ;;  %s2509_s26 = sshll.u32 (%p1446_p6), %s4825_s20, 7 }
 0x6d4   : > { %s4547_s28 = scalar_lea.hbm (%p1446_p6), %s4826_s2, %s2509_s26 }
 0x6d9   : >> { %2594 = vmatmul.mubr.msk.bf16.vlgmr.msra.gmra.mrb[0].mxu1 %vm1426_vm5, %v1467_v47  ;;  %v1721_v47 = vrot.slane (%p1446_p6), %v1712_v44, %v1720_v45 }
 0x6da   : > { %2538 = vmatpush3.bf16.msra.mxu1 (%p1446_p6), %v2868_v21 }
 0x6db   : > { %2539 = vmatprep.subr.bf16.mxu1 (%p1446_p6), %v2869_v22 }
 0x6de   : > { %2540 = vmatpush3.bf16.msra.mxu1 (%p1446_p6), %v2870_v23 }
 0x6df   : > { %2541 = vmatprep.subr.bf16.mxu1 (%p1446_p6), %v2871_v30 }
 0x6e2   : > { %2542 = vmatpush3.bf16.msra.mxu1 (%p1446_p6), %v2872_v31 }
 0x6e3   : > { %2543 = vmatprep.subr.bf16.mxu1 (%p1446_p6), %v2873_v32 }
 0x6e6   : > { %2544 = vmatpush3.bf16.msra.mxu1 (%p1446_p6), %v2874_v33 }
 0x6e7   : > { %2545 = vmatprep.subr.bf16.mxu1 (%p1446_p6), %v2875_v34 }
 0x6ea   : > { %2546 = vmatpush3.bf16.msra.mxu1 (%p1446_p6), %v2876_v35 }
 0x6eb   : > { %2547 = vmatprep.subr.bf16.mxu1 (%p1446_p6), %v2877_v36 }
 0x6ee   : > { %2548 = vmatpush3.bf16.msra.mxu1 (%p1446_p6), %v2878_v37 }
 0x6ef   : > { %2549 = vmatprep.subr.bf16.mxu1 (%p1446_p6), %v2879_v38 }
 0x6f2   : > { %2550 = vmatpush3.bf16.msra.mxu1 (%p1446_p6), %v2880_v39 }
 0x6f3   : > { %2551 = vmatprep.subr.bf16.mxu1 (%p1446_p6), %v2881_v40 }
 0x6f6   : > { %2552 = vmatpush3.bf16.msra.mxu1 (%p1446_p6), %v2882_v41 }
 0x7ac   : >> { %v1582_v49 = vpop.f32.mrb[0].mxu1 }
 0x7ad   : >> { %v2595_v50 = vpop.f32.mrb[1].mxu1 }
 0x7ae   : >> { %v1585_v51 = vpop.f32.mrb[2].mxu1 }
 0x7af   : >> { %v1596_v52 = vpack.c.bf16 %v1585_v51, %v1582_v49  ;;  %v2596_v53 = vpop.f32.mrb[3].mxu1 }
 0x7b1   : >> { %1597 = vxpose.xlu1.c.b16.start.end [1/1] (short) (narrow) %v1596_v52, 16 }
 0x817   : >> { %v1605_v54 = vpop.trf.xlu1 }
 0x818   : >> { %2600 = vmatmul.mubr.msk.bf16.vlgmr.msra.gmra.mrb[4].mxu0 %vm1484_vm7, %v1605_v54 }
 0x819   : > { %1799 = vmatprep.mubr.bf16.mxu0 (%p1446_p6), %v3547_v8 }
 0x8e8   : > { %1448 = sbr.rel (!%p1446_p6) target bundleno = 1103 (0x44f), region = 302 }
 0x8eb   : >> { %v1656_v56 = vpop.f32.mrb[4].mxu0 }
 0x8ec   : >> { %v1662_v57 = vadd.f32 %v1656_v56, %v1595_v55  ;;  %v2601_v58 = vpop.f32.mrb[5].mxu0 }
 0x8ed   : >> { %v1659_v59 = vpop.f32.mrb[6].mxu0 }
 0x8ee   : >> { %1663 = vst.msk [vmem:[#allocation3] sm:$0xff] %vm988_vm3, %v1662_v57  ;;  %v2602_v61 = vpop.f32.mrb[7].mxu0 }
 0x8f5   : > { %v1664_v62 = vld [vmem:[#allocation3] sm:$0xff] }
 0x8f6   : > { %v1665_v1 = vadd.f32 %v1664_v62, %v4372_v4  ;;  %v2857_v4 = vld [vmem:[%s4340_s21] ss:$8 sps:$4 sm:$0xff]   ;;  %s4824_s21 = sld [smem:[#allocation47_spill]] }
 0x8f7   : > { %1768 = vmatpush1.bf16.msra.mxu0 %v2857_v4 }
 0x8f8   : > { %v4500_v2 = vadd.f32 %v2479_v0, %v1665_v1  ;;  %1769 = vmatprep.subr.bf16.mxu0 %v2858_v5 }
 0x8fa   : > { %v1676_v13 = vsel %vm988_vm3, %v4500_v2, 0.0 }
 0x8fb   : > { %1677 = vadd.xlane.f32.xlu0 %v1676_v13  ;;  %1770 = vmatpush1.bf16.msra.mxu0 %v2860_v15 }
 0x8fc   : > { %1771 = vmatprep.subr.bf16.mxu0 %v2861_v16  ;;  %s2510_s0 = sshll.u32 %s4824_s21, 1  ;;  %s3311_s21 = sshll.u32 %s3551_s17, 4  ;;  %s3312_s21 = int_to_ptr.vmem [resolvable:$false] %s3311_s21 }
 0x8fd   : > { %s2028_s14 = sadd.s32 %s4825_s20, %s2510_s0  ;;  %s3313_s20 = scalar_lea.vmem %s3312_s21, 256 }
 0x8fe   : > { %s2511_s8 = sshll.u32 %s2028_s14, 4  ;;  %p3314_p8 = scmp.lt.s32.totalorder %s4550_s6, %s3312_s21 }
 0x8ff   : > { %1772 = vmatpush1.bf16.msra.mxu0 %v2863_v17  ;;  %s4555_s4 = scalar_lea.hbm %s4827_s12, %s2511_s8  ;;  %p3315_p7 = scmp.lt.s32.totalorder %s3313_s20, %s3307_s30 }
 0x900   : > { %1773 = vmatprep.subr.bf16.mxu0 %v2864_v18 }
 0x901   : > { %p3316_p10 = por %p3315_p7, %p3314_p8 }
 0x903   : > { %1774 = vmatpush1.bf16.msra.mxu0 %v2866_v19  ;;  %p3317_p3 = pnand %p3316_p10, %p3310_p4 }
 0x988   : > { %v1678_v63 = vpop.xlane.xlu0 %1677 }
 0x989   : > { %v1679_v6 = vmul.f32 0.015625, %v1678_v63 }
 0x98b   : > { %v1680_v7 = vsub.f32 %v4500_v2, %v1679_v6  ;;  %v2491_v6 = vld [vmem:[%s866_s3] ss:$0 sm:$0xff] }
 0x98d   : > { %v1681_v3 = vmul.f32 %v1680_v7, %v1680_v7 }
 0x98f   : > { %v1682_v8 = vsel %vm988_vm3, %v1681_v3, 0.0 }
 0x990   : > { %1683 = vadd.xlane.f32.xlu0 %v1682_v8 }
 0xa1d   : > { %v1684_v24 = vpop.xlane.xlu0 %1683 }
 0xa1e   : > { %v1685_v25 = vmul.f32 0.015625, %v1684_v24 }
 0xa20   : > { %v1686_v26 = vadd.f32 1e-06, %v1685_v25 }
 0xa22   : > { %2883 = vrsqrt.f32 %v1686_v26 }
 0xa2c   : > { %v2884_v27 = vpop.eup %2883 }
 0xa2d   : > { %v1688_v29 = vmul.f32 %v2884_v27, %v1680_v7 }
 0xa2f   : > { %v1695_v10 = vmul.f32 %v2480_v28, %v1688_v29 }
 0xa31   : > { %v1702_v11 = vadd.f32 %v2481_v9, %v1695_v10 }
 0xa33   : > { %v1703_v12 = vpack.c.bf16 %v1702_v11, %v1702_v11 }
 0xa35   : > { %2490 = vmatmul.mubr.msk.bf16.vlgmr.msra.gmra.mrb[0].mxu0 %vm988_vm3, %v1703_v12 }
 0xb08   : > { %v1801_v48 = vpop.f32.mrb[0].mxu0 }
 0xb09   : > { %v1802_v49 = vadd.f32 %v1801_v48, %v1717_v46  ;;  %v1803_v50 = vpop.f32.mrb[1].mxu0 }
 0xb0a   : > { %v1804_v51 = vadd.f32 %v1803_v50, %v1721_v47  ;;  %v1805_v52 = vpop.f32.mrb[2].mxu0 }
 0xb0b   : > { %v1810_v53 = vmul.f32 0.70710677, %v1802_v49  ;;  %v1806_v54 = vpop.f32.mrb[3].mxu0  ;;  %v1808_v57 = vmul.f32 0.5, %v1802_v49 }
 0xb0c   : > { %v1811_v55 = vmul.f32 0.70710677, %v1804_v51  ;;  %v1809_v59 = vmul.f32 0.5, %v1804_v51 }
 0xb0d   : > { %2885 = verf.f32 %v1810_v53 }
 0xb0e   : > { %2887 = verf.f32 %v1811_v55 }
 0xb17   : > { %v2886_v56 = vpop.eup %2885 }
 0xb18   : > { %v2888_v60 = vpop.eup %2887  ;;  %v1814_v58 = vadd.f32 1.0, %v2886_v56 }
 0xb19   : > { %v1815_v61 = vadd.f32 1.0, %v2888_v60 }
 0xb1a   : > { %v1816_v62 = vmul.f32 %v1814_v58, %v1808_v57 }
 0xb1b   : > { %v1817_v0 = vmul.f32 %v1815_v61, %v1809_v59 }
 0xb1c   : > { %v1818_v13 = vpack.c.bf16 %v1816_v62, %v1816_v62 }
 0xb1d   : > { %v1819_v1 = vpack.c.bf16 %v1817_v0, %v1817_v0 }
 0xb1f   : > { %1987 = vmatprep.mubr.bf16.mxu1 %v1819_v1 }
 0xb20   : > { %1988 = vmatmul.mubr.bf16.vlgmr.msra.gmra.mrb[0].mxu1 %v1818_v13 }
 0xbf3   : > { %v2553_v63 = vpop.f32.mrb[0].mxu1 }
 0xbf4   : > { %v2554_v7 = vpop.f32.mrb[1].mxu1 }
 0xbf5   : > { %v2555_v3 = vadd.f32 %v2554_v7, %v2553_v63  ;;  %v2556_v8 = vpop.f32.mrb[2].mxu1 }
 0xbf6   : > { %v2557_v14 = vpop.f32.mrb[3].mxu1 }
 0xbf7   : > { %v1990_v4 = vadd.f32 %v2555_v3, %v2491_v6 }
 0xbf9   : > { %v1995_v5 = vadd.f32 %v1990_v4, %v4500_v2 }
 0xbfb   : > { %1996 = vst.msk [vmem:[%s4360_s10] sm:$0xff] %vm988_vm3, %v1995_v5 }
 0xbfc   : > { %1998 = vst.msk [vmem:[%s4364_s24] sm:$0x1] %vm1997_vm8, %v1995_v5 }
 0xbfd   : > { %3320 = shalt.err (!%p3317_p3)
}
 0xbfe   : > { %s3321_s11 = scalar_lea.hbm %s4547_s28, 128  ;;  %s3325_s0 = scalar_lea.hbm %s4826_s2, 256 }
 0xbff   : > { %p3322_p12 = scmp.ne.s32.totalorder %s4547_s28, %s3321_s11  ;;  %p3326_p1 = scmp.lt.u32.totalorder %s4547_s28, %s4826_s2 }
 0xc00   : > { %p3327_p2 = scmp.lt.u32.totalorder %s3325_s0, %s3321_s11  ;;  %p3329_p11 = scmp.lt.u32.totalorder %s3321_s11, %s4547_s28 }
 0xc01   : > { %p3323_p9 = pnand %p3322_p12, %p4828_p5 }
 0xc02   : > { %p3328_p6 = por %p3327_p2, %p3326_p1 }
 0xc03   : > { %p3324_p13 = pneg %p3323_p9 }
 0xc04   : > { %p3330_p0 = por %p3329_p11, %p3328_p6 }
 0xc06   : > { %p3331_p4 = pnand %p3330_p0, %p3324_p13 }
 0xc08   : > { %3334 = shalt.err (!%p3331_p4)
}
 0xc09   : > { %s4829_s8 = sld [smem:[#allocation42_spill]]  ;;  %s3335_s5 = scalar_lea.vmem %s4557_s23, 16 }
 0xc0a   : > { %2643 = dma.vmem_to_hbm [thread:$0]  (%p4828_p5), %s4550_s6, 128, %s4547_s28, %s2000_s13  }
 0xc0b   : > { %p3336_p8 = scmp.ne.s32.totalorder %s4557_s23, %s3335_s5  ;;  %p4831_p7 = scmp.ne.s32.totalorder %s4782_s18, 0 }
 0xc0c   : > { %s3552_s3 = smov [#allocation28]  }
 0xc0d   : > { %p3337_p10 = pnand %p3336_p8, %p4831_p7  ;;  %s3339_s30 = sshll.u32 %s3552_s3, 4  ;;  %s3340_s30 = int_to_ptr.vmem [resolvable:$false] %s3339_s30 }
 0xc0e   : > { %s3341_s17 = scalar_lea.vmem %s3340_s30, 32  ;;  %p3342_p12 = scmp.lt.s32.totalorder %s4557_s23, %s3340_s30 }
 0xc0f   : > { %s4830_s15 = sand.u32 1, %s4829_s8   ;;  %p3338_p3 = pneg %p3337_p10 }
 0xc10   : > { %s2005_s19 = scalar_lea.sflag [#allocation29], %s4830_s15  ;;  %p3343_p9 = scmp.lt.s32.totalorder %s3341_s17, %s3335_s5 }
 0xc12   : > { %p3344_p13 = por %p3343_p9, %p3342_p12 }
 0xc14   : > { %p3345_p1 = pnand %p3344_p13, %p3338_p3 }
 0xc16   : > { %3348 = shalt.err (!%p3345_p1)
}
 0xc17   : > { %s3349_s27 = scalar_lea.hbm %s4555_s4, 16  ;;  %s3353_s13 = scalar_lea.hbm %s4827_s12, 64 }
 0xc18   : > { %p3350_p5 = scmp.ne.s32.totalorder %s4555_s4, %s3349_s27  ;;  %p3354_p11 = scmp.lt.u32.totalorder %s4555_s4, %s4827_s12 }
 0xc19   : > { %p3355_p0 = scmp.lt.u32.totalorder %s3353_s13, %s3349_s27  ;;  %p3357_p8 = scmp.lt.u32.totalorder %s3349_s27, %s4555_s4 }
 0xc1a   : > { %p3351_p2 = pnand %p3350_p5, %p4831_p7 }
 0xc1b   : > { %p3356_p4 = por %p3355_p0, %p3354_p11 }
 0xc1c   : > { %p3352_p6 = pneg %p3351_p2 }
 0xc1d   : > { %p3358_p10 = por %p3357_p8, %p3356_p4 }
 0xc1f   : > { %p3359_p3 = pnand %p3358_p10, %p3352_p6 }
 0xc21   : > { %3362 = shalt.err (!%p3359_p3)
}
 0xc22   : > { %2644 = dma.vmem_to_hbm [thread:$0]  (%p4831_p7), %s4557_s23, 16, %s4555_s4, %s2005_s19  }
 0xc23 PF: > { %s4832_s11 = sld [smem:[#allocation45_spill]]  ;;  %s4833_s24 = sld [smem:[#allocation54_spill]] }
 0xc24   : > { %p2701_p12 = scmp.ge.s32.totalorder %s3521_s16, 2 }
 0xc29   : > { %s2044_s10 = sand.u32 1, %s4832_s11   ;;  %p4834_p9 = scmp.ne.s32.totalorder %s4833_s24, 0 }
 0xc2a   : > { %s2045_s0 = scalar_lea.sflag [#allocation6], %s2044_s10 }
 0xc2b   : > { %p2692_p13 = pnand %p2701_p12, %p4834_p9 }
 0xc2d   : > { %3460 = dma.done.wait (!%p2692_p13), %s2045_s0, 128  }
 0xc2e   : > { %3462 = vsyncadd (!%p2692_p13), %s2045_s0, 4294967168  ;;  %s4835_s14 = sld [smem:[#allocation41_spill]]  ;;  %s4836_s26 = sld [smem:[#allocation56_spill]] }
 0xc34   : > { %s2053_s8 = sand.u32 1, %s4835_s14   ;;  %p4837_p1 = scmp.ne.s32.totalorder %s4836_s26, 0 }
 0xc35   : > { %s2054_s18 = scalar_lea.sflag [#allocation29], %s2053_s8 }
 0xc36   : > { %p2695_p5 = pnand %p2701_p12, %p4837_p1 }
 0xc38   : > { %3464 = dma.done.wait (!%p2695_p5), %s2054_s18, 16  }
 0xc39   : > { %3466 = vsyncadd (!%p2695_p5), %s2054_s18, 4294967280  ;;  %s54_s16 = sadd.s32 1, %s3521_s16   ;;  %s4839_s18 = sld [smem:[#allocation42_spill]] }
 0xc3a   : > { %p4615_p7 = scmp.ge.s32.totalorder %s54_s16, 6   ;;  %s4840_s19 = sld [smem:[#allocation43_spill]] }
 0xc3b   : > { %s4841_s20 = sld [smem:[#allocation55_spill]]  ;;  %s4842_s4 = sld [smem:[#allocation44_spill]] }
 0xc3c   : > { %s4843_s15 = sld [smem:[#allocation52_spill]]  ;;  %s4844_s5 = sld [smem:[#allocation46_spill]] }
 0xc3d   : > { %s4845_s26 = sld [smem:[#allocation53_spill]]  ;;  %s4846_s28 = sld [smem:[#allocation49_spill]] }
 0xc3e   : > { %s4847_s3 = sld [smem:[#allocation50_spill]]  ;;  %s4848_s30 = sld [smem:[#allocation51_spill]] }
 0xc3f   : > { %s4850_s21 = smov %s3485_s22  ;;  %s4853_s24 = smov %s3497_s25 }
 0xc40   : > { %s4855_s27 = smov %s3513_s29  ;;  %53 = sbr.rel (!%p4615_p7) target bundleno = 42 (0x2a), region = 313 }
 0xc41   : > { %s4851_s22 = smov %s4842_s4 }
 0xc42   : > { %s4852_s23 = smov %s4843_s15  ;;  %s4854_s25 = smov %s4844_s5 }
 0xc44   : > { %s4856_s29 = smov %s4847_s3 }
 0xc47   :  { %2058 = vsyncpa [#allocation5], 1 }
 0xc48   :  { %2060 = vsyncpa [#allocation5 + $0x1], 1 }
 0xc49   :  { %2061 = vsyncpa [#allocation8], 1 }
 0xc4a   :  { %2063 = vsyncpa [#allocation8 + $0x1], 1 }
 0xc4b   :  { %2064 = vsyncpa [#allocation11], 1 }
 0xc4c   :  { %2066 = vsyncpa [#allocation11 + $0x1], 1 }
 0xc4d   :  { %2067 = vsyncpa [#allocation14], 1 }
 0xc4e   :  { %2069 = vsyncpa [#allocation14 + $0x1], 1 }
 0xc4f   :  { %2070 = vsyncpa [#allocation17], 1 }
 0xc50   :  { %2072 = vsyncpa [#allocation17 + $0x1], 1 }
 0xc51   :  { %2073 = vsyncpa [#allocation20], 1 }
 0xc52   :  { %2075 = vsyncpa [#allocation20 + $0x1], 1 }
 0xc53   :  { %2076 = vsyncpa [#allocation23], 1 }
 0xc54   :  { %2078 = vsyncpa [#allocation23 + $0x1], 1 }
 0xc55   :  { %2079 = vsyncpa [#allocation26], 1 }
 0xc56   :  { %2081 = vsyncpa [#allocation26 + $0x1], 1 }
 0xc57   :  { %2082 = vsyncpa [#allocation6], 1 }
 0xc58   :  { %2084 = vsyncpa [#allocation6 + $0x1], 1 }
 0xc59   :  { %2085 = vsyncpa [#allocation29], 1 }
 0xc5a   :  { %2087 = vsyncpa [#allocation29 + $0x1], 1 }

</bundles_post_ra>
